<compile_context>
chip_gen: v7x
topology: tpu7x:2x2x1
jax: 0.10.0
libtpu: 0.0.40
codegen_flags: <defaults>
</compile_context>

<pallas_src>
import functools

import jax
import jax.numpy as jnp
from jax import lax
from jax.experimental import pallas as pl
from jax.experimental.pallas import tpu as pltpu

BN_EPS = 1e-5
IN_DIM = 283
OUT_DIM = 3

# Logical (PyTorch) layer dims: (in_features, out_features).
LAYER_DIMS = [(283, 512), (512, 256), (256, 128), (128, 64), (64, 32), (32, 3)]
# Lane-aligned padded dims used inside the kernel (note: output padded to 128 lanes).
PAD_IN = [384, 512, 256, 128, 128, 128]
PAD_OUT = [512, 256, 128, 128, 128, 128]

VEC_WIDTH = 512      # packed per-feature parameter table width (lanes)
VEC_ROWS = 16        # sublane-aligned row count (11 used)
ROW_B6 = 10          # row index of the output-layer bias

BN_BATCH = 128       # one BatchNorm batch per grid step (fills MXU M on v5e)


def mlp_kernel(x_ref, w1, w2, w3, w4, w5, w6, vec_ref, out_ref, xpad_ref):
    # Zero-pad this BN batch into the lane-aligned f32 scratch (lanes 283..383 = 0),
    # then cast the whole tile to bf16 for the MXU.  Done per step so it is correct
    # under "parallel" grid semantics (no cross-step scratch initialization).
    xpad_ref[...] = jnp.zeros_like(xpad_ref)
    xpad_ref[:, :IN_DIM] = x_ref[...]
    h = xpad_ref[...].astype(jnp.bfloat16)                      # (B, 384) bf16

    for li, w_ref in enumerate((w1, w2, w3, w4, w5)):
        f = PAD_OUT[li]
        # Linear (hidden biases dropped: BN mean subtraction cancels them exactly),
        # bf16 operands, f32 accumulation on the MXU.
        z = jnp.dot(h, w_ref[...], preferred_element_type=jnp.float32)   # (B, f) f32
        gamma = vec_ref[2 * li: 2 * li + 1, :f]                 # (1, f)
        beta = vec_ref[2 * li + 1: 2 * li + 2, :f]              # (1, f)
        # Training-mode BatchNorm1d: batch mean + biased variance (two-pass, centered),
        # folded with the affine transform into one scale/shift FMA, then ReLU.
        mean = jnp.mean(z, axis=0, keepdims=True)
        c = z - mean
        var = jnp.mean(c * c, axis=0, keepdims=True)
        scale = gamma * lax.rsqrt(var + BN_EPS)
        h = jnp.maximum(c * scale + beta, 0.0).astype(jnp.bfloat16)

    # Output layer: plain Linear with bias, lane-dense (128-wide, zero-padded) store.
    b6 = vec_ref[ROW_B6: ROW_B6 + 1, :PAD_OUT[-1]]              # (1, 128)
    out_ref[...] = jnp.dot(h, w6[...], preferred_element_type=jnp.float32) + b6


def pack_params(params):
    """params: flat PyTorch-layout list [w1,b1,g1,be1, ..., w5,b5,g5,be5, w6,b6].

    Returns (lane-aligned bf16 weights list, packed (16,512) f32 per-feature table
    with gamma/beta of the 5 BN layers plus the output bias).  Hidden Linear biases
    are dropped (BatchNorm cancels them exactly).  Padded gamma entries are 1 and
    padded beta/bias entries are 0, so padded feature columns stay exactly zero
    through BN + ReLU and through the padded output lanes.
    """
    idx = 0
    weights = []
    vec = jnp.zeros((VEC_ROWS, VEC_WIDTH), jnp.float32)
    for li, (fan_in, fan_out) in enumerate(LAYER_DIMS):
        w, b = params[idx], params[idx + 1]
        idx += 2
        w = jnp.pad(w, ((0, PAD_IN[li] - fan_in), (0, PAD_OUT[li] - fan_out)))
        weights.append(w.astype(jnp.bfloat16))
        if li < len(LAYER_DIMS) - 1:
            gamma, beta = params[idx], params[idx + 1]
            idx += 2
            g_row = jnp.ones((VEC_WIDTH,), jnp.float32).at[:fan_out].set(gamma.reshape(-1))
            b_row = jnp.zeros((VEC_WIDTH,), jnp.float32).at[:fan_out].set(beta.reshape(-1))
            vec = vec.at[2 * li].set(g_row)
            vec = vec.at[2 * li + 1].set(b_row)
        else:
            b_row = jnp.zeros((VEC_WIDTH,), jnp.float32).at[:fan_out].set(b.reshape(-1))
            vec = vec.at[ROW_B6].set(b_row)
    return weights, vec


@functools.partial(jax.jit, static_argnames=("bn_batch",))
def neural_network_forward(x, weights, vec, *, bn_batch=BN_BATCH):
    """x: (num_batches * bn_batch, 283) f32.  Every consecutive `bn_batch` rows is an
    independent BatchNorm batch (== one forward call of the PyTorch module)."""
    total, in_dim = x.shape
    assert in_dim == IN_DIM and total % bn_batch == 0 and bn_batch % 8 == 0
    num_batches = total // bn_batch

    def resident(shape):        # whole array in VMEM once, reused across grid steps
        return pl.BlockSpec(shape, lambda i: (0, 0))

    grid_spec = pltpu.PrefetchScalarGridSpec(
        num_scalar_prefetch=0,
        grid=(num_batches,),
        in_specs=[pl.BlockSpec((bn_batch, IN_DIM), lambda i: (i, 0))]   # per-step x block
        + [resident(w.shape) for w in weights]                          # weights resident
        + [resident(vec.shape)],                                        # packed table
        out_specs=pl.BlockSpec((bn_batch, PAD_OUT[-1]), lambda i: (i, 0)),
        scratch_shapes=[pltpu.VMEM((bn_batch, PAD_IN[0]), jnp.float32)],
    )

    flops = 2 * total * sum(fi * fo for fi, fo in LAYER_DIMS)
    bytes_accessed = (x.size * 4 + total * PAD_OUT[-1] * 4
                      + sum(w.size * 2 for w in weights) + vec.size * 4)
    transcendentals = num_batches * sum(fo for _, fo in LAYER_DIMS[:-1])

    out = pl.pallas_call(
        mlp_kernel,
        out_shape=jax.ShapeDtypeStruct((total, PAD_OUT[-1]), jnp.float32),
        grid_spec=grid_spec,
        compiler_params=pltpu.CompilerParams(
            dimension_semantics=("parallel",),   # shard BN batches across v7x's 2 TCs
            vmem_limit_bytes=8 * 1024 * 1024,    # ~2 MiB real footprint; keep headroom tight
        ),
        cost_estimate=pl.CostEstimate(flops=flops, transcendentals=transcendentals,
                                      bytes_accessed=bytes_accessed),
    )(x, *weights, vec)
    return out[:, :OUT_DIM]                      # lane-dense store, free wrapper slice


def init_params(key):
    """Deterministic params mirroring the PyTorch module's parameter shapes.

    Linear: weight stored transposed as (in, out), bias as (1, out), U(+-1/sqrt(in))
    (PyTorch default init).  BatchNorm1d gamma/beta get small random perturbations
    around the PyTorch defaults (1, 0) so the affine path is actually exercised."""
    params = []
    for li, (fan_in, fan_out) in enumerate(LAYER_DIMS):
        key, kw, kb, kg, kbe = jax.random.split(key, 5)
        bound = 1.0 / (fan_in ** 0.5)
        w = jax.random.uniform(kw, (fan_in, fan_out), jnp.float32, -bound, bound)
        b = jax.random.uniform(kb, (1, fan_out), jnp.float32, -bound, bound)
        params.extend([w, b])
        if li < len(LAYER_DIMS) - 1:
            gamma = 1.0 + 0.2 * jax.random.uniform(kg, (1, fan_out), jnp.float32, -1.0, 1.0)
            beta = 0.2 * jax.random.uniform(kbe, (1, fan_out), jnp.float32, -1.0, 1.0)
            params.extend([gamma, beta])
    return params


def reference_forward(x, params):
    """Pure-JAX reference in the ORIGINAL formulation (hidden biases kept, explicit
    BatchNorm with two-pass biased variance), unpadded parameters.  Matmul operands
    are cast to bf16 to mirror the kernel's dtype policy."""
    idx = 0
    h = x.astype(jnp.float32)
    for li in range(len(LAYER_DIMS)):
        w, b = params[idx], params[idx + 1]
        idx += 2
        z = jnp.dot(h.astype(jnp.bfloat16), w.astype(jnp.bfloat16),
                    preferred_element_type=jnp.float32) + b
        if li < len(LAYER_DIMS) - 1:
            gamma, beta = params[idx], params[idx + 1]
            idx += 2
            mean = jnp.mean(z, axis=0, keepdims=True)
            var = jnp.mean((z - mean) ** 2, axis=0, keepdims=True)
            z = (z - mean) / jnp.sqrt(var + BN_EPS) * gamma + beta
            h = jnp.maximum(z, 0.0)
        else:
            h = z
    return h


if __name__ == "__main__":
    key = jax.random.PRNGKey(0)
    key, kx = jax.random.split(key)

    bn_batch = BN_BATCH      # one BatchNorm batch per grid step
    num_batches = 2          # two independent BN batches in one pallas_call
    x = jax.random.normal(kx, (num_batches * bn_batch, IN_DIM), jnp.float32)

    params = init_params(key)
    weights, vec = pack_params(params)

    out = neural_network_forward(x, weights, vec, bn_batch=bn_batch)
    out = jax.block_until_ready(out)
    assert out.shape == (num_batches * bn_batch, OUT_DIM)

    # Reference: each bn_batch-row group is one independent forward of the module.
    ref = jnp.concatenate(
        [reference_forward(x[i * bn_batch:(i + 1) * bn_batch], params)
         for i in range(num_batches)], axis=0)
    err = float(jnp.max(jnp.abs(out - ref)))
    assert jnp.allclose(out, ref, atol=5e-3, rtol=5e-3), \
        f"kernel mismatch vs reference (max abs err {err})"

    print("KERNEL_OK")
</pallas_src>

<mosaic_0001>
module attributes {stable_mosaic.version = 11 : i64} {
  func.func @mlp_kernel(%arg0: i32, %arg1: memref<128x283xf32, #tpu.memory_space<vmem>>, %arg2: memref<384x512xbf16, #tpu.memory_space<vmem>>, %arg3: memref<512x256xbf16, #tpu.memory_space<vmem>>, %arg4: memref<256x128xbf16, #tpu.memory_space<vmem>>, %arg5: memref<128x128xbf16, #tpu.memory_space<vmem>>, %arg6: memref<128x128xbf16, #tpu.memory_space<vmem>>, %arg7: memref<128x128xbf16, #tpu.memory_space<vmem>>, %arg8: memref<16x512xf32, #tpu.memory_space<vmem>>, %arg9: memref<128x128xf32, #tpu.memory_space<vmem>>, %arg10: memref<128x384xf32, #tpu.memory_space<vmem>>) attributes {dimension_semantics = [#tpu.dimension_semantics<parallel>], iteration_bounds = array<i64: 2>, scalar_prefetch = 0 : i64, scratch_operands = 1 : i64, tpu.core_type = #tpu.core_type<tc>, window_params = [{transform_indices = @transform_0, window_bounds = array<i64: 128, 283>}, {pipeline_mode = #tpu.pipeline_mode<synchronous>, transform_indices = @transform_1, window_bounds = array<i64: 384, 512>}, {pipeline_mode = #tpu.pipeline_mode<synchronous>, transform_indices = @transform_2, window_bounds = array<i64: 512, 256>}, {pipeline_mode = #tpu.pipeline_mode<synchronous>, transform_indices = @transform_3, window_bounds = array<i64: 256, 128>}, {pipeline_mode = #tpu.pipeline_mode<synchronous>, transform_indices = @transform_4, window_bounds = array<i64: 128, 128>}, {pipeline_mode = #tpu.pipeline_mode<synchronous>, transform_indices = @transform_5, window_bounds = array<i64: 128, 128>}, {pipeline_mode = #tpu.pipeline_mode<synchronous>, transform_indices = @transform_6, window_bounds = array<i64: 128, 128>}, {pipeline_mode = #tpu.pipeline_mode<synchronous>, transform_indices = @transform_7, window_bounds = array<i64: 16, 512>}, {transform_indices = @transform_8, window_bounds = array<i64: 128, 128>}]} {
    %cst = arith.constant 0.000000e+00 : f32
    %0 = vector.broadcast %cst : f32 to vector<128x384xf32>
    %c0 = arith.constant 0 : index
    %c0_0 = arith.constant 0 : index
    %1 = vector.load %arg10[%c0, %c0_0] : memref<128x384xf32, #tpu.memory_space<vmem>>, vector<128x384xf32>
    tpu.vector_store %arg10[%c0, %c0_0], %0 {strides = array<i32>} : memref<128x384xf32, #tpu.memory_space<vmem>>, vector<128x384xf32>,
    %c0_1 = arith.constant 0 : index
    %c0_2 = arith.constant 0 : index
    %2 = vector.load %arg1[%c0_1, %c0_2] : memref<128x283xf32, #tpu.memory_space<vmem>>, vector<128x283xf32>
    %c0_3 = arith.constant 0 : index
    %c0_4 = arith.constant 0 : index
    %3 = vector.load %arg10[%c0_3, %c0_4] : memref<128x384xf32, #tpu.memory_space<vmem>>, vector<128x283xf32>
    tpu.vector_store %arg10[%c0_3, %c0_4], %2 {strides = array<i32>} : memref<128x384xf32, #tpu.memory_space<vmem>>, vector<128x283xf32>,
    %c0_5 = arith.constant 0 : index
    %c0_6 = arith.constant 0 : index
    %4 = vector.load %arg10[%c0_5, %c0_6] : memref<128x384xf32, #tpu.memory_space<vmem>>, vector<128x384xf32>
    %5 = arith.truncf %4 : vector<128x384xf32> to vector<128x384xbf16>
    %c0_7 = arith.constant 0 : index
    %c0_8 = arith.constant 0 : index
    %6 = vector.load %arg2[%c0_7, %c0_8] : memref<384x512xbf16, #tpu.memory_space<vmem>>, vector<384x512xbf16>
    %cst_9 = arith.constant dense<0.000000e+00> : vector<128x512xf32>
    %7 = tpu.matmul %5, %6, %cst_9 {dimension_numbers = #tpu.dot_dimension_numbers<[1], [0], [0], [1], [0, 0, 1, 1], [], []>} : vector<128x384xbf16>, vector<384x512xbf16>, vector<128x512xf32> -> vector<128x512xf32>
    %c0_10 = arith.constant 0 : index
    %c0_11 = arith.constant 0 : index
    %8 = vector.load %arg8[%c0_10, %c0_11] : memref<16x512xf32, #tpu.memory_space<vmem>>, vector<1x512xf32>
    %c1 = arith.constant 1 : index
    %c0_12 = arith.constant 0 : index
    %9 = vector.load %arg8[%c1, %c0_12] : memref<16x512xf32, #tpu.memory_space<vmem>>, vector<1x512xf32>
    %cst_13 = arith.constant dense<0.000000e+00> : vector<512xf32>
    %10 = vector.multi_reduction <add>, %7, %cst_13 [0] : vector<128x512xf32> to vector<512xf32>
    %11 = vector.shape_cast %10 : vector<512xf32> to vector<1x512xf32>
    %cst_14 = arith.constant 1.280000e+02 : f32
    %12 = vector.broadcast %cst_14 : f32 to vector<1x512xf32>
    %13 = arith.divf %11, %12 : vector<1x512xf32>
    %14 = vector.broadcast %13 : vector<1x512xf32> to vector<128x512xf32>
    %15 = arith.subf %7, %14 : vector<128x512xf32>
    %16 = arith.mulf %15, %15 : vector<128x512xf32>
    %cst_15 = arith.constant dense<0.000000e+00> : vector<512xf32>
    %17 = vector.multi_reduction <add>, %16, %cst_15 [0] : vector<128x512xf32> to vector<512xf32>
    %18 = vector.shape_cast %17 : vector<512xf32> to vector<1x512xf32>
    %cst_16 = arith.constant 1.280000e+02 : f32
    %19 = vector.broadcast %cst_16 : f32 to vector<1x512xf32>
    %20 = arith.divf %18, %19 : vector<1x512xf32>
    %cst_17 = arith.constant 9.99999974E-6 : f32
    %21 = vector.broadcast %cst_17 : f32 to vector<1x512xf32>
    %22 = arith.addf %20, %21 : vector<1x512xf32>
    %23 = math.rsqrt %22 : vector<1x512xf32>
    %24 = arith.mulf %8, %23 : vector<1x512xf32>
    %25 = vector.broadcast %24 : vector<1x512xf32> to vector<128x512xf32>
    %26 = arith.mulf %15, %25 : vector<128x512xf32>
    %27 = vector.broadcast %9 : vector<1x512xf32> to vector<128x512xf32>
    %28 = arith.addf %26, %27 : vector<128x512xf32>
    %cst_18 = arith.constant 0.000000e+00 : f32
    %29 = vector.broadcast %cst_18 : f32 to vector<128x512xf32>
    %30 = arith.maximumf %28, %29 : vector<128x512xf32>
    %31 = arith.truncf %30 : vector<128x512xf32> to vector<128x512xbf16>
    %c0_19 = arith.constant 0 : index
    %c0_20 = arith.constant 0 : index
    %32 = vector.load %arg3[%c0_19, %c0_20] : memref<512x256xbf16, #tpu.memory_space<vmem>>, vector<512x256xbf16>
    %cst_21 = arith.constant dense<0.000000e+00> : vector<128x256xf32>
    %33 = tpu.matmul %31, %32, %cst_21 {dimension_numbers = #tpu.dot_dimension_numbers<[1], [0], [0], [1], [0, 0, 1, 1], [], []>} : vector<128x512xbf16>, vector<512x256xbf16>, vector<128x256xf32> -> vector<128x256xf32>
    %c2 = arith.constant 2 : index
    %c0_22 = arith.constant 0 : index
    %34 = vector.load %arg8[%c2, %c0_22] : memref<16x512xf32, #tpu.memory_space<vmem>>, vector<1x256xf32>
    %c3 = arith.constant 3 : index
    %c0_23 = arith.constant 0 : index
    %35 = vector.load %arg8[%c3, %c0_23] : memref<16x512xf32, #tpu.memory_space<vmem>>, vector<1x256xf32>
    %cst_24 = arith.constant dense<0.000000e+00> : vector<256xf32>
    %36 = vector.multi_reduction <add>, %33, %cst_24 [0] : vector<128x256xf32> to vector<256xf32>
    %37 = vector.shape_cast %36 : vector<256xf32> to vector<1x256xf32>
    %cst_25 = arith.constant 1.280000e+02 : f32
    %38 = vector.broadcast %cst_25 : f32 to vector<1x256xf32>
    %39 = arith.divf %37, %38 : vector<1x256xf32>
    %40 = vector.broadcast %39 : vector<1x256xf32> to vector<128x256xf32>
    %41 = arith.subf %33, %40 : vector<128x256xf32>
    %42 = arith.mulf %41, %41 : vector<128x256xf32>
    %cst_26 = arith.constant dense<0.000000e+00> : vector<256xf32>
    %43 = vector.multi_reduction <add>, %42, %cst_26 [0] : vector<128x256xf32> to vector<256xf32>
    %44 = vector.shape_cast %43 : vector<256xf32> to vector<1x256xf32>
    %cst_27 = arith.constant 1.280000e+02 : f32
    %45 = vector.broadcast %cst_27 : f32 to vector<1x256xf32>
    %46 = arith.divf %44, %45 : vector<1x256xf32>
    %cst_28 = arith.constant 9.99999974E-6 : f32
    %47 = vector.broadcast %cst_28 : f32 to vector<1x256xf32>
    %48 = arith.addf %46, %47 : vector<1x256xf32>
    %49 = math.rsqrt %48 : vector<1x256xf32>
    %50 = arith.mulf %34, %49 : vector<1x256xf32>
    %51 = vector.broadcast %50 : vector<1x256xf32> to vector<128x256xf32>
    %52 = arith.mulf %41, %51 : vector<128x256xf32>
    %53 = vector.broadcast %35 : vector<1x256xf32> to vector<128x256xf32>
    %54 = arith.addf %52, %53 : vector<128x256xf32>
    %cst_29 = arith.constant 0.000000e+00 : f32
    %55 = vector.broadcast %cst_29 : f32 to vector<128x256xf32>
    %56 = arith.maximumf %54, %55 : vector<128x256xf32>
    %57 = arith.truncf %56 : vector<128x256xf32> to vector<128x256xbf16>
    %c0_30 = arith.constant 0 : index
    %c0_31 = arith.constant 0 : index
    %58 = vector.load %arg4[%c0_30, %c0_31] : memref<256x128xbf16, #tpu.memory_space<vmem>>, vector<256x128xbf16>
    %cst_32 = arith.constant dense<0.000000e+00> : vector<128x128xf32>
    %59 = tpu.matmul %57, %58, %cst_32 {dimension_numbers = #tpu.dot_dimension_numbers<[1], [0], [0], [1], [0, 0, 1, 1], [], []>} : vector<128x256xbf16>, vector<256x128xbf16>, vector<128x128xf32> -> vector<128x128xf32>
    %c4 = arith.constant 4 : index
    %c0_33 = arith.constant 0 : index
    %60 = vector.load %arg8[%c4, %c0_33] : memref<16x512xf32, #tpu.memory_space<vmem>>, vector<1x128xf32>
    %c5 = arith.constant 5 : index
    %c0_34 = arith.constant 0 : index
    %61 = vector.load %arg8[%c5, %c0_34] : memref<16x512xf32, #tpu.memory_space<vmem>>, vector<1x128xf32>
    %cst_35 = arith.constant dense<0.000000e+00> : vector<128xf32>
    %62 = vector.multi_reduction <add>, %59, %cst_35 [0] : vector<128x128xf32> to vector<128xf32>
    %63 = vector.shape_cast %62 : vector<128xf32> to vector<1x128xf32>
    %cst_36 = arith.constant 1.280000e+02 : f32
    %64 = vector.broadcast %cst_36 : f32 to vector<1x128xf32>
    %65 = arith.divf %63, %64 : vector<1x128xf32>
    %66 = vector.broadcast %65 : vector<1x128xf32> to vector<128x128xf32>
    %67 = arith.subf %59, %66 : vector<128x128xf32>
    %68 = arith.mulf %67, %67 : vector<128x128xf32>
    %cst_37 = arith.constant dense<0.000000e+00> : vector<128xf32>
    %69 = vector.multi_reduction <add>, %68, %cst_37 [0] : vector<128x128xf32> to vector<128xf32>
    %70 = vector.shape_cast %69 : vector<128xf32> to vector<1x128xf32>
    %cst_38 = arith.constant 1.280000e+02 : f32
    %71 = vector.broadcast %cst_38 : f32 to vector<1x128xf32>
    %72 = arith.divf %70, %71 : vector<1x128xf32>
    %cst_39 = arith.constant 9.99999974E-6 : f32
    %73 = vector.broadcast %cst_39 : f32 to vector<1x128xf32>
    %74 = arith.addf %72, %73 : vector<1x128xf32>
    %75 = math.rsqrt %74 : vector<1x128xf32>
    %76 = arith.mulf %60, %75 : vector<1x128xf32>
    %77 = vector.broadcast %76 : vector<1x128xf32> to vector<128x128xf32>
    %78 = arith.mulf %67, %77 : vector<128x128xf32>
    %79 = vector.broadcast %61 : vector<1x128xf32> to vector<128x128xf32>
    %80 = arith.addf %78, %79 : vector<128x128xf32>
    %cst_40 = arith.constant 0.000000e+00 : f32
    %81 = vector.broadcast %cst_40 : f32 to vector<128x128xf32>
    %82 = arith.maximumf %80, %81 : vector<128x128xf32>
    %83 = arith.truncf %82 : vector<128x128xf32> to vector<128x128xbf16>
    %c0_41 = arith.constant 0 : index
    %c0_42 = arith.constant 0 : index
    %84 = vector.load %arg5[%c0_41, %c0_42] : memref<128x128xbf16, #tpu.memory_space<vmem>>, vector<128x128xbf16>
    %cst_43 = arith.constant dense<0.000000e+00> : vector<128x128xf32>
    %85 = tpu.matmul %83, %84, %cst_43 {dimension_numbers = #tpu.dot_dimension_numbers<[1], [0], [0], [1], [0, 0, 1, 1], [], []>} : vector<128x128xbf16>, vector<128x128xbf16>, vector<128x128xf32> -> vector<128x128xf32>
    %c6 = arith.constant 6 : index
    %c0_44 = arith.constant 0 : index
    %86 = vector.load %arg8[%c6, %c0_44] : memref<16x512xf32, #tpu.memory_space<vmem>>, vector<1x128xf32>
    %c7 = arith.constant 7 : index
    %c0_45 = arith.constant 0 : index
    %87 = vector.load %arg8[%c7, %c0_45] : memref<16x512xf32, #tpu.memory_space<vmem>>, vector<1x128xf32>
    %cst_46 = arith.constant dense<0.000000e+00> : vector<128xf32>
    %88 = vector.multi_reduction <add>, %85, %cst_46 [0] : vector<128x128xf32> to vector<128xf32>
    %89 = vector.shape_cast %88 : vector<128xf32> to vector<1x128xf32>
    %cst_47 = arith.constant 1.280000e+02 : f32
    %90 = vector.broadcast %cst_47 : f32 to vector<1x128xf32>
    %91 = arith.divf %89, %90 : vector<1x128xf32>
    %92 = vector.broadcast %91 : vector<1x128xf32> to vector<128x128xf32>
    %93 = arith.subf %85, %92 : vector<128x128xf32>
    %94 = arith.mulf %93, %93 : vector<128x128xf32>
    %cst_48 = arith.constant dense<0.000000e+00> : vector<128xf32>
    %95 = vector.multi_reduction <add>, %94, %cst_48 [0] : vector<128x128xf32> to vector<128xf32>
    %96 = vector.shape_cast %95 : vector<128xf32> to vector<1x128xf32>
    %cst_49 = arith.constant 1.280000e+02 : f32
    %97 = vector.broadcast %cst_49 : f32 to vector<1x128xf32>
    %98 = arith.divf %96, %97 : vector<1x128xf32>
    %cst_50 = arith.constant 9.99999974E-6 : f32
    %99 = vector.broadcast %cst_50 : f32 to vector<1x128xf32>
    %100 = arith.addf %98, %99 : vector<1x128xf32>
    %101 = math.rsqrt %100 : vector<1x128xf32>
    %102 = arith.mulf %86, %101 : vector<1x128xf32>
    %103 = vector.broadcast %102 : vector<1x128xf32> to vector<128x128xf32>
    %104 = arith.mulf %93, %103 : vector<128x128xf32>
    %105 = vector.broadcast %87 : vector<1x128xf32> to vector<128x128xf32>
    %106 = arith.addf %104, %105 : vector<128x128xf32>
    %cst_51 = arith.constant 0.000000e+00 : f32
    %107 = vector.broadcast %cst_51 : f32 to vector<128x128xf32>
    %108 = arith.maximumf %106, %107 : vector<128x128xf32>
    %109 = arith.truncf %108 : vector<128x128xf32> to vector<128x128xbf16>
    %c0_52 = arith.constant 0 : index
    %c0_53 = arith.constant 0 : index
    %110 = vector.load %arg6[%c0_52, %c0_53] : memref<128x128xbf16, #tpu.memory_space<vmem>>, vector<128x128xbf16>
    %cst_54 = arith.constant dense<0.000000e+00> : vector<128x128xf32>
    %111 = tpu.matmul %109, %110, %cst_54 {dimension_numbers = #tpu.dot_dimension_numbers<[1], [0], [0], [1], [0, 0, 1, 1], [], []>} : vector<128x128xbf16>, vector<128x128xbf16>, vector<128x128xf32> -> vector<128x128xf32>
    %c8 = arith.constant 8 : index
    %c0_55 = arith.constant 0 : index
    %112 = vector.load %arg8[%c8, %c0_55] : memref<16x512xf32, #tpu.memory_space<vmem>>, vector<1x128xf32>
    %c9 = arith.constant 9 : index
    %c0_56 = arith.constant 0 : index
    %113 = vector.load %arg8[%c9, %c0_56] : memref<16x512xf32, #tpu.memory_space<vmem>>, vector<1x128xf32>
    %cst_57 = arith.constant dense<0.000000e+00> : vector<128xf32>
    %114 = vector.multi_reduction <add>, %111, %cst_57 [0] : vector<128x128xf32> to vector<128xf32>
    %115 = vector.shape_cast %114 : vector<128xf32> to vector<1x128xf32>
    %cst_58 = arith.constant 1.280000e+02 : f32
    %116 = vector.broadcast %cst_58 : f32 to vector<1x128xf32>
    %117 = arith.divf %115, %116 : vector<1x128xf32>
    %118 = vector.broadcast %117 : vector<1x128xf32> to vector<128x128xf32>
    %119 = arith.subf %111, %118 : vector<128x128xf32>
    %120 = arith.mulf %119, %119 : vector<128x128xf32>
    %cst_59 = arith.constant dense<0.000000e+00> : vector<128xf32>
    %121 = vector.multi_reduction <add>, %120, %cst_59 [0] : vector<128x128xf32> to vector<128xf32>
    %122 = vector.shape_cast %121 : vector<128xf32> to vector<1x128xf32>
    %cst_60 = arith.constant 1.280000e+02 : f32
    %123 = vector.broadcast %cst_60 : f32 to vector<1x128xf32>
    %124 = arith.divf %122, %123 : vector<1x128xf32>
    %cst_61 = arith.constant 9.99999974E-6 : f32
    %125 = vector.broadcast %cst_61 : f32 to vector<1x128xf32>
    %126 = arith.addf %124, %125 : vector<1x128xf32>
    %127 = math.rsqrt %126 : vector<1x128xf32>
    %128 = arith.mulf %112, %127 : vector<1x128xf32>
    %129 = vector.broadcast %128 : vector<1x128xf32> to vector<128x128xf32>
    %130 = arith.mulf %119, %129 : vector<128x128xf32>
    %131 = vector.broadcast %113 : vector<1x128xf32> to vector<128x128xf32>
    %132 = arith.addf %130, %131 : vector<128x128xf32>
    %cst_62 = arith.constant 0.000000e+00 : f32
    %133 = vector.broadcast %cst_62 : f32 to vector<128x128xf32>
    %134 = arith.maximumf %132, %133 : vector<128x128xf32>
    %135 = arith.truncf %134 : vector<128x128xf32> to vector<128x128xbf16>
    %c10 = arith.constant 10 : index
    %c0_63 = arith.constant 0 : index
    %136 = vector.load %arg8[%c10, %c0_63] : memref<16x512xf32, #tpu.memory_space<vmem>>, vector<1x128xf32>
    %c0_64 = arith.constant 0 : index
    %c0_65 = arith.constant 0 : index
    %137 = vector.load %arg7[%c0_64, %c0_65] : memref<128x128xbf16, #tpu.memory_space<vmem>>, vector<128x128xbf16>
    %cst_66 = arith.constant dense<0.000000e+00> : vector<128x128xf32>
    %138 = tpu.matmul %135, %137, %cst_66 {dimension_numbers = #tpu.dot_dimension_numbers<[1], [0], [0], [1], [0, 0, 1, 1], [], []>} : vector<128x128xbf16>, vector<128x128xbf16>, vector<128x128xf32> -> vector<128x128xf32>
    %139 = vector.broadcast %136 : vector<1x128xf32> to vector<128x128xf32>
    %140 = arith.addf %138, %139 : vector<128x128xf32>
    %c0_67 = arith.constant 0 : index
    %c0_68 = arith.constant 0 : index
    %141 = vector.load %arg9[%c0_67, %c0_68] : memref<128x128xf32, #tpu.memory_space<vmem>>, vector<128x128xf32>
    tpu.vector_store %arg9[%c0_67, %c0_68], %140 {strides = array<i32>} : memref<128x128xf32, #tpu.memory_space<vmem>>, vector<128x128xf32>,
    return
  }
  func.func @transform_0(%arg0: i32) -> (i32, i32) {
    %c0_i32 = arith.constant 0 : i32
    %c0_i32_0 = arith.constant 0 : i32
    return %arg0, %c0_i32 : i32, i32
  }
  func.func @transform_1(%arg0: i32) -> (i32, i32) {
    %c0_i32 = arith.constant 0 : i32
    %c0_i32_0 = arith.constant 0 : i32
    %c0_i32_1 = arith.constant 0 : i32
    return %c0_i32, %c0_i32_0 : i32, i32
  }
  func.func @transform_2(%arg0: i32) -> (i32, i32) {
    %c0_i32 = arith.constant 0 : i32
    %c0_i32_0 = arith.constant 0 : i32
    %c0_i32_1 = arith.constant 0 : i32
    return %c0_i32, %c0_i32_0 : i32, i32
  }
  func.func @transform_3(%arg0: i32) -> (i32, i32) {
    %c0_i32 = arith.constant 0 : i32
    %c0_i32_0 = arith.constant 0 : i32
    %c0_i32_1 = arith.constant 0 : i32
    return %c0_i32, %c0_i32_0 : i32, i32
  }
  func.func @transform_4(%arg0: i32) -> (i32, i32) {
    %c0_i32 = arith.constant 0 : i32
    %c0_i32_0 = arith.constant 0 : i32
    %c0_i32_1 = arith.constant 0 : i32
    return %c0_i32, %c0_i32_0 : i32, i32
  }
  func.func @transform_5(%arg0: i32) -> (i32, i32) {
    %c0_i32 = arith.constant 0 : i32
    %c0_i32_0 = arith.constant 0 : i32
    %c0_i32_1 = arith.constant 0 : i32
    return %c0_i32, %c0_i32_0 : i32, i32
  }
  func.func @transform_6(%arg0: i32) -> (i32, i32) {
    %c0_i32 = arith.constant 0 : i32
    %c0_i32_0 = arith.constant 0 : i32
    %c0_i32_1 = arith.constant 0 : i32
    return %c0_i32, %c0_i32_0 : i32, i32
  }
  func.func @transform_7(%arg0: i32) -> (i32, i32) {
    %c0_i32 = arith.constant 0 : i32
    %c0_i32_0 = arith.constant 0 : i32
    %c0_i32_1 = arith.constant 0 : i32
    return %c0_i32, %c0_i32_0 : i32, i32
  }
  func.func @transform_8(%arg0: i32) -> (i32, i32) {
    %c0_i32 = arith.constant 0 : i32
    %c0_i32_0 = arith.constant 0 : i32
    return %arg0, %c0_i32 : i32, i32
  }
}

</mosaic_0001>

<bundles_post_ra>
// kernel: neural_network_forward.1
= control target key start
LH: loop header
LB: loop body
LE: loop exit
PB: predicated region body
PF: predicated region fallthrough
CT: control target
= control target key end

     0   :  { %13 = vsyncpa [#allocation4], 0  ;;  %s7582_s0 = inlined_call_operand.vmem [shape: f32[256,283], index: 0, kind: input, shape index: {}]   ;;  %s7583_s1 = inlined_call_operand.vmem [shape: bf16[384,512], index: 1, kind: input, shape index: {}]   ;;  %s7584_s2 = inlined_call_operand.vmem [shape: bf16[512,256], index: 2, kind: input, shape index: {}]   ;;  %s7585_s3 = inlined_call_operand.hbm [shape: bf16[256,128], index: 3, kind: input, shape index: {}]   ;;  %s7586_s4 = inlined_call_operand.vmem [shape: bf16[128,128], index: 4, kind: input, shape index: {}]   ;;  %s7587_s5 = inlined_call_operand.hbm [shape: bf16[128,128], index: 5, kind: input, shape index: {}]   ;;  %s7588_s6 = inlined_call_operand.hbm [shape: bf16[128,128], index: 6, kind: input, shape index: {}]   ;;  %s7589_s7 = inlined_call_operand.hbm [shape: f32[16,512], index: 7, kind: input, shape index: {}]   ;;  %s7590_s8 = inlined_call_operand.vmem [shape: f32[256,128], index: 8, kind: output, shape index: {}]  }
   0x1   :  { %14 = vsyncpa [#allocation6], 0 }
   0x2   :  { %15 = vsyncpa [#allocation9], 0  ;;  %s5467_s27 = smov 0  }
   0x3 LB: > { %s4385_s28 = sadd.s32 4294967295, %s5409_s27   ;;  %p4387_p0 = scmp.ge.s32.totalorder %s5409_s27, 1  ;;  %s5409_s27 = sphi %s5467_s27, %s21_s27  }
   0x4   : > { %p225_p1 = scmp.lt.s32.totalorder %s5409_s27, 3  ;;  %p5477_p2 = scmp.eq.s32.totalorder %s4385_s28, 0 }
   0x5   : > { %s5411_s9 = smov [#allocation5]   ;;  %s5412_s11 = smov [#allocation3]  }
   0x6   : > { %s7650_s29 = scalar_select %p5477_p2, 1, 0 }
   0x7   : > { %p5481_p3 = pnand %p4387_p0, %p225_p1  ;;  %s259_s10 = sshll.u32 %s5411_s9, 4  ;;  %s5485_s10 = int_to_ptr.vmem [resolvable:$true] %s259_s10 }
   0x8   : > { %s243_s12 = sshll.u32 %s5412_s11, 4  ;;  %s5413_s14 = smov [#allocation7]   ;;  %s5489_s12 = int_to_ptr.vmem [resolvable:$true] %s243_s12 }
   0x9   : > { %s7651_s30 = scalar_select %p5481_p3, 1, 0 }
   0xa   : > { %p4941_p4 = pneg %p5481_p3  ;;  %s272_s15 = sshll.u32 %s5413_s14, 4  ;;  %s5497_s15 = int_to_ptr.vmem [resolvable:$true] %s272_s15 }
   0xb   : > { %s5414_s16 = smov [#allocation8]   ;;  %s5279_s20 = scalar_lea.hbm %s7587_s5, 1024 }
   0xc   : > { %p5493_p5 = pnand %p5477_p2, %p4941_p4  ;;  %s5499_s17 = sshll.u32 %s5414_s16, 4  ;;  %s286_s17 = int_to_ptr.vmem [resolvable:$true] %s5499_s17 }
   0xd   : > { %p5280_p6 = scmp.ne.s32.totalorder %s7587_s5, %s5279_s20  ;;  %p5286_p10 = scmp.lt.u32.totalorder %s5279_s20, %s7587_s5 }
   0xe   : > { %p5509_p7 = pneg %p5493_p5 }
  0x10   : > { %p5282_p8 = pnand %p5509_p7, %p5280_p6 }
  0x12   : > { %p5283_p9 = pneg %p5282_p8 }
  0x14   : > { %p5288_p11 = pnand %p5286_p10, %p5283_p9 }
  0x16   : > { %5291 = shalt.err (!%p5288_p11)
}
  0x17   : > { %s5292_s26 = scalar_lea.vmem %s5485_s10, 1024  ;;  %p5300_p1 = scmp.lt.s32.totalorder %s5485_s10, %s5485_s10 }
  0x18   : > { %p5293_p12 = scmp.ne.s32.totalorder %s5485_s10, %s5292_s26  ;;  %p5301_p4 = scmp.lt.s32.totalorder %s5292_s26, %s5292_s26 }
  0x1a   : > { %p5295_p13 = pnand %p5293_p12, %p5509_p7  ;;  %p5302_p6 = por %p5301_p4, %p5300_p1 }
  0x1c   : > { %p5296_p0 = pneg %p5295_p13 }
  0x1e   : > { %p5303_p8 = pnand %p5302_p6, %p5296_p0 }
  0x20   : > { %5306 = shalt.err (!%p5303_p8)
}
  0x21   : > { %s5415_s9 = smov 64   ;;  %s5416_s11 = smov 4  }
  0x22   : > { %4947 = dma.hbm_to_vmem [thread:$0]  (!%p5493_p5), %s7587_s5, 1024, %s5485_s10, [#allocation6], %s5415_s9, %s5415_s9, %s5416_s11  }
  0x23   : > { %s5307_s20 = scalar_lea.hbm %s7585_s3, 2048 }
  0x24   : > { %p5308_p9 = scmp.ne.s32.totalorder %s7585_s3, %s5307_s20  ;;  %p5314_p12 = scmp.lt.u32.totalorder %s5307_s20, %s7585_s3 }
  0x26   : > { %p5310_p10 = pnand %p5308_p9, %p5509_p7 }
  0x28   : > { %p5311_p11 = pneg %p5310_p10 }
  0x2a   : > { %p5316_p13 = pnand %p5314_p12, %p5311_p11 }
  0x2c   : > { %5319 = shalt.err (!%p5316_p13)
}
  0x2d   : > { %s5320_s10 = scalar_lea.vmem %s5489_s12, 2048  ;;  %p5328_p6 = scmp.lt.s32.totalorder %s5489_s12, %s5489_s12 }
  0x2e   : > { %p5321_p0 = scmp.ne.s32.totalorder %s5489_s12, %s5320_s10  ;;  %p5329_p8 = scmp.lt.s32.totalorder %s5320_s10, %s5320_s10 }
  0x30   : > { %p5323_p1 = pnand %p5321_p0, %p5509_p7  ;;  %p5330_p9 = por %p5329_p8, %p5328_p6 }
  0x32   : > { %p5324_p4 = pneg %p5323_p1 }
  0x34   : > { %p5331_p10 = pnand %p5330_p9, %p5324_p4 }
  0x36   : > { %5334 = shalt.err (!%p5331_p10)
}
  0x37   : > { %4944 = dma.hbm_to_vmem [thread:$0]  (!%p5493_p5), %s7585_s3, 2048, %s5489_s12, [#allocation4], %s5415_s9, %s5415_s9, %s5416_s11  }
  0x38   : > { %s5335_s19 = scalar_lea.hbm %s7588_s6, 1024 }
  0x39   : > { %p5336_p11 = scmp.ne.s32.totalorder %s7588_s6, %s5335_s19  ;;  %p5342_p0 = scmp.lt.u32.totalorder %s5335_s19, %s7588_s6 }
  0x3b   : > { %p5338_p12 = pnand %p5336_p11, %p5509_p7 }
  0x3d   : > { %p5339_p13 = pneg %p5338_p12 }
  0x3f   : > { %p5344_p1 = pnand %p5342_p0, %p5339_p13 }
  0x41   : > { %5347 = shalt.err (!%p5344_p1)
}
  0x42   : > { %s5348_s12 = scalar_lea.vmem %s5497_s15, 1024  ;;  %p5356_p9 = scmp.lt.s32.totalorder %s5497_s15, %s5497_s15 }
  0x43   : > { %p5349_p4 = scmp.ne.s32.totalorder %s5497_s15, %s5348_s12  ;;  %p5357_p10 = scmp.lt.s32.totalorder %s5348_s12, %s5348_s12 }
  0x45   : > { %p5351_p6 = pnand %p5349_p4, %p5509_p7  ;;  %p5358_p11 = por %p5357_p10, %p5356_p9 }
  0x47   : > { %p5352_p8 = pneg %p5351_p6 }
  0x49   : > { %p5359_p12 = pnand %p5358_p11, %p5352_p8 }
  0x4b   : > { %5362 = shalt.err (!%p5359_p12)
}
  0x4c   : > { %4950 = dma.hbm_to_vmem [thread:$0]  (!%p5493_p5), %s7588_s6, 1024, %s5497_s15, [#allocation6], %s5415_s9, %s5415_s9, %s5416_s11  }
  0x4d   : > { %s5363_s16 = scalar_lea.hbm %s7589_s7, 1024 }
  0x4e   : > { %p5364_p13 = scmp.ne.s32.totalorder %s7589_s7, %s5363_s16  ;;  %p5370_p4 = scmp.lt.u32.totalorder %s5363_s16, %s7589_s7 }
  0x50   : > { %p5366_p0 = pnand %p5364_p13, %p5509_p7 }
  0x52   : > { %p5367_p1 = pneg %p5366_p0 }
  0x54   : > { %p5372_p6 = pnand %p5370_p4, %p5367_p1 }
  0x56   : > { %5375 = shalt.err (!%p5372_p6)
}
  0x57   : > { %s5376_s22 = scalar_lea.vmem %s286_s17, 1024  ;;  %p5384_p11 = scmp.lt.s32.totalorder %s286_s17, %s286_s17 }
  0x58   : > { %p5377_p8 = scmp.ne.s32.totalorder %s286_s17, %s5376_s22  ;;  %p5385_p12 = scmp.lt.s32.totalorder %s5376_s22, %s5376_s22 }
  0x5a   : > { %p5379_p9 = pnand %p5377_p8, %p5509_p7  ;;  %p5386_p2 = por %p5385_p12, %p5384_p11 }
  0x5c   : > { %p5380_p10 = pneg %p5379_p9 }
  0x5e   : > { %p5387_p3 = pnand %p5386_p2, %p5380_p10 }
  0x60   : > { %5390 = shalt.err (!%p5387_p3)
}
  0x61   : > { %s5417_s15 = smov 512   ;;  %s5418_s9 = smov 32  }
  0x62   : > { %4953 = dma.hbm_to_vmem [thread:$0]  (!%p5493_p5), %s7589_s7, 1024, %s286_s17, [#allocation9], %s5417_s15, %s5417_s15, %s5418_s9  }
  0x63   : > { %p7654_p13 = scmp.ne.s32.totalorder %s7651_s30, 0 }
  0x65   : > { %311 = sbr.rel (%p7654_p13) target bundleno = 2338 (0x922), region = 52 }
  0x6c   : > { %p7655_p0 = scmp.ne.s32.totalorder %s7650_s29, 0 }
  0x6e   : > { %5396 = dma.done.wait (%p7655_p0), [#allocation4], 2048  }
  0x6f   : > { %5398 = vsyncadd (%p7655_p0), [#allocation4], 4294965248 }
  0x70   : > { %5400 = dma.done.wait (%p7655_p0), [#allocation6], 2048  }
  0x71   : > { %5402 = vsyncadd (%p7655_p0), [#allocation6], 4294965248 }
  0x72   : > { %5404 = dma.done.wait (%p7655_p0), [#allocation9], 1024  }
  0x73   : > { %5406 = vsyncadd (%p7655_p0), [#allocation9], 4294966272  ;;  %v5419_v0 = vmov 0.0   ;;  %v4981_v1 = vld [vmem:[%s7583_s1 + $0x4] ss:$16 sps:$4 sm:$0xff]   ;;  %s4398_s11 = sshll.u32 %s4385_s28, 4 }
  0x74   : > { %374 = vst [vmem:[#allocation2 + $0x10] sm:$0xff] %v5419_v0  ;;  %377 = vst [vmem:[#allocation2 + $0x28] sm:$0xff] %v5419_v0  ;;  %v4983_v2 = vld [vmem:[%s7583_s1 + $0xc] ss:$16 sps:$4 sm:$0xff]   ;;  %1165 = vmatprep.subr.bf16.mxu0 %v4981_v1  ;;  %v4985_v3 = vld [vmem:[%s7583_s1] ss:$16 sps:$4 sm:$0xff]  }
  0x75   : > { %380 = vst [vmem:[#allocation2 + $0x40] sm:$0xff] %v5419_v0  ;;  %383 = vst [vmem:[#allocation2 + $0x58] sm:$0xff] %v5419_v0  ;;  %v4986_v4 = vld [vmem:[%s7583_s1 + $0x8] ss:$16 sps:$4 sm:$0xff]   ;;  %1391 = vmatprep.subr.bf16.mxu1 %v4983_v2  ;;  %v4987_v5 = vld [vmem:[%s7583_s1 + $0x24] ss:$16 sps:$4 sm:$0xff]   ;;  %1166 = vmatpush1.bf16.msra.mxu0 %v4985_v3 }
  0x76   : > { %386 = vst [vmem:[#allocation2 + $0x70] sm:$0xff] %v5419_v0  ;;  %389 = vst [vmem:[#allocation2 + $0x88] sm:$0xff] %v5419_v0  ;;  %1392 = vmatpush1.bf16.msra.mxu1 %v4986_v4  ;;  %v4989_v6 = vld [vmem:[%s7583_s1 + $0x2c] ss:$16 sps:$4 sm:$0xff]   ;;  %v4991_v7 = vld [vmem:[%s7583_s1 + $0x20] ss:$16 sps:$4 sm:$0xff]   ;;  %1167 = vmatprep.subr.bf16.mxu0 %v4987_v5 }
  0x77   : > { %392 = vst [vmem:[#allocation2 + $0xa0] sm:$0xff] %v5419_v0  ;;  %395 = vst [vmem:[#allocation2 + $0xb8] sm:$0xff] %v5419_v0  ;;  %v4992_v8 = vld [vmem:[%s7583_s1 + $0x28] ss:$16 sps:$4 sm:$0xff]   ;;  %1393 = vmatprep.subr.bf16.mxu1 %v4989_v6  ;;  %v4993_v9 = vld [vmem:[%s7583_s1 + $0x44] ss:$16 sps:$4 sm:$0xff]  }
  0x78   : > { %398 = vst [vmem:[#allocation2 + $0xd0] sm:$0xff] %v5419_v0  ;;  %401 = vst [vmem:[#allocation2 + $0xe8] sm:$0xff] %v5419_v0  ;;  %v4995_v10 = vld [vmem:[%s7583_s1 + $0x4c] ss:$16 sps:$4 sm:$0xff]   ;;  %v4997_v11 = vld [vmem:[%s7583_s1 + $0x40] ss:$16 sps:$4 sm:$0xff]  }
  0x79   : > { %404 = vst [vmem:[#allocation2 + $0x100] sm:$0xff] %v5419_v0  ;;  %407 = vst [vmem:[#allocation2 + $0x118] sm:$0xff] %v5419_v0  ;;  %v4998_v12 = vld [vmem:[%s7583_s1 + $0x48] ss:$16 sps:$4 sm:$0xff]   ;;  %1168 = vmatpush1.bf16.msra.mxu0 %v4991_v7  ;;  %v4999_v13 = vld [vmem:[%s7583_s1 + $0x64] ss:$16 sps:$4 sm:$0xff]  }
  0x7a   : > { %410 = vst [vmem:[#allocation2 + $0x130] sm:$0xff] %v5419_v0  ;;  %413 = vst [vmem:[#allocation2 + $0x148] sm:$0xff] %v5419_v0  ;;  %1394 = vmatpush1.bf16.msra.mxu1 %v4992_v8  ;;  %1169 = vmatprep.subr.bf16.mxu0 %v4993_v9  ;;  %v5001_v14 = vld [vmem:[%s7583_s1 + $0x6c] ss:$16 sps:$4 sm:$0xff]   ;;  %v5003_v15 = vld [vmem:[%s7583_s1 + $0x60] ss:$16 sps:$4 sm:$0xff]  }
  0x7b   : > { %416 = vst [vmem:[#allocation2 + $0x160] sm:$0xff] %v5419_v0  ;;  %419 = vst [vmem:[#allocation2 + $0x178] sm:$0xff] %v5419_v0  ;;  %1395 = vmatprep.subr.bf16.mxu1 %v4995_v10  ;;  %v5004_v16 = vld [vmem:[%s7583_s1 + $0x68] ss:$16 sps:$4 sm:$0xff]   ;;  %v5005_v17 = vld [vmem:[%s7583_s1 + $0x84] ss:$16 sps:$4 sm:$0xff]  }
  0x7c   : > { %v5007_v18 = vld [vmem:[%s7583_s1 + $0x8c] ss:$16 sps:$4 sm:$0xff]   ;;  %v5009_v19 = vld [vmem:[%s7583_s1 + $0x80] ss:$16 sps:$4 sm:$0xff]   ;;  %v5010_v20 = vld [vmem:[%s7583_s1 + $0x88] ss:$16 sps:$4 sm:$0xff]  }
  0x7d   : > { %1170 = vmatpush1.bf16.msra.mxu0 %v4997_v11  ;;  %v5011_v21 = vld [vmem:[%s7583_s1 + $0xa4] ss:$16 sps:$4 sm:$0xff]   ;;  %v5013_v22 = vld [vmem:[%s7583_s1 + $0xac] ss:$16 sps:$4 sm:$0xff]   ;;  %v5015_v23 = vld [vmem:[%s7583_s1 + $0xa0] ss:$16 sps:$4 sm:$0xff]  }
  0x7e   : > { %1396 = vmatpush1.bf16.msra.mxu1 %v4998_v12  ;;  %1171 = vmatprep.subr.bf16.mxu0 %v4999_v13  ;;  %v5016_v24 = vld [vmem:[%s7583_s1 + $0xa8] ss:$16 sps:$4 sm:$0xff]   ;;  %v5017_v25 = vld [vmem:[%s7583_s1 + $0xc4] ss:$16 sps:$4 sm:$0xff]   ;;  %v5019_v26 = vld [vmem:[%s7583_s1 + $0xcc] ss:$16 sps:$4 sm:$0xff]  }
  0x7f   : > { %1397 = vmatprep.subr.bf16.mxu1 %v5001_v14  ;;  %v5021_v27 = vld [vmem:[%s7583_s1 + $0xc0] ss:$16 sps:$4 sm:$0xff]   ;;  %v5022_v28 = vld [vmem:[%s7583_s1 + $0xc8] ss:$16 sps:$4 sm:$0xff]   ;;  %v5023_v29 = vld [vmem:[%s7583_s1 + $0xe4] ss:$16 sps:$4 sm:$0xff]  }
  0x80   : > { %v5025_v30 = vld [vmem:[%s7583_s1 + $0xec] ss:$16 sps:$4 sm:$0xff]   ;;  %v5027_v31 = vld [vmem:[%s7583_s1 + $0xe0] ss:$16 sps:$4 sm:$0xff]   ;;  %p359_p2 = scmp.lt.s32.totalorder %s4398_s11, 31  ;;  %vm470_vm0 = vcmask 220160  }
  0x81   : > { %1172 = vmatpush1.bf16.msra.mxu0 %v5003_v15  ;;  %v5028_v32 = vld [vmem:[%s7583_s1 + $0xe8] ss:$16 sps:$4 sm:$0xff]   ;;  %v5029_v33 = vld [vmem:[%s7583_s1 + $0x104] ss:$16 sps:$4 sm:$0xff]   ;;  %v5031_v34 = vld [vmem:[%s7583_s1 + $0x10c] ss:$16 sps:$4 sm:$0xff]  }
  0x82   : > { %1398 = vmatpush1.bf16.msra.mxu1 %v5004_v16  ;;  %1173 = vmatprep.subr.bf16.mxu0 %v5005_v17  ;;  %v5033_v35 = vld [vmem:[%s7583_s1 + $0x100] ss:$16 sps:$4 sm:$0xff]   ;;  %v5034_v36 = vld [vmem:[%s7583_s1 + $0x108] ss:$16 sps:$4 sm:$0xff]   ;;  %s7764_s11 = smov (!%p359_p2, %s4398_s11), 31 }
  0x83   : > { %1399 = vmatprep.subr.bf16.mxu1 %v5007_v18  ;;  %v5035_v37 = vld [vmem:[%s7583_s1 + $0x124] ss:$16 sps:$4 sm:$0xff]   ;;  %v5037_v38 = vld [vmem:[%s7583_s1 + $0x12c] ss:$16 sps:$4 sm:$0xff]   ;;  %v5039_v39 = vld [vmem:[%s7583_s1 + $0x120] ss:$16 sps:$4 sm:$0xff]  }
  0x84   : > { %s4924_s24 = smul.u32 24, %s7764_s11  ;;  %v5040_v40 = vld [vmem:[%s7583_s1 + $0x128] ss:$16 sps:$4 sm:$0xff]   ;;  %v5041_v41 = vld [vmem:[%s7583_s1 + $0x144] ss:$16 sps:$4 sm:$0xff]   ;;  %s4401_s23 = sshll.u32 %s7764_s11, 3 }
  0x85   : > { %1174 = vmatpush1.bf16.msra.mxu0 %v5009_v19  ;;  %v5043_v42 = vld [vmem:[%s7583_s1 + $0x14c] ss:$16 sps:$4 sm:$0xff]   ;;  %v5045_v43 = vld [vmem:[%s7583_s1 + $0x140] ss:$16 sps:$4 sm:$0xff]   ;;  %v5046_v44 = vld [vmem:[%s7583_s1 + $0x148] ss:$16 sps:$4 sm:$0xff]   ;;  %s7561_s28 = scalar_lea.vmem %s7590_s8, %s4401_s23 }
  0x86   : > { %1400 = vmatpush1.bf16.msra.mxu1 %v5010_v20  ;;  %1175 = vmatprep.subr.bf16.mxu0 %v5011_v21  ;;  %s5758_s18 = scalar_lea.vmem %s7582_s0, %s4924_s24  ;;  %v5047_v45 = vld [vmem:[%s7583_s1 + $0x164] ss:$16 sps:$4 sm:$0xff]   ;;  %v5049_v46 = vld [vmem:[%s7583_s1 + $0x16c] ss:$16 sps:$4 sm:$0xff]   ;;  %v5051_v47 = vld [vmem:[%s7583_s1 + $0x160] ss:$16 sps:$4 sm:$0xff]  }
  0x87   : > { %1401 = vmatprep.subr.bf16.mxu1 %v5013_v22  ;;  %v5052_v48 = vld [vmem:[%s7583_s1 + $0x168] ss:$16 sps:$4 sm:$0xff]   ;;  %v424_v50 = vld [vmem:[%s5758_s18 + $0x20] sm:$0xff]  ;;  %v5055_v55 = vld [vmem:[%s7583_s1 + $0x18c] ss:$16 sps:$4 sm:$0xff]  }
  0x88   : > { %v421_v49 = vld [vmem:[%s5758_s18 + $0x8] sm:$0xff]  ;;  %v420_v51 = vld [vmem:[%s5758_s18] sm:$0xff]  ;;  %v423_v52 = vld [vmem:[%s5758_s18 + $0x18] sm:$0xff] }
  0x89   : > { %1176 = vmatpush1.bf16.msra.mxu0 %v5015_v23  ;;  %v5053_v53 = vld [vmem:[%s7583_s1 + $0x184] ss:$16 sps:$4 sm:$0xff]   ;;  %v566_v54 = vpack.c.bf16 %v424_v50, %v421_v49  ;;  %v5057_v56 = vld [vmem:[%s7583_s1 + $0x180] ss:$16 sps:$4 sm:$0xff]   ;;  %v5058_v57 = vld [vmem:[%s7583_s1 + $0x188] ss:$16 sps:$4 sm:$0xff]  }
  0x8a   : > { %1402 = vmatpush1.bf16.msra.mxu1 %v5016_v24  ;;  %1177 = vmatprep.subr.bf16.mxu0 %v5017_v25  ;;  %v427_v58 = vld [vmem:[%s5758_s18 + $0x38] sm:$0xff]  ;;  %v430_v59 = vld [vmem:[%s5758_s18 + $0x50] sm:$0xff]  ;;  %v5794_v61 = vld [vmem:[%s5758_s18 + $0x48] sm:$0xff] }
  0x8b   : > { %1403 = vmatprep.subr.bf16.mxu1 %v5019_v26  ;;  %1197 = vmatprep.mubr.bf16.mxu0 %v566_v54  ;;  %v5791_v60 = vld [vmem:[%s5758_s18 + $0x30] sm:$0xff]  ;;  %v5061_v63 = vld [vmem:[%s7583_s1 + $0x1ac] ss:$16 sps:$4 sm:$0xff]   ;;  %v5064_v1 = vld [vmem:[%s7583_s1 + $0x1a8] ss:$16 sps:$4 sm:$0xff]   ;;  %v565_v26 = vpack.c.bf16 %v423_v52, %v420_v51 }
  0x8c   : > { %1423 = vmatprep.mubr.bf16.mxu1 %v566_v54  ;;  %v5059_v62 = vld [vmem:[%s7583_s1 + $0x1a4] ss:$16 sps:$4 sm:$0xff]   ;;  %v5063_v0 = vld [vmem:[%s7583_s1 + $0x1a0] ss:$16 sps:$4 sm:$0xff]   ;;  %v5809_v2 = vld [vmem:[%s5758_s18 + $0x68] sm:$0xff] }
  0x8d   : > { %1178 = vmatpush1.bf16.msra.mxu0 %v5021_v27  ;;  %v5812_v3 = vld [vmem:[%s5758_s18 + $0x80] sm:$0xff]  ;;  %v5818_v5 = vld [vmem:[%s5758_s18 + $0x78] sm:$0xff]  ;;  %v5836_v11 = vld [vmem:[%s5758_s18 + $0xb0] sm:$0xff] }
  0x8e   : > { %1404 = vmatpush1.bf16.msra.mxu1 %v5022_v28  ;;  %1179 = vmatprep.subr.bf16.mxu0 %v5023_v29  ;;  %v5815_v4 = vld [vmem:[%s5758_s18 + $0x60] sm:$0xff]  ;;  %v5067_v7 = vld [vmem:[%s7583_s1 + $0x1cc] ss:$16 sps:$4 sm:$0xff]   ;;  %v5070_v9 = vld [vmem:[%s7583_s1 + $0x1c8] ss:$16 sps:$4 sm:$0xff]  }
  0x8f   : > { %1405 = vmatprep.subr.bf16.mxu1 %v5025_v30  ;;  %v5065_v6 = vld [vmem:[%s7583_s1 + $0x1c4] ss:$16 sps:$4 sm:$0xff]   ;;  %v5069_v8 = vld [vmem:[%s7583_s1 + $0x1c0] ss:$16 sps:$4 sm:$0xff]   ;;  %v5833_v10 = vld [vmem:[%s5758_s18 + $0x98] sm:$0xff] }
  0x90   : > { %v5839_v12 = vld [vmem:[%s5758_s18 + $0x90] sm:$0xff]  ;;  %v5842_v13 = vld [vmem:[%s5758_s18 + $0xa8] sm:$0xff]  ;;  %v5860_v19 = vld [vmem:[%s5758_s18 + $0xe0] sm:$0xff] }
  0x91   : > { %1180 = vmatpush1.bf16.msra.mxu0 %v5027_v31  ;;  %v5071_v14 = vld [vmem:[%s7583_s1 + $0x1e4] ss:$16 sps:$4 sm:$0xff]   ;;  %v5073_v15 = vld [vmem:[%s7583_s1 + $0x1ec] ss:$16 sps:$4 sm:$0xff]   ;;  %v5075_v16 = vld [vmem:[%s7583_s1 + $0x1e0] ss:$16 sps:$4 sm:$0xff]   ;;  %v569_v31 = vpack.c.bf16 %v430_v59, %v427_v58 }
  0x92   : > { %1406 = vmatpush1.bf16.msra.mxu1 %v5028_v32  ;;  %1181 = vmatprep.subr.bf16.mxu0 %v5029_v33  ;;  %v5076_v17 = vld [vmem:[%s7583_s1 + $0x1e8] ss:$16 sps:$4 sm:$0xff]   ;;  %v5863_v20 = vld [vmem:[%s5758_s18 + $0xc0] sm:$0xff]  ;;  %v5082_v23 = vld [vmem:[%s7583_s1 + $0x20c] ss:$16 sps:$4 sm:$0xff]  }
  0x93   : > { %1407 = vmatprep.subr.bf16.mxu1 %v5031_v34  ;;  %v5857_v18 = vld [vmem:[%s5758_s18 + $0xc8] sm:$0xff]  ;;  %v5866_v21 = vld [vmem:[%s5758_s18 + $0xd8] sm:$0xff]  ;;  %v5079_v22 = vld [vmem:[%s7583_s1 + $0x204] ss:$16 sps:$4 sm:$0xff]  }
  0x94   : > { %v5077_v24 = vld [vmem:[%s7583_s1 + $0x200] ss:$16 sps:$4 sm:$0xff]   ;;  %v5878_v25 = vld [vmem:[%s5758_s18 + $0xf8] sm:$0xff]  ;;  %v5887_v29 = vld [vmem:[%s5758_s18 + $0x108] sm:$0xff] }
  0x95   : > { %1182 = vmatpush1.bf16.msra.mxu0 %v5033_v35  ;;  %v5881_v27 = vld [vmem:[%s5758_s18 + $0x110] sm:$0xff]  ;;  %v5080_v30 = vld [vmem:[%s7583_s1 + $0x208] ss:$16 sps:$4 sm:$0xff]   ;;  %v5088_v35 = vld [vmem:[%s7583_s1 + $0x22c] ss:$16 sps:$4 sm:$0xff]  }
  0x96   : > { %1408 = vmatpush1.bf16.msra.mxu1 %v5034_v36  ;;  %1183 = vmatprep.subr.bf16.mxu0 %v5035_v37  ;;  %v5884_v28 = vld [vmem:[%s5758_s18 + $0xf0] sm:$0xff]  ;;  %v5086_v34 = vld [vmem:[%s7583_s1 + $0x228] ss:$16 sps:$4 sm:$0xff]   ;;  %v5908_v37 = vld [vmem:[%s5758_s18 + $0x140] sm:$0xff] }
  0x97   : > { %1409 = vmatprep.subr.bf16.mxu1 %v5037_v38  ;;  %v5085_v32 = vld [vmem:[%s7583_s1 + $0x224] ss:$16 sps:$4 sm:$0xff]   ;;  %v5083_v33 = vld [vmem:[%s7583_s1 + $0x220] ss:$16 sps:$4 sm:$0xff]   ;;  %v5905_v36 = vld [vmem:[%s5758_s18 + $0x128] sm:$0xff] }
  0x98   : > { %v5911_v38 = vld [vmem:[%s5758_s18 + $0x120] sm:$0xff]  ;;  %v5092_v49 = vld [vmem:[%s7583_s1 + $0x248] ss:$16 sps:$4 sm:$0xff]   ;;  %v5100_v51 = vld [vmem:[%s7583_s1 + $0x26c] ss:$16 sps:$4 sm:$0xff]  }
  0x99   : > { %1184 = vmatpush1.bf16.msra.mxu0 %v5039_v39  ;;  %v5914_v39 = vld [vmem:[%s5758_s18 + $0x138] sm:$0xff]  ;;  %v5097_v50 = vld [vmem:[%s7583_s1 + $0x264] ss:$16 sps:$4 sm:$0xff]  }
  0x9a   : > { %1410 = vmatpush1.bf16.msra.mxu1 %v5040_v40  ;;  %1185 = vmatprep.subr.bf16.mxu0 %v5041_v41  ;;  %v5091_v40 = vld [vmem:[%s7583_s1 + $0x244] ss:$16 sps:$4 sm:$0xff]   ;;  %v5094_v41 = vld [vmem:[%s7583_s1 + $0x24c] ss:$16 sps:$4 sm:$0xff]   ;;  %v5098_v54 = vld [vmem:[%s7583_s1 + $0x268] ss:$16 sps:$4 sm:$0xff]  }
  0x9b   : > { %1411 = vmatprep.subr.bf16.mxu1 %v5043_v42  ;;  %v5923_v42 = vld [vmem:[%s5758_s18 + $0x158] sm:$0xff]  ;;  %v422_v52 = vld [vmem:[%s5758_s18 + $0x10] sm:$0xff] }
  0x9c   : > { %471 = vst.msk [vmem:[#allocation2 + $0x10] sm:$0xff] %vm470_vm0, %v422_v52  ;;  %v5103_v58 = vld [vmem:[%s7583_s1 + $0x284] ss:$16 sps:$4 sm:$0xff]   ;;  %v5106_v59 = vld [vmem:[%s7583_s1 + $0x28c] ss:$16 sps:$4 sm:$0xff]  }
  0x9d   : > { %1186 = vmatpush1.bf16.msra.mxu0 %v5045_v43  ;;  %v568_v43 = vpack.c.bf16 %v5794_v61, %v5791_v60  ;;  %v434_v60 = vld [vmem:[%s5758_s18 + $0x70] sm:$0xff]  ;;  %v437_v61 = vld [vmem:[%s5758_s18 + $0x88] sm:$0xff] }
  0x9e   : > { %1412 = vmatpush1.bf16.msra.mxu1 %v5046_v44  ;;  %1187 = vmatprep.subr.bf16.mxu0 %v5047_v45  ;;  %v5928_v44 = vld [vmem:[%s5758_s18 + $0x170] sm:$0xff]  ;;  %483 = vst.msk [vmem:[#allocation2 + $0x70] sm:$0xff] %vm470_vm0, %v434_v60  ;;  %486 = vst.msk [vmem:[#allocation2 + $0x88] sm:$0xff] %vm470_vm0, %v437_v61 }
  0x9f   : > { %1413 = vmatprep.subr.bf16.mxu1 %v5049_v46  ;;  %v5931_v45 = vld [vmem:[%s5758_s18 + $0x150] sm:$0xff]  ;;  %v5934_v46 = vld [vmem:[%s5758_s18 + $0x168] sm:$0xff] }
  0xa1   : > { %1188 = vmatpush1.bf16.msra.mxu0 %v5051_v47  ;;  %v572_v47 = vpack.c.bf16 %v5812_v3, %v5809_v2  ;;  %v452_v2 = vld [vmem:[%s5758_s18 + $0x100] sm:$0xff]  ;;  %v455_v3 = vld [vmem:[%s5758_s18 + $0x118] sm:$0xff] }
  0xa2   : > { %1414 = vmatpush1.bf16.msra.mxu1 %v5052_v48  ;;  %1189 = vmatprep.subr.bf16.mxu0 %v5053_v53  ;;  %v5089_v48 = vld [vmem:[%s7583_s1 + $0x240] ss:$16 sps:$4 sm:$0xff]   ;;  %501 = vst.msk [vmem:[#allocation2 + $0x100] sm:$0xff] %vm470_vm0, %v452_v2  ;;  %504 = vst.msk [vmem:[#allocation2 + $0x118] sm:$0xff] %vm470_vm0, %v455_v3 }
  0xa3   : > { %1415 = vmatprep.subr.bf16.mxu1 %v5055_v55  ;;  %v5095_v53 = vld [vmem:[%s7583_s1 + $0x260] ss:$16 sps:$4 sm:$0xff]   ;;  %v425_v55 = vld [vmem:[%s5758_s18 + $0x28] sm:$0xff] }
  0xa4   : > { %474 = vst.msk [vmem:[#allocation2 + $0x28] sm:$0xff] %vm470_vm0, %v425_v55 }
  0xa5   : > { %1190 = vmatpush1.bf16.msra.mxu0 %v5057_v56  ;;  %v428_v56 = vld [vmem:[%s5758_s18 + $0x40] sm:$0xff] }
  0xa6   : > { %1416 = vmatpush1.bf16.msra.mxu1 %v5058_v57  ;;  %1191 = vmatprep.subr.bf16.mxu0 %v5059_v62  ;;  %v431_v57 = vld [vmem:[%s5758_s18 + $0x58] sm:$0xff]  ;;  %477 = vst.msk [vmem:[#allocation2 + $0x40] sm:$0xff] %vm470_vm0, %v428_v56  ;;  %v440_v62 = vld [vmem:[%s5758_s18 + $0xa0] sm:$0xff] }
  0xa7   : > { %1417 = vmatprep.subr.bf16.mxu1 %v5061_v63  ;;  %480 = vst.msk [vmem:[#allocation2 + $0x58] sm:$0xff] %vm470_vm0, %v431_v57  ;;  %v443_v63 = vld [vmem:[%s5758_s18 + $0xb8] sm:$0xff]  ;;  %489 = vst.msk [vmem:[#allocation2 + $0xa0] sm:$0xff] %vm470_vm0, %v440_v62  ;;  %v5127_v62 = vld [vmem:[%s7584_s2 + $0x4] ss:$8 sps:$4 sm:$0xff]  }
  0xa8   : > { %492 = vst.msk [vmem:[#allocation2 + $0xb8] sm:$0xff] %vm470_vm0, %v443_v63 }
  0xa9   : > { %1192 = vmatpush1.bf16.msra.mxu0 %v5063_v0  ;;  %v446_v0 = vld [vmem:[%s5758_s18 + $0xd0] sm:$0xff] }
  0xaa   : > { %1418 = vmatpush1.bf16.msra.mxu1 %v5064_v1  ;;  %1193 = vmatprep.subr.bf16.mxu0 %v5065_v6  ;;  %v449_v1 = vld [vmem:[%s5758_s18 + $0xe8] sm:$0xff]  ;;  %495 = vst.msk [vmem:[#allocation2 + $0xd0] sm:$0xff] %vm470_vm0, %v446_v0  ;;  %v458_v6 = vld [vmem:[%s5758_s18 + $0x130] sm:$0xff] }
  0xab   : > { %1419 = vmatprep.subr.bf16.mxu1 %v5067_v7  ;;  %498 = vst.msk [vmem:[#allocation2 + $0xe8] sm:$0xff] %vm470_vm0, %v449_v1  ;;  %v571_v7 = vpack.c.bf16 %v5818_v5, %v5815_v4  ;;  %507 = vst.msk [vmem:[#allocation2 + $0x130] sm:$0xff] %vm470_vm0, %v458_v6  ;;  %v575_v4 = vpack.c.bf16 %v5836_v11, %v5833_v10  ;;  %v5109_v5 = vld [vmem:[%s7583_s1 + $0x2a4] ss:$16 sps:$4 sm:$0xff]   ;;  %v5107_v10 = vld [vmem:[%s7583_s1 + $0x2a0] ss:$16 sps:$4 sm:$0xff]  }
  0xac   : > { %v5110_v11 = vld [vmem:[%s7583_s1 + $0x2a8] ss:$16 sps:$4 sm:$0xff]  }
  0xad   : > { %1194 = vmatpush1.bf16.msra.mxu0 %v5069_v8  ;;  %v5101_v8 = vld [vmem:[%s7583_s1 + $0x280] ss:$16 sps:$4 sm:$0xff]  }
  0xae   : > { %1420 = vmatpush1.bf16.msra.mxu1 %v5070_v9  ;;  %1195 = vmatprep.subr.bf16.mxu0 %v5071_v14  ;;  %v5104_v9 = vld [vmem:[%s7583_s1 + $0x288] ss:$16 sps:$4 sm:$0xff]  }
  0xaf   : > { %1421 = vmatprep.subr.bf16.mxu1 %v5073_v15  ;;  %v461_v14 = vld [vmem:[%s5758_s18 + $0x148] sm:$0xff]  ;;  %v464_v15 = vld [vmem:[%s5758_s18 + $0x160] sm:$0xff] }
  0xb0   : > { %510 = vst.msk [vmem:[#allocation2 + $0x148] sm:$0xff] %vm470_vm0, %v461_v14  ;;  %513 = vst.msk [vmem:[#allocation2 + $0x160] sm:$0xff] %vm470_vm0, %v464_v15  ;;  %v5125_v1 = vld [vmem:[%s7584_s2] ss:$8 sps:$4 sm:$0xff]   ;;  %v5130_v14 = vld [vmem:[%s7584_s2 + $0x14] ss:$8 sps:$4 sm:$0xff]  }
  0xb1   : > { %1196 = vmatpush1.bf16.msra.mxu0 %v5075_v16  ;;  %v467_v16 = vld [vmem:[%s5758_s18 + $0x178] sm:$0xff] }
  0xb2   : > { %1422 = vmatpush1.bf16.msra.mxu1 %v5076_v17  ;;  %1278 = vmatprep.subr.bf16.mxu0 %v5079_v22  ;;  %516 = vst.msk [vmem:[#allocation2 + $0x178] sm:$0xff] %vm470_vm0, %v467_v16  ;;  %v5112_v17 = vld [vmem:[%s7583_s1 + $0x2ac] ss:$16 sps:$4 sm:$0xff]   ;;  %v5115_v22 = vld [vmem:[%s7583_s1 + $0x2c4] ss:$16 sps:$4 sm:$0xff]  }
  0xb3   : > { %1504 = vmatprep.subr.bf16.mxu1 %v5082_v23  ;;  %v5118_v23 = vld [vmem:[%s7583_s1 + $0x2cc] ss:$16 sps:$4 sm:$0xff]   ;;  %v555_v52 = vld [vmem:[#allocation2 + $0x130] sm:$0xff] }
  0xb4   : > { %1198 = vmatmul.mubr.bf16.vlgmr.msra.gmra.mrb[0].mxu0 %v565_v26  ;;  %v5128_v15 = vld [vmem:[%s7584_s2 + $0x10] ss:$8 sps:$4 sm:$0xff]  }
  0xb5   : > { %1424 = vmatmul.mubr.bf16.vlgmr.msra.gmra.mrb[0].mxu1 %v565_v26  ;;  %1279 = vmatpush1.bf16.msra.mxu0 %v5077_v24  ;;  %v574_v24 = vpack.c.bf16 %v5842_v13, %v5839_v12  ;;  %v5113_v26 = vld [vmem:[%s7583_s1 + $0x2c0] ss:$16 sps:$4 sm:$0xff]   ;;  %v5122_v13 = vld [vmem:[%s7583_s1 + $0x2e8] ss:$16 sps:$4 sm:$0xff]  }
  0xb6   : > { %1505 = vmatpush1.bf16.msra.mxu1 %v5080_v30  ;;  %1207 = vmatprep.mubr.bf16.mxu0 %v569_v31  ;;  %v5116_v30 = vld [vmem:[%s7583_s1 + $0x2c8] ss:$16 sps:$4 sm:$0xff]   ;;  %v5119_v12 = vld [vmem:[%s7583_s1 + $0x2e0] ss:$16 sps:$4 sm:$0xff]  }
  0xb7   : > { %1433 = vmatprep.mubr.bf16.mxu1 %v569_v31  ;;  %1280 = vmatprep.subr.bf16.mxu0 %v5085_v32  ;;  %v578_v31 = vpack.c.bf16 %v5860_v19, %v5857_v18  ;;  %v5121_v32 = vld [vmem:[%s7583_s1 + $0x2e4] ss:$16 sps:$4 sm:$0xff]   ;;  %v577_v18 = vpack.c.bf16 %v5866_v21, %v5863_v20  ;;  %v581_v19 = vpack.c.bf16 %v5881_v27, %v5878_v25 }
  0xb8   : > { %1506 = vmatprep.subr.bf16.mxu1 %v5088_v35  ;;  %v584_v35 = vpack.c.bf16 %v5908_v37, %v5905_v36  ;;  %v583_v20 = vpack.c.bf16 %v5914_v39, %v5911_v38  ;;  %v587_v21 = vpack.c.bf16 %v5928_v44, %v5923_v42  ;;  %v586_v25 = vpack.c.bf16 %v5934_v46, %v5931_v45  ;;  %v519_v27 = vld [vmem:[#allocation2 + $0x10] sm:$0xff]  ;;  %v525_v37 = vld [vmem:[#allocation2 + $0x40] sm:$0xff]  ;;  %v528_v38 = vld [vmem:[#allocation2 + $0x58] sm:$0xff] }
  0xb9   : > { %1281 = vmatpush1.bf16.msra.mxu0 %v5083_v33  ;;  %v5124_v33 = vld [vmem:[%s7583_s1 + $0x2ec] ss:$16 sps:$4 sm:$0xff]   ;;  %v570_v39 = vpack.c.bf16 %v528_v38, %v525_v37  ;;  %v543_v46 = vld [vmem:[#allocation2 + $0xd0] sm:$0xff]  ;;  %v561_v55 = vld [vmem:[#allocation2 + $0x160] sm:$0xff] }
  0xba   : > { %1507 = vmatpush1.bf16.msra.mxu1 %v5086_v34  ;;  %1282 = vmatprep.subr.bf16.mxu0 %v5091_v40  ;;  %v580_v34 = vpack.c.bf16 %v5887_v29, %v5884_v28  ;;  %v522_v28 = vld [vmem:[#allocation2 + $0x28] sm:$0xff]  ;;  %v5420_v29 = vmov 0   ;;  %v531_v40 = vld [vmem:[#allocation2 + $0x70] sm:$0xff]  ;;  %v540_v44 = vld [vmem:[#allocation2 + $0xb8] sm:$0xff] }
  0xbb   : > { %1508 = vmatprep.subr.bf16.mxu1 %v5094_v41  ;;  %v567_v36 = vpack.c.bf16 %v522_v28, %v519_v27  ;;  %v534_v41 = vld [vmem:[#allocation2 + $0x88] sm:$0xff]  ;;  %v564_v56 = vld [vmem:[#allocation2 + $0x178] sm:$0xff] }
  0xbc   : > { %1208 = vmatmul.mubr.bf16.gmra.mrb[4].mxu0 %v568_v43  ;;  %v573_v42 = vpack.c.bf16 %v534_v41, %v531_v40  ;;  %v588_v57 = vpack.c.bf16 %v564_v56, %v561_v55  ;;  %v5137_v41 = vld [vmem:[%s7584_s2 + $0x40] ss:$8 sps:$4 sm:$0xff]   ;;  %v5145_v56 = vld [vmem:[%s7584_s2 + $0x64] ss:$8 sps:$4 sm:$0xff]  }
  0xbd   : > { %1434 = vmatmul.mubr.bf16.gmra.mrb[4].mxu1 %v568_v43  ;;  %1217 = vmatprep.mubr.bf16.mxu0 %v572_v47  ;;  %v537_v43 = vld [vmem:[#allocation2 + $0xa0] sm:$0xff] }
  0xbe   : > { %1443 = vmatprep.mubr.bf16.mxu1 %v572_v47  ;;  %1283 = vmatpush1.bf16.msra.mxu0 %v5089_v48  ;;  %v576_v45 = vpack.c.bf16 %v540_v44, %v537_v43  ;;  %v546_v47 = vld [vmem:[#allocation2 + $0xe8] sm:$0xff] }
  0xbf   : > { %1509 = vmatpush1.bf16.msra.mxu1 %v5092_v49  ;;  %1284 = vmatprep.subr.bf16.mxu0 %v5097_v50  ;;  %v579_v48 = vpack.c.bf16 %v546_v47, %v543_v46  ;;  %v549_v49 = vld [vmem:[#allocation2 + $0x100] sm:$0xff]  ;;  %v552_v50 = vld [vmem:[#allocation2 + $0x118] sm:$0xff] }
  0xc0   : > { %1510 = vmatprep.subr.bf16.mxu1 %v5100_v51  ;;  %v582_v51 = vpack.c.bf16 %v552_v50, %v549_v49  ;;  %v5140_v49 = vld [vmem:[%s7584_s2 + $0x50] ss:$8 sps:$4 sm:$0xff]  }
  0xc2   : > { %1285 = vmatpush1.bf16.msra.mxu0 %v5095_v53  ;;  %v558_v53 = vld [vmem:[#allocation2 + $0x148] sm:$0xff] }
  0xc3   : > { %1511 = vmatpush1.bf16.msra.mxu1 %v5098_v54  ;;  %1286 = vmatprep.subr.bf16.mxu0 %v5103_v58  ;;  %v585_v54 = vpack.c.bf16 %v558_v53, %v555_v52 }
  0xc4   : > { %1512 = vmatprep.subr.bf16.mxu1 %v5106_v59  ;;  %1218 = vmatmul.mubr.bf16.gmra.mrb[8].mxu0 %v571_v7 }
  0xc5   : > { %1444 = vmatmul.mubr.bf16.gmra.mrb[8].mxu1 %v571_v7  ;;  %1227 = vmatprep.mubr.bf16.mxu0 %v575_v4 }
  0xc6   : > { %1453 = vmatprep.mubr.bf16.mxu1 %v575_v4  ;;  %1287 = vmatpush1.bf16.msra.mxu0 %v5101_v8 }
  0xc7   : > { %1513 = vmatpush1.bf16.msra.mxu1 %v5104_v9  ;;  %1288 = vmatprep.subr.bf16.mxu0 %v5109_v5 }
  0xc8   : > { %1514 = vmatprep.subr.bf16.mxu1 %v5112_v17 }
  0xca   : > { %1289 = vmatpush1.bf16.msra.mxu0 %v5107_v10 }
  0xcb   : > { %1515 = vmatpush1.bf16.msra.mxu1 %v5110_v11  ;;  %1290 = vmatprep.subr.bf16.mxu0 %v5115_v22  ;;  %v5133_v22 = vld [vmem:[%s7584_s2 + $0x24] ss:$8 sps:$4 sm:$0xff]  }
  0xcc   : > { %1516 = vmatprep.subr.bf16.mxu1 %v5118_v23  ;;  %1228 = vmatmul.mubr.bf16.gmra.mrb[12].mxu0 %v574_v24 }
  0xcd   : > { %1454 = vmatmul.mubr.bf16.gmra.mrb[12].mxu1 %v574_v24  ;;  %1237 = vmatprep.mubr.bf16.mxu0 %v578_v31 }
  0xce   : > { %1463 = vmatprep.mubr.bf16.mxu1 %v578_v31  ;;  %1291 = vmatpush1.bf16.msra.mxu0 %v5113_v26  ;;  %v5131_v31 = vld [vmem:[%s7584_s2 + $0x20] ss:$8 sps:$4 sm:$0xff]  }
  0xcf   : > { %1517 = vmatpush1.bf16.msra.mxu1 %v5116_v30  ;;  %1292 = vmatprep.subr.bf16.mxu0 %v5121_v32 }
  0xd0   : > { %1518 = vmatprep.subr.bf16.mxu1 %v5124_v33 }
  0xd2   : > { %1293 = vmatpush1.bf16.msra.mxu0 %v5119_v12 }
  0xd3   : > { %1519 = vmatpush1.bf16.msra.mxu1 %v5122_v13  ;;  %2613 = vmatprep.subr.bf16.mxu0 %v5127_v62 }
  0xd4   : > { %1238 = vmatmul.mubr.bf16.gmra.mrb[16].mxu0 %v577_v18 }
  0xd5   : > { %1464 = vmatmul.mubr.bf16.gmra.mrb[16].mxu1 %v577_v18  ;;  %1247 = vmatprep.mubr.bf16.mxu0 %v581_v19 }
  0xd6   : > { %1473 = vmatprep.mubr.bf16.mxu1 %v581_v19 }
  0xdc   : > { %1248 = vmatmul.mubr.bf16.gmra.mrb[20].mxu0 %v580_v34 }
  0xdd   : > { %1474 = vmatmul.mubr.bf16.gmra.mrb[20].mxu1 %v580_v34  ;;  %1257 = vmatprep.mubr.bf16.mxu0 %v584_v35  ;;  %v5136_v34 = vld [vmem:[%s7584_s2 + $0x34] ss:$8 sps:$4 sm:$0xff]  }
  0xde   : > { %1483 = vmatprep.mubr.bf16.mxu1 %v584_v35  ;;  %v5134_v35 = vld [vmem:[%s7584_s2 + $0x30] ss:$8 sps:$4 sm:$0xff]  }
  0xe4   : > { %1258 = vmatmul.mubr.bf16.gmra.mrb[24].mxu0 %v583_v20 }
  0xe5   : > { %1484 = vmatmul.mubr.bf16.gmra.mrb[24].mxu1 %v583_v20  ;;  %1267 = vmatprep.mubr.bf16.mxu0 %v587_v21 }
  0xe6   : > { %1493 = vmatprep.mubr.bf16.mxu1 %v587_v21 }
  0xec   : > { %1268 = vmatmul.mubr.bf16.gmra.mrb[28].mxu0 %v586_v25 }
  0xed   : > { %1494 = vmatmul.mubr.bf16.gmra.mrb[28].mxu1 %v586_v25  ;;  %1310 = vmatprep.mubr.bf16.mxu0 %v5420_v29 }
  0xee   : > { %1536 = vmatprep.mubr.bf16.mxu1 %v5420_v29 }
  0xf4   : > { %1311 = vmatmul.mubr.bf16.vlgmr.msra.gmra.mrb[0].mxu0 %v567_v36 }
  0xf5   : > { %1537 = vmatmul.mubr.bf16.vlgmr.msra.gmra.mrb[0].mxu1 %v567_v36  ;;  %1320 = vmatprep.mubr.bf16.mxu0 %v5420_v29  ;;  %v5139_v36 = vld [vmem:[%s7584_s2 + $0x44] ss:$8 sps:$4 sm:$0xff]  }
  0xf6   : > { %1546 = vmatprep.mubr.bf16.mxu1 %v5420_v29  ;;  %2614 = vmatpush1.bf16.msra.mxu0 %v5125_v1 }
  0xf7   : > { %2615 = vmatprep.subr.bf16.mxu0 %v5130_v14 }
  0xfa   : > { %2616 = vmatpush1.bf16.msra.mxu0 %v5128_v15 }
  0xfb   : > { %2617 = vmatprep.subr.bf16.mxu0 %v5133_v22  ;;  %v5148_v22 = vld [vmem:[%s7584_s2 + $0x74] ss:$8 sps:$4 sm:$0xff]  }
  0xfc   : > { %1321 = vmatmul.mubr.bf16.gmra.mrb[4].mxu0 %v570_v39 }
  0xfd   : > { %1547 = vmatmul.mubr.bf16.gmra.mrb[4].mxu1 %v570_v39  ;;  %1330 = vmatprep.mubr.bf16.mxu0 %v5420_v29 }
  0xfe   : > { %1556 = vmatprep.mubr.bf16.mxu1 %v5420_v29  ;;  %2618 = vmatpush1.bf16.msra.mxu0 %v5131_v31 }
  0xff   : > { %2619 = vmatprep.subr.bf16.mxu0 %v5136_v34  ;;  %v5151_v34 = vld [vmem:[%s7584_s2 + $0x84] ss:$8 sps:$4 sm:$0xff]  }
 0x102   : > { %2620 = vmatpush1.bf16.msra.mxu0 %v5134_v35 }
 0x103   : > { %2621 = vmatprep.subr.bf16.mxu0 %v5139_v36 }
 0x104   : > { %1331 = vmatmul.mubr.bf16.gmra.mrb[8].mxu0 %v573_v42 }
 0x105   : > { %1557 = vmatmul.mubr.bf16.gmra.mrb[8].mxu1 %v573_v42  ;;  %1340 = vmatprep.mubr.bf16.mxu0 %v5420_v29 }
 0x106   : > { %1566 = vmatprep.mubr.bf16.mxu1 %v5420_v29  ;;  %2622 = vmatpush1.bf16.msra.mxu0 %v5137_v41 }
 0x10c   : > { %1341 = vmatmul.mubr.bf16.gmra.mrb[12].mxu0 %v576_v45 }
 0x10d   : > { %1567 = vmatmul.mubr.bf16.gmra.mrb[12].mxu1 %v576_v45  ;;  %1350 = vmatprep.mubr.bf16.mxu0 %v5420_v29 }
 0x10e   : > { %1576 = vmatprep.mubr.bf16.mxu1 %v5420_v29 }
 0x114   : > { %1351 = vmatmul.mubr.bf16.gmra.mrb[16].mxu0 %v579_v48 }
 0x115   : > { %1577 = vmatmul.mubr.bf16.gmra.mrb[16].mxu1 %v579_v48  ;;  %1360 = vmatprep.mubr.bf16.mxu0 %v5420_v29  ;;  %v5142_v48 = vld [vmem:[%s7584_s2 + $0x54] ss:$8 sps:$4 sm:$0xff]  }
 0x116   : > { %1586 = vmatprep.mubr.bf16.mxu1 %v5420_v29  ;;  %2623 = vmatprep.subr.bf16.mxu0 %v5142_v48  ;;  %v5154_v48 = vld [vmem:[%s7584_s2 + $0x94] ss:$8 sps:$4 sm:$0xff]  }
 0x117   : > { %2624 = vmatpush1.bf16.msra.mxu0 %v5140_v49  ;;  %v5152_v49 = vld [vmem:[%s7584_s2 + $0x90] ss:$8 sps:$4 sm:$0xff]  }
 0x118   : > { %2625 = vmatprep.subr.bf16.mxu0 %v5145_v56 }
 0x11c   : > { %1361 = vmatmul.mubr.bf16.gmra.mrb[20].mxu0 %v582_v51 }
 0x11d   : > { %1587 = vmatmul.mubr.bf16.gmra.mrb[20].mxu1 %v582_v51  ;;  %1370 = vmatprep.mubr.bf16.mxu0 %v5420_v29 }
 0x11e   : > { %1596 = vmatprep.mubr.bf16.mxu1 %v5420_v29 }
 0x124   : > { %1371 = vmatmul.mubr.bf16.gmra.mrb[24].mxu0 %v585_v54 }
 0x125   : > { %1597 = vmatmul.mubr.bf16.gmra.mrb[24].mxu1 %v585_v54  ;;  %1380 = vmatprep.mubr.bf16.mxu0 %v5420_v29 }
 0x126   : > { %1606 = vmatprep.mubr.bf16.mxu1 %v5420_v29 }
 0x12c   : > { %1381 = vmatmul.mubr.bf16.gmra.mrb[28].mxu0 %v588_v57 }
 0x12d   : > { %1607 = vmatmul.mubr.bf16.gmra.mrb[28].mxu1 %v588_v57 }
 0x1c7   : > { %v6058_v58 = vpop.f32.mrb[0].mxu0 }
 0x1c8   : > { %v6060_v59 = vpop.f32.mrb[0].mxu1  ;;  %v6062_v60 = vpop.f32.mrb[1].mxu0 }
 0x1c9   : > { %v6064_v61 = vpop.f32.mrb[1].mxu1  ;;  %v6069_v63 = vpop.f32.mrb[2].mxu0 }
 0x1ca   : > { %7656 = vst [vmem:[#allocation13_spill] sm:$0xff] %v6064_v61  ;;  %v6071_v0 = vpop.f32.mrb[2].mxu1  ;;  %v1620_v2 = vadd.f32 %v6069_v63, %v6058_v58  ;;  %v6080_v6 = vpop.f32.mrb[3].mxu0 }
 0x1cb   : > { %v1662_v3 = vadd.f32 %v6071_v0, %v6060_v59  ;;  %v6082_v7 = vpop.f32.mrb[3].mxu1  ;;  %v1641_v8 = vadd.f32 %v6080_v6, %v6062_v60 }
 0x1cc   : > { %7657 = vst [vmem:[#allocation14_spill] sm:$0xff] %v6082_v7  ;;  %v1683_v9 = vadd.f32 %v6082_v7, %v6064_v61 }
 0x1cf   : > { %v6094_v16 = vpop.f32.mrb[4].mxu0 }
 0x1d0   : > { %v6096_v4 = vpop.f32.mrb[4].mxu1  ;;  %v1621_v5 = vadd.f32 %v1620_v2, %v6094_v16  ;;  %v6100_v10 = vpop.f32.mrb[5].mxu0 }
 0x1d1   : > { %v1663_v17 = vadd.f32 %v1662_v3, %v6096_v4  ;;  %v6102_v11 = vpop.f32.mrb[5].mxu1  ;;  %v1642_v23 = vadd.f32 %v1641_v8, %v6100_v10  ;;  %v6109_v26 = vpop.f32.mrb[6].mxu0  ;;  %v5143_v3 = vld [vmem:[%s7584_s2 + $0x60] ss:$8 sps:$4 sm:$0xff]  }
 0x1d2   : > { %7658 = vst [vmem:[#allocation15_spill] sm:$0xff] %v6102_v11  ;;  %v1684_v24 = vadd.f32 %v1683_v9, %v6102_v11  ;;  %v6111_v30 = vpop.f32.mrb[6].mxu1  ;;  %v1622_v32 = vadd.f32 %v1621_v5, %v6109_v26  ;;  %v6118_v12 = vpop.f32.mrb[7].mxu0  ;;  %2626 = vmatpush1.bf16.msra.mxu0 %v5143_v3 }
 0x1d3   : > { %v1664_v33 = vadd.f32 %v1663_v17, %v6111_v30  ;;  %v6120_v13 = vpop.f32.mrb[7].mxu1  ;;  %v1643_v18 = vadd.f32 %v1642_v23, %v6118_v12  ;;  %v5146_v23 = vld [vmem:[%s7584_s2 + $0x70] ss:$8 sps:$4 sm:$0xff]   ;;  %2627 = vmatprep.subr.bf16.mxu0 %v5148_v22 }
 0x1d4   : > { %7659 = vst [vmem:[#allocation16_spill] sm:$0xff] %v6120_v13  ;;  %v1685_v19 = vadd.f32 %v1684_v24, %v6120_v13 }
 0x1d6   : > { %2628 = vmatpush1.bf16.msra.mxu0 %v5146_v23  ;;  %v5155_v23 = vld [vmem:[%s7584_s2 + $0xa0] ss:$8 sps:$4 sm:$0xff]  }
 0x1d7   : > { %v6130_v20 = vpop.f32.mrb[8].mxu0  ;;  %2629 = vmatprep.subr.bf16.mxu0 %v5151_v34 }
 0x1d8   : > { %v6132_v21 = vpop.f32.mrb[8].mxu1  ;;  %v1623_v25 = vadd.f32 %v1622_v32, %v6130_v20  ;;  %v6136_v28 = vpop.f32.mrb[9].mxu0 }
 0x1d9   : > { %v1665_v27 = vadd.f32 %v1664_v33, %v6132_v21  ;;  %v6138_v29 = vpop.f32.mrb[9].mxu1  ;;  %v1644_v37 = vadd.f32 %v1643_v18, %v6136_v28  ;;  %v6145_v39 = vpop.f32.mrb[10].mxu0 }
 0x1da   : > { %7660 = vst [vmem:[#allocation17_spill] sm:$0xff] %v6138_v29  ;;  %v1686_v38 = vadd.f32 %v1685_v19, %v6138_v29  ;;  %v6147_v40 = vpop.f32.mrb[10].mxu1  ;;  %v1624_v42 = vadd.f32 %v1623_v25, %v6145_v39  ;;  %v6154_v44 = vpop.f32.mrb[11].mxu0 }
 0x1db   : > { %v1666_v43 = vadd.f32 %v1665_v27, %v6147_v40  ;;  %v6156_v45 = vpop.f32.mrb[11].mxu1  ;;  %v1645_v46 = vadd.f32 %v1644_v37, %v6154_v44 }
 0x1dc   : > { %7661 = vst [vmem:[#allocation18_spill] sm:$0xff] %v6156_v45  ;;  %v1687_v47 = vadd.f32 %v1686_v38, %v6156_v45 }
 0x1df   : > { %v6166_v50 = vpop.f32.mrb[12].mxu0 }
 0x1e0   : > { %v6168_v51 = vpop.f32.mrb[12].mxu1  ;;  %v1625_v52 = vadd.f32 %v1624_v42, %v6166_v50  ;;  %v6172_v54 = vpop.f32.mrb[13].mxu0 }
 0x1e1   : > { %v1667_v53 = vadd.f32 %v1666_v43, %v6168_v51  ;;  %v6174_v55 = vpop.f32.mrb[13].mxu1  ;;  %v1646_v57 = vadd.f32 %v1645_v46, %v6172_v54  ;;  %v6181_v1 = vpop.f32.mrb[14].mxu0 }
 0x1e2   : > { %7662 = vst [vmem:[#allocation19_spill] sm:$0xff] %v6174_v55  ;;  %v1688_v62 = vadd.f32 %v1687_v47, %v6174_v55  ;;  %v6183_v2 = vpop.f32.mrb[14].mxu1  ;;  %v1626_v8 = vadd.f32 %v1625_v52, %v6181_v1  ;;  %v6190_v14 = vpop.f32.mrb[15].mxu0  ;;  %v5149_v47 = vld [vmem:[%s7584_s2 + $0x80] ss:$8 sps:$4 sm:$0xff]  }
 0x1e3   : > { %v1668_v9 = vadd.f32 %v1667_v53, %v6183_v2  ;;  %v6192_v15 = vpop.f32.mrb[15].mxu1  ;;  %v1647_v5 = vadd.f32 %v1646_v57, %v6190_v14  ;;  %2630 = vmatpush1.bf16.msra.mxu0 %v5149_v47  ;;  %v5169_v55 = vld [vmem:[%s7584_s2 + $0xe4] ss:$8 sps:$4 sm:$0xff]  }
 0x1e4   : > { %7663 = vst [vmem:[#allocation20_spill] sm:$0xff] %v6192_v15  ;;  %v1689_v17 = vadd.f32 %v1688_v62, %v6192_v15  ;;  %2631 = vmatprep.subr.bf16.mxu0 %v5154_v48 }
 0x1e7   : > { %v6202_v24 = vpop.f32.mrb[16].mxu0  ;;  %2632 = vmatpush1.bf16.msra.mxu0 %v5152_v49 }
 0x1e8   : > { %v6204_v31 = vpop.f32.mrb[16].mxu1  ;;  %v1627_v32 = vadd.f32 %v1626_v8, %v6202_v24  ;;  %v6208_v18 = vpop.f32.mrb[17].mxu0  ;;  %v5157_v8 = vld [vmem:[%s7584_s2 + $0xa4] ss:$8 sps:$4 sm:$0xff]  }
 0x1e9   : > { %v1669_v33 = vadd.f32 %v1668_v9, %v6204_v31  ;;  %7664 = vst [vmem:[#allocation21_spill] sm:$0xff] %v6208_v18  ;;  %v6210_v19 = vpop.f32.mrb[17].mxu1  ;;  %v1648_v35 = vadd.f32 %v1647_v5, %v6208_v18  ;;  %v6217_v27 = vpop.f32.mrb[18].mxu0  ;;  %2633 = vmatprep.subr.bf16.mxu0 %v5157_v8  ;;  %v5163_v8 = vld [vmem:[%s7584_s2 + $0xc4] ss:$8 sps:$4 sm:$0xff]  }
 0x1ea   : > { %7665 = vst [vmem:[#allocation22_spill] sm:$0xff] %v6210_v19  ;;  %v1690_v25 = vadd.f32 %v1689_v17, %v6210_v19  ;;  %v6219_v36 = vpop.f32.mrb[18].mxu1  ;;  %v1628_v37 = vadd.f32 %v1627_v32, %v6217_v27  ;;  %v6223_v41 = vpop.f32.mrb[19].mxu0 }
 0x1eb   : > { %v1670_v38 = vadd.f32 %v1669_v33, %v6219_v36  ;;  %7666 = vst [vmem:[#allocation23_spill] sm:$0xff] %v6223_v41  ;;  %v6225_v42 = vpop.f32.mrb[19].mxu1  ;;  %v1649_v43 = vadd.f32 %v1648_v35, %v6223_v41  ;;  %2634 = vmatpush1.bf16.msra.mxu0 %v5155_v23 }
 0x1ec   : > { %7667 = vst [vmem:[#allocation24_spill] sm:$0xff] %v6225_v42  ;;  %v1691_v46 = vadd.f32 %v1690_v25, %v6225_v42 }
 0x1ef   : > { %v6238_v52 = vpop.f32.mrb[20].mxu0 }
 0x1f0   : > { %v6240_v53 = vpop.f32.mrb[20].mxu1  ;;  %v1629_v56 = vadd.f32 %v1628_v37, %v6238_v52  ;;  %v6244_v62 = vpop.f32.mrb[21].mxu0 }
 0x1f1   : > { %v1671_v57 = vadd.f32 %v1670_v38, %v6240_v53  ;;  %7668 = vst [vmem:[#allocation25_spill] sm:$0xff] %v6244_v62  ;;  %v6246_v3 = vpop.f32.mrb[21].mxu1  ;;  %v1650_v9 = vadd.f32 %v1649_v43, %v6244_v62  ;;  %v6253_v17 = vpop.f32.mrb[22].mxu0  ;;  %v5160_v38 = vld [vmem:[%s7584_s2 + $0xb4] ss:$8 sps:$4 sm:$0xff]  }
 0x1f2   : > { %7669 = vst [vmem:[#allocation26_spill] sm:$0xff] %v6246_v3  ;;  %v1692_v5 = vadd.f32 %v1691_v46, %v6246_v3  ;;  %v6255_v22 = vpop.f32.mrb[22].mxu1  ;;  %v1630_v32 = vadd.f32 %v1629_v56, %v6253_v17  ;;  %v6262_v34 = vpop.f32.mrb[23].mxu0  ;;  %v5158_v43 = vld [vmem:[%s7584_s2 + $0xb0] ss:$8 sps:$4 sm:$0xff]   ;;  %2635 = vmatprep.subr.bf16.mxu0 %v5160_v38 }
 0x1f3   : > { %v1672_v33 = vadd.f32 %v1671_v57, %v6255_v22  ;;  %7670 = vst [vmem:[#allocation27_spill] sm:$0xff] %v6262_v34  ;;  %v6264_v35 = vpop.f32.mrb[23].mxu1  ;;  %v1651_v25 = vadd.f32 %v1650_v9, %v6262_v34  ;;  %2636 = vmatpush1.bf16.msra.mxu0 %v5158_v43  ;;  %v5166_v43 = vld [vmem:[%s7584_s2 + $0xd4] ss:$8 sps:$4 sm:$0xff]  }
 0x1f4   : > { %7671 = vst [vmem:[#allocation28_spill] sm:$0xff] %v6264_v35  ;;  %v1693_v37 = vadd.f32 %v1692_v5, %v6264_v35  ;;  %v1942_v35 = vlaneseq  ;;  %2637 = vmatprep.subr.bf16.mxu0 %v5163_v8 }
 0x1f7   : > { %v6274_v46 = vpop.f32.mrb[24].mxu0 }
 0x1f8   : > { %v6276_v47 = vpop.f32.mrb[24].mxu1  ;;  %v1631_v48 = vadd.f32 %v1630_v32, %v6274_v46  ;;  %v6280_v56 = vpop.f32.mrb[25].mxu0  ;;  %v5161_v32 = vld [vmem:[%s7584_s2 + $0xc0] ss:$8 sps:$4 sm:$0xff]  }
 0x1f9   : > { %v1673_v49 = vadd.f32 %v1672_v33, %v6276_v47  ;;  %7672 = vst [vmem:[#allocation29_spill] sm:$0xff] %v6280_v56  ;;  %v6282_v57 = vpop.f32.mrb[25].mxu1  ;;  %v1652_v9 = vadd.f32 %v1651_v25, %v6280_v56  ;;  %v6289_v23 = vpop.f32.mrb[26].mxu0  ;;  %2638 = vmatpush1.bf16.msra.mxu0 %v5161_v32 }
 0x1fa   : > { %7673 = vst [vmem:[#allocation30_spill] sm:$0xff] %v6282_v57  ;;  %v1694_v5 = vadd.f32 %v1693_v37, %v6282_v57  ;;  %v6291_v38 = vpop.f32.mrb[26].mxu1  ;;  %v1632_v33 = vadd.f32 %v1631_v48, %v6289_v23  ;;  %v6298_v42 = vpop.f32.mrb[27].mxu0  ;;  %v6307_v57 = vshrl.u32 %v1942_v35, 7  ;;  %v5164_v48 = vld [vmem:[%s7584_s2 + $0xd0] ss:$8 sps:$4 sm:$0xff]   ;;  %2639 = vmatprep.subr.bf16.mxu0 %v5166_v43 }
 0x1fb   : > { %v1674_v3 = vadd.f32 %v1673_v49, %v6291_v38  ;;  %7674 = vst [vmem:[#allocation31_spill] sm:$0xff] %v6298_v42  ;;  %v6300_v19 = vpop.f32.mrb[27].mxu1  ;;  %v1653_v25 = vadd.f32 %v1652_v9, %v6298_v42  ;;  %v6312_v49 = vld [vmem:[#allocation8 + $0x1] ss:$8 sm:$0xf] }
 0x1fc   : > { %7675 = vst [vmem:[#allocation32_spill] sm:$0xff] %v6300_v19  ;;  %v1695_v37 = vadd.f32 %v1694_v5, %v6300_v19  ;;  %7676 = vst [vmem:[#allocation33_spill] sm:$0xff] %v6307_v57  ;;  %v7610_v9 = vsub.s32 2, %v6307_v57 }
 0x1fd   : > { %7677 = vst [vmem:[#allocation34_spill] sm:$0xff] %v6312_v49  ;;  %2640 = vmatpush1.bf16.msra.mxu0 %v5164_v48  ;;  %v5172_v48 = vld [vmem:[%s7584_s2 + $0xf4] ss:$8 sps:$4 sm:$0xff]  }
 0x1fe   : > { %2641 = vmatprep.subr.bf16.mxu0 %v5169_v55 }
 0x1ff   : > { %v6314_v15 = vpop.f32.mrb[28].mxu0 }
 0x200   : > { %v6316_v8 = vpop.f32.mrb[28].mxu1  ;;  %v1633_v5 = vadd.f32 %v1632_v33, %v6314_v15  ;;  %v6321_v35 = vpop.f32.mrb[29].mxu0  ;;  %v6335_v33 = vrot.slane %v6312_v49, %v7610_v9 }
 0x201   : > { %v1675_v19 = vadd.f32 %v1674_v3, %v6316_v8  ;;  %7678 = vst [vmem:[#allocation35_spill] sm:$0xff] %v6321_v35  ;;  %v6323_v32 = vpop.f32.mrb[29].mxu1  ;;  %v1654_v43 = vadd.f32 %v1653_v25, %v6321_v35  ;;  %v1386_v29 = vpop.f32.mrb[30].mxu0  ;;  %v5167_v3 = vld [vmem:[%s7584_s2 + $0xe0] ss:$8 sps:$4 sm:$0xff]  }
 0x202   : > { %7679 = vst [vmem:[#allocation36_spill] sm:$0xff] %v6323_v32  ;;  %v1696_v45 = vadd.f32 %v1695_v37, %v6323_v32  ;;  %v6330_v13 = vpop.f32.mrb[30].mxu1  ;;  %7680 = vst [vmem:[#allocation37_spill] sm:$0xff] %v6335_v33  ;;  %v1634_v11 = vadd.f32 %v1633_v5, %v1386_v29  ;;  %v6341_v61 = vpop.f32.mrb[31].mxu0  ;;  %2642 = vmatpush1.bf16.msra.mxu0 %v5167_v3 }
 0x203   : > { %v1676_v7 = vadd.f32 %v1675_v19, %v6330_v13  ;;  %7681 = vst [vmem:[#allocation38_spill] sm:$0xff] %v6341_v61  ;;  %v6343_v25 = vpop.f32.mrb[31].mxu1  ;;  %v1655_v37 = vadd.f32 %v1654_v43, %v6341_v61  ;;  %v5170_v19 = vld [vmem:[%s7584_s2 + $0xf0] ss:$8 sps:$4 sm:$0xff]   ;;  %2643 = vmatprep.subr.bf16.mxu0 %v5172_v48 }
 0x204   : > { %7682 = vst [vmem:[#allocation39_spill] sm:$0xff] %v6343_v25  ;;  %v1697_v57 = vadd.f32 %v1696_v45, %v6343_v25  ;;  %v1635_v9 = vrot.slane %v1634_v11, 4  ;;  %v5175_v45 = vld [vmem:[%s7584_s2 + $0x104] ss:$8 sps:$4 sm:$0xff]  }
 0x205   : > { %v1677_v33 = vrot.slane %v1676_v7, 4  ;;  %v1656_v49 = vrot.slane %v1655_v37, 4 }
 0x206   : > { %v1698_v32 = vrot.slane %v1697_v57, 4  ;;  %v1636_v5 = vadd.f32 %v1635_v9, %v1634_v11  ;;  %2644 = vmatpush1.bf16.msra.mxu0 %v5170_v19 }
 0x207   : > { %v1678_v35 = vadd.f32 %v1677_v33, %v1676_v7  ;;  %v1657_v55 = vadd.f32 %v1656_v49, %v1655_v37  ;;  %2726 = vmatprep.subr.bf16.mxu0 %v5175_v45 }
 0x208   : > { %v1637_v43 = vrot.slane %v1636_v5, 2  ;;  %v1699_v42 = vadd.f32 %v1698_v32, %v1697_v57 }
 0x209   : > { %v1679_v61 = vrot.slane %v1678_v35, 2  ;;  %v1658_v25 = vrot.slane %v1657_v55, 2 }
 0x20a   : > { %v1638_v56 = vadd.f32 %v1637_v43, %v1636_v5  ;;  %v1700_v18 = vrot.slane %v1699_v42, 2 }
 0x20b   : > { %v1680_v34 = vadd.f32 %v1679_v61, %v1678_v35  ;;  %v1659_v41 = vadd.f32 %v1658_v25, %v1657_v55 }
 0x20c   : > { %v1639_v3 = vrot.slane %v1638_v56, 1  ;;  %v1701_v33 = vadd.f32 %v1700_v18, %v1699_v42 }
 0x20d   : > { %v1681_v62 = vrot.slane %v1680_v34, 1  ;;  %v1660_v49 = vrot.slane %v1659_v41, 1 }
 0x20e   : > { %v1640_v11 = vadd.f32 %v1639_v3, %v1638_v56 }
 0x20f   : > { %v1682_v9 = vadd.f32 %v1681_v62, %v1680_v34  ;;  %v1661_v34 = vadd.f32 %v1660_v49, %v1659_v41 }
 0x210   : > { %v1705_v7 = vmul.f32 0.0078125, %v1640_v11 }
 0x212   : > { %v6357_v37 = vsub.f32 %v6058_v58, %v1705_v7  ;;  %v6360_v48 = vsub.f32 %v6069_v63, %v1705_v7  ;;  %v6363_v57 = vsub.f32 %v6094_v16, %v1705_v7  ;;  %v6366_v61 = vsub.f32 %v6109_v26, %v1705_v7 }
 0x213   : > { %v6369_v35 = vsub.f32 %v6130_v20, %v1705_v7  ;;  %v6372_v56 = vsub.f32 %v6145_v39, %v1705_v7  ;;  %v6375_v18 = vsub.f32 %v6166_v50, %v1705_v7  ;;  %v6378_v58 = vsub.f32 %v6181_v1, %v1705_v7 }
 0x214   : > { %v6381_v63 = vsub.f32 %v6202_v24, %v1705_v7  ;;  %v6384_v16 = vsub.f32 %v6217_v27, %v1705_v7  ;;  %v6387_v26 = vsub.f32 %v6238_v52, %v1705_v7  ;;  %v6390_v20 = vsub.f32 %v6253_v17, %v1705_v7 }
 0x215   : > { %7683 = vst [vmem:[#allocation40_spill] sm:$0xff] %v6378_v58  ;;  %v6393_v39 = vsub.f32 %v6274_v46, %v1705_v7  ;;  %v6396_v50 = vsub.f32 %v6289_v23, %v1705_v7  ;;  %v6399_v1 = vsub.f32 %v6314_v15, %v1705_v7  ;;  %v6401_v24 = vsub.f32 %v1386_v29, %v1705_v7 }
 0x216   : > { %7684 = vst [vmem:[#allocation41_spill] sm:$0xff] %v6381_v63  ;;  %7685 = vst [vmem:[#allocation42_spill] sm:$0xff] %v6384_v16  ;;  %v1773_v27 = vmul.f32 %v6357_v37, %v6357_v37  ;;  %v1777_v42 = vmul.f32 %v6360_v48, %v6360_v48  ;;  %v1707_v52 = vmul.f32 0.0078125, %v1682_v9  ;;  %v1781_v62 = vmul.f32 %v6363_v57, %v6363_v57 }
 0x217   : > { %7686 = vst [vmem:[#allocation43_spill] sm:$0xff] %v6387_v26  ;;  %7687 = vst [vmem:[#allocation44_spill] sm:$0xff] %v6390_v20  ;;  %v1785_v17 = vmul.f32 %v6366_v61, %v6366_v61  ;;  %v1702_v46 = vrot.slane %v1701_v33, 1  ;;  %v1797_v3 = vmul.f32 %v6375_v18, %v6375_v18 }
 0x218   : > { %7688 = vst [vmem:[#allocation45_spill] sm:$0xff] %v6393_v39  ;;  %7689 = vst [vmem:[#allocation46_spill] sm:$0xff] %v6396_v50  ;;  %v1837_v23 = vadd.f32 %v1777_v42, %v1773_v27  ;;  %v6412_v15 = vsub.f32 %v6060_v59, %v1707_v52  ;;  %v6415_v29 = vsub.f32 %v6071_v0, %v1707_v52 }
 0x219   : > { %v6418_v32 = vsub.f32 %v6096_v4, %v1707_v52  ;;  %v6421_v25 = vsub.f32 %v6111_v30, %v1707_v52  ;;  %v6424_v19 = vsub.f32 %v6132_v21, %v1707_v52  ;;  %v6427_v5 = vsub.f32 %v6147_v40, %v1707_v52 }
 0x21a   : > { %7690 = vst [vmem:[#allocation47_spill] sm:$0xff] %v6412_v15  ;;  %7691 = vst [vmem:[#allocation48_spill] sm:$0xff] %v6415_v29  ;;  %v6430_v41 = vsub.f32 %v6168_v51, %v1707_v52  ;;  %v1838_v59 = vadd.f32 %v1837_v23, %v1781_v62  ;;  %v6433_v55 = vsub.f32 %v6183_v2, %v1707_v52 }
 0x21b   : > { %7692 = vst [vmem:[#allocation49_spill] sm:$0xff] %v6418_v32  ;;  %7693 = vst [vmem:[#allocation50_spill] sm:$0xff] %v6421_v25  ;;  %v6436_v0 = vsub.f32 %v6204_v31, %v1707_v52  ;;  %v6439_v4 = vsub.f32 %v6219_v36, %v1707_v52  ;;  %v6442_v30 = vsub.f32 %v6240_v53, %v1707_v52 }
 0x21c   : > { %7694 = vst [vmem:[#allocation51_spill] sm:$0xff] %v6424_v19  ;;  %7695 = vst [vmem:[#allocation52_spill] sm:$0xff] %v6427_v5  ;;  %v6445_v21 = vsub.f32 %v6255_v22, %v1707_v52  ;;  %v6448_v40 = vsub.f32 %v6276_v47, %v1707_v52  ;;  %v6451_v51 = vsub.f32 %v6291_v38, %v1707_v52  ;;  %v1706_v47 = vmul.f32 0.0078125, %v1661_v34 }
 0x21d   : > { %7696 = vst [vmem:[#allocation53_spill] sm:$0xff] %v6430_v41  ;;  %7697 = vst [vmem:[#allocation54_spill] sm:$0xff] %v6433_v55  ;;  %v1789_v2 = vmul.f32 %v6369_v35, %v6369_v35  ;;  %v1839_v31 = vadd.f32 %v1838_v59, %v1785_v17  ;;  %v6456_v43 = vsub.f32 %v6316_v8, %v1707_v52 }
 0x21e   : > { %7698 = vst [vmem:[#allocation55_spill] sm:$0xff] %v6436_v0  ;;  %7699 = vst [vmem:[#allocation56_spill] sm:$0xff] %v6439_v4  ;;  %v6459_v36 = vsub.f32 %v6330_v13, %v1707_v52  ;;  %v1775_v53 = vmul.f32 %v6412_v15, %v6412_v15  ;;  %v1779_v22 = vmul.f32 %v6415_v29, %v6415_v29 }
 0x21f   : > { %7700 = vst [vmem:[#allocation57_spill] sm:$0xff] %v6442_v30  ;;  %v1793_v38 = vmul.f32 %v6372_v56, %v6372_v56  ;;  %v1840_v45 = vadd.f32 %v1839_v31, %v1789_v2  ;;  %v1801_v8 = vmul.f32 %v6378_v58, %v6378_v58  ;;  %v1703_v11 = vadd.f32 %v1702_v46, %v1701_v33  ;;  %v7701_v31 = vld [vmem:[#allocation21_spill] sm:$0xff] }
 0x220   : > { %v1805_v13 = vmul.f32 %v6381_v63, %v6381_v63  ;;  %v1783_v9 = vmul.f32 %v6418_v32, %v6418_v32  ;;  %v1787_v49 = vmul.f32 %v6421_v25, %v6421_v25  ;;  %v1791_v27 = vmul.f32 %v6424_v19, %v6424_v19  ;;  %v7720_v25 = vld [vmem:[#allocation22_spill] sm:$0xff]  ;;  %v7722_v32 = vld [vmem:[#allocation24_spill] sm:$0xff] }
 0x221   : > { %v1841_v7 = vadd.f32 %v1840_v45, %v1793_v38  ;;  %v1879_v42 = vadd.f32 %v1779_v22, %v1775_v53  ;;  %v6480_v52 = vsub.f32 %v6062_v60, %v1706_v47  ;;  %v6483_v62 = vsub.f32 %v6080_v6, %v1706_v47  ;;  %v7702_v53 = vld [vmem:[#allocation23_spill] sm:$0xff]  ;;  %v7703_v22 = vld [vmem:[#allocation25_spill] sm:$0xff]  ;;  %v7725_v63 = vld [vmem:[#allocation30_spill] sm:$0xff] }
 0x222   : > { %v6486_v17 = vsub.f32 %v6100_v10, %v1706_v47  ;;  %v6489_v34 = vsub.f32 %v6118_v12, %v1706_v47  ;;  %v6492_v46 = vsub.f32 %v6136_v28, %v1706_v47  ;;  %v6495_v59 = vsub.f32 %v6154_v44, %v1706_v47  ;;  %v7704_v45 = vld [vmem:[#allocation27_spill] sm:$0xff] }
 0x223   : > { %v1842_v33 = vadd.f32 %v1841_v7, %v1797_v3  ;;  %v1880_v23 = vadd.f32 %v1879_v42, %v1783_v9  ;;  %v6498_v60 = vsub.f32 %v6172_v54, %v1706_v47  ;;  %v6501_v6 = vsub.f32 %v6190_v14, %v1706_v47  ;;  %v7705_v3 = vld [vmem:[#allocation29_spill] sm:$0xff]  ;;  %v7706_v7 = vld [vmem:[#allocation31_spill] sm:$0xff] }
 0x224   : > { %v6504_v10 = vsub.f32 %v7701_v31, %v1706_v47  ;;  %v6507_v12 = vsub.f32 %v7702_v53, %v1706_v47  ;;  %v6510_v28 = vsub.f32 %v7703_v22, %v1706_v47  ;;  %v6513_v44 = vsub.f32 %v7704_v45, %v1706_v47  ;;  %v7707_v42 = vld [vmem:[#allocation35_spill] sm:$0xff]  ;;  %v7708_v31 = vld [vmem:[#allocation38_spill] sm:$0xff] }
 0x225   : > { %v1843_v2 = vadd.f32 %v1842_v33, %v1801_v8  ;;  %v1881_v38 = vadd.f32 %v1880_v23, %v1787_v49  ;;  %v6516_v54 = vsub.f32 %v7705_v3, %v1706_v47  ;;  %v6519_v14 = vsub.f32 %v7706_v7, %v1706_v47 }
 0x226   : > { %v1809_v8 = vmul.f32 %v6384_v16, %v6384_v16  ;;  %v6524_v33 = vsub.f32 %v7707_v42, %v1706_v47  ;;  %v6527_v53 = vsub.f32 %v7708_v31, %v1706_v47  ;;  %v1795_v49 = vmul.f32 %v6427_v5, %v6427_v5  ;;  %v7723_v16 = vld [vmem:[#allocation26_spill] sm:$0xff] }
 0x227   : > { %v1844_v9 = vadd.f32 %v1843_v2, %v1805_v13  ;;  %v1882_v23 = vadd.f32 %v1881_v38, %v1791_v27  ;;  %v1708_v22 = vmul.f32 0.0078125, %v1703_v11  ;;  %v1813_v45 = vmul.f32 %v6387_v26, %v6387_v26 }
 0x228   : > { %v1774_v7 = vmul.f32 %v6480_v52, %v6480_v52  ;;  %v1778_v13 = vmul.f32 %v6483_v62, %v6483_v62  ;;  %v1817_v2 = vmul.f32 %v6390_v20, %v6390_v20  ;;  %v1821_v47 = vmul.f32 %v6393_v39, %v6393_v39 }
 0x229   : > { %v1845_v3 = vadd.f32 %v1844_v9, %v1809_v8  ;;  %v1799_v27 = vmul.f32 %v6430_v41, %v6430_v41  ;;  %v1883_v11 = vadd.f32 %v1882_v23, %v1795_v49  ;;  %v1803_v8 = vmul.f32 %v6433_v55, %v6433_v55  ;;  %v7710_v41 = vld [vmem:[#allocation14_spill] sm:$0xff] }
 0x22a   : > { %v1807_v9 = vmul.f32 %v6436_v0, %v6436_v0  ;;  %v1811_v42 = vmul.f32 %v6439_v4, %v6439_v4  ;;  %v1815_v31 = vmul.f32 %v6442_v30, %v6442_v30  ;;  %v1782_v39 = vmul.f32 %v6486_v17, %v6486_v17  ;;  %v7712_v4 = vld [vmem:[#allocation15_spill] sm:$0xff]  ;;  %v7713_v30 = vld [vmem:[#allocation16_spill] sm:$0xff] }
 0x22b   : > { %v1846_v38 = vadd.f32 %v1845_v3, %v1813_v45  ;;  %v1884_v5 = vadd.f32 %v1883_v11, %v1799_v27  ;;  %v1786_v49 = vmul.f32 %v6489_v34, %v6489_v34  ;;  %v1858_v45 = vadd.f32 %v1778_v13, %v1774_v7  ;;  %v7709_v3 = vld [vmem:[#allocation13_spill] sm:$0xff]  ;;  %v7716_v13 = vld [vmem:[#allocation18_spill] sm:$0xff] }
 0x22c   : > { %v6556_v55 = vsub.f32 %v7709_v3, %v1708_v22  ;;  %v6559_v0 = vsub.f32 %v7710_v41, %v1708_v22  ;;  %v6562_v20 = vsub.f32 %v7712_v4, %v1708_v22  ;;  %v6565_v27 = vsub.f32 %v7713_v30, %v1708_v22  ;;  %v7714_v11 = vld [vmem:[#allocation17_spill] sm:$0xff]  ;;  %v7718_v3 = vld [vmem:[#allocation19_spill] sm:$0xff] }
 0x22d   : > { %v1847_v23 = vadd.f32 %v1846_v38, %v1817_v2  ;;  %v1885_v19 = vadd.f32 %v1884_v5, %v1803_v8  ;;  %v6568_v26 = vsub.f32 %v7714_v11, %v1708_v22  ;;  %v1790_v2 = vmul.f32 %v6492_v46, %v6492_v46  ;;  %v7719_v8 = vld [vmem:[#allocation20_spill] sm:$0xff] }
 0x22e   : > { %7711 = vst [vmem:[#allocation21_spill] sm:$0xff] %v6559_v0  ;;  %v1859_v7 = vadd.f32 %v1858_v45, %v1782_v39  ;;  %v6573_v38 = vsub.f32 %v7716_v13, %v1708_v22  ;;  %v6576_v41 = vsub.f32 %v7718_v3, %v1708_v22  ;;  %v6579_v4 = vsub.f32 %v7719_v8, %v1708_v22  ;;  %v7724_v45 = vld [vmem:[#allocation28_spill] sm:$0xff] }
 0x22f   : > { %7715 = vst [vmem:[#allocation23_spill] sm:$0xff] %v6568_v26  ;;  %v1886_v5 = vadd.f32 %v1885_v19, %v1807_v9  ;;  %v6582_v30 = vsub.f32 %v7720_v25, %v1708_v22  ;;  %v6585_v11 = vsub.f32 %v7722_v32, %v1708_v22  ;;  %v1848_v29 = vadd.f32 %v1847_v23, %v1821_v47  ;;  %v7727_v9 = vld [vmem:[#allocation32_spill] sm:$0xff] }
 0x230   : > { %7717 = vst [vmem:[#allocation25_spill] sm:$0xff] %v6573_v38  ;;  %v1860_v15 = vadd.f32 %v1859_v7, %v1786_v49  ;;  %v6588_v39 = vsub.f32 %v7723_v16, %v1708_v22  ;;  %v6591_v13 = vsub.f32 %v7724_v45, %v1708_v22  ;;  %v6594_v19 = vsub.f32 %v7725_v63, %v1708_v22  ;;  %v7729_v25 = vld [vmem:[#allocation36_spill] sm:$0xff]  ;;  %v7731_v49 = vld [vmem:[#allocation39_spill] sm:$0xff] }
 0x231   : > { %7721 = vst [vmem:[#allocation27_spill] sm:$0xff] %v6582_v30  ;;  %v1887_v3 = vadd.f32 %v1886_v5, %v1811_v42  ;;  %v6597_v8 = vsub.f32 %v7727_v9, %v1708_v22  ;;  %v6600_v58 = vsub.f32 %v7729_v25, %v1708_v22  ;;  %v1825_v32 = vmul.f32 %v6396_v50, %v6396_v50 }
 0x232   : > { %7726 = vst [vmem:[#allocation29_spill] sm:$0xff] %v6594_v19  ;;  %v1794_v16 = vmul.f32 %v6495_v59, %v6495_v59  ;;  %v1861_v47 = vadd.f32 %v1860_v15, %v1790_v2  ;;  %v6607_v23 = vsub.f32 %v7731_v49, %v1708_v22  ;;  %v1819_v63 = vmul.f32 %v6445_v21, %v6445_v21 }
 0x233   : > { %7728 = vst [vmem:[#allocation31_spill] sm:$0xff] %v6597_v8  ;;  %7730 = vst [vmem:[#allocation35_spill] sm:$0xff] %v6600_v58  ;;  %v1888_v42 = vadd.f32 %v1887_v3, %v1815_v31  ;;  %v1849_v7 = vadd.f32 %v1848_v29, %v1825_v32  ;;  %v1798_v5 = vmul.f32 %v6498_v60, %v6498_v60 }
 0x234   : > { %7732 = vst [vmem:[#allocation38_spill] sm:$0xff] %v6607_v23  ;;  %v1862_v45 = vadd.f32 %v1861_v47, %v1794_v16  ;;  %v1823_v9 = vmul.f32 %v6448_v40, %v6448_v40  ;;  %v1776_v50 = vmul.f32 %v6556_v55, %v6556_v55  ;;  %v1780_v15 = vmul.f32 %v6559_v0, %v6559_v0 }
 0x235   : > { %v1889_v25 = vadd.f32 %v1888_v42, %v1819_v63  ;;  %v1829_v22 = vmul.f32 %v6399_v1, %v6399_v1  ;;  %v1802_v29 = vmul.f32 %v6501_v6, %v6501_v6  ;;  %v1827_v2 = vmul.f32 %v6451_v51, %v6451_v51 }
 0x236   : > { %v1863_v31 = vadd.f32 %v1862_v45, %v1798_v5  ;;  %v1806_v16 = vmul.f32 %v6504_v10, %v6504_v10  ;;  %v1784_v63 = vmul.f32 %v6562_v20, %v6562_v20  ;;  %v1900_v42 = vadd.f32 %v1780_v15, %v1776_v50 }
 0x237   : > { %v1890_v3 = vadd.f32 %v1889_v25, %v1823_v9  ;;  %v1850_v32 = vadd.f32 %v1849_v7, %v1829_v22  ;;  %v1833_v0 = vmul.f32 %v6401_v24, %v6401_v24  ;;  %v1810_v5 = vmul.f32 %v6507_v12, %v6507_v12 }
 0x238   : > { %v1864_v47 = vadd.f32 %v1863_v31, %v1802_v29  ;;  %v1831_v9 = vmul.f32 %v6456_v43, %v6456_v43  ;;  %v1788_v7 = vmul.f32 %v6565_v27, %v6565_v27  ;;  %v1901_v25 = vadd.f32 %v1900_v42, %v1784_v63 }
 0x239   : > { %v1891_v49 = vadd.f32 %v1890_v3, %v1827_v2  ;;  %v1851_v22 = vadd.f32 %v1850_v32, %v1833_v0  ;;  %v1814_v29 = vmul.f32 %v6510_v28, %v6510_v28  ;;  %v1792_v15 = vmul.f32 %v6568_v26, %v6568_v26 }
 0x23a   : > { %v1865_v45 = vadd.f32 %v1864_v47, %v1806_v16  ;;  %v1902_v2 = vadd.f32 %v1901_v25, %v1788_v7  ;;  %v1818_v3 = vmul.f32 %v6513_v44, %v6513_v44  ;;  %v1835_v47 = vmul.f32 %v6459_v36, %v6459_v36 }
 0x23b   : > { %v1892_v50 = vadd.f32 %v1891_v49, %v1831_v9  ;;  %v1796_v63 = vmul.f32 %v6573_v38, %v6573_v38  ;;  %v1852_v32 = vrot.slane %v1851_v22, 4  ;;  %v1822_v42 = vmul.f32 %v6516_v54, %v6516_v54 }
 0x23c   : > { %v1866_v31 = vadd.f32 %v1865_v45, %v1810_v5  ;;  %v1903_v0 = vadd.f32 %v1902_v2, %v1792_v15  ;;  %v1800_v45 = vmul.f32 %v6576_v41, %v6576_v41  ;;  %v1826_v7 = vmul.f32 %v6519_v14, %v6519_v14 }
 0x23d   : > { %v1893_v5 = vadd.f32 %v1892_v50, %v1835_v47  ;;  %v1853_v38 = vadd.f32 %v1852_v32, %v1851_v22  ;;  %v1830_v15 = vmul.f32 %v6524_v33, %v6524_v33  ;;  %v1808_v50 = vmul.f32 %v6582_v30, %v6582_v30 }
 0x23e   : > { %v1867_v16 = vadd.f32 %v1866_v31, %v1814_v29  ;;  %v1904_v9 = vadd.f32 %v1903_v0, %v1796_v63  ;;  %v1804_v29 = vmul.f32 %v6579_v4, %v6579_v4  ;;  %v1812_v63 = vmul.f32 %v6585_v11, %v6585_v11 }
 0x23f   : > { %v1894_v26 = vrot.slane %v1893_v5, 4  ;;  %v1816_v32 = vmul.f32 %v6588_v39, %v6588_v39 }
 0x240   : > { %v1868_v49 = vadd.f32 %v1867_v16, %v1818_v3  ;;  %v1905_v31 = vadd.f32 %v1904_v9, %v1800_v45  ;;  %v1834_v16 = vmul.f32 %v6527_v53, %v6527_v53 }
 0x241   : > { %v1895_v22 = vadd.f32 %v1894_v26, %v1893_v5  ;;  %v1828_v26 = vmul.f32 %v6597_v8, %v6597_v8 }
 0x242   : > { %v1869_v25 = vadd.f32 %v1868_v49, %v1822_v42  ;;  %v1906_v3 = vadd.f32 %v1905_v31, %v1804_v29  ;;  %v1854_v42 = vrot.slane %v1853_v38, 2 }
 0x243   : > { %v1896_v30 = vrot.slane %v1895_v22, 2 }
 0x244   : > { %v1870_v2 = vadd.f32 %v1869_v25, %v1826_v7  ;;  %v1907_v0 = vadd.f32 %v1906_v3, %v1808_v50  ;;  %v1820_v7 = vmul.f32 %v6591_v13, %v6591_v13  ;;  %v1855_v29 = vadd.f32 %v1854_v42, %v1853_v38 }
 0x245   : > { %v1836_v38 = vmul.f32 %v6607_v23, %v6607_v23 }
 0x246   : > { %v1871_v47 = vadd.f32 %v1870_v2, %v1830_v15  ;;  %v1908_v45 = vadd.f32 %v1907_v0, %v1812_v63  ;;  %v1824_v15 = vmul.f32 %v6594_v19, %v6594_v19  ;;  %v1856_v3 = vrot.slane %v1855_v29, 1 }
 0x247   : > { %v1832_v63 = vmul.f32 %v6600_v58, %v6600_v58 }
 0x248   : > { %v1872_v49 = vadd.f32 %v1871_v47, %v1834_v16  ;;  %v1909_v25 = vadd.f32 %v1908_v45, %v1816_v32  ;;  %v1897_v47 = vadd.f32 %v1896_v30, %v1895_v22 }
 0x24a   : > { %v1873_v9 = vrot.slane %v1872_v49, 4  ;;  %v1910_v2 = vadd.f32 %v1909_v25, %v1820_v7  ;;  %v1898_v45 = vrot.slane %v1897_v47, 1 }
 0x24c   : > { %v1874_v31 = vadd.f32 %v1873_v9, %v1872_v49  ;;  %v1911_v5 = vadd.f32 %v1910_v2, %v1824_v15  ;;  %v1857_v49 = vadd.f32 %v1856_v3, %v1855_v29  ;;  %v1899_v8 = vadd.f32 %v1898_v45, %v1897_v47 }
 0x24d   : > { %v5421_v3 = vmov 1966171168  }
 0x24e   : > { %v1875_v50 = vrot.slane %v1874_v31, 2  ;;  %v1912_v0 = vadd.f32 %v1911_v5, %v1828_v26  ;;  %v1921_v19 = vmul.f32 0.0078125, %v1857_v49  ;;  %v1923_v22 = vmul.f32 0.0078125, %v1899_v8 }
 0x250   : > { %v1876_v16 = vadd.f32 %v1875_v50, %v1874_v31  ;;  %v1913_v42 = vadd.f32 %v1912_v0, %v1832_v63  ;;  %v1925_v30 = vadd.f32 1e-05, %v1921_v19  ;;  %v1927_v5 = vadd.f32 1e-05, %v1923_v22 }
 0x252   : > { %v1877_v32 = vrot.slane %v1876_v16, 1  ;;  %v1914_v7 = vadd.f32 %v1913_v42, %v1836_v38  ;;  %5261 = vrsqrt.f32 %v1925_v30  ;;  %v7733_v42 = vld [vmem:[#allocation33_spill] sm:$0xff]  ;;  %v7734_v30 = vld [vmem:[#allocation34_spill] sm:$0xff] }
 0x254   : > { %v1878_v9 = vadd.f32 %v1877_v32, %v1876_v16  ;;  %v1915_v25 = vrot.slane %v1914_v7, 4  ;;  %v1940_v16 = vunpack.c.l.s4 %v5421_v3 }
 0x256   : > { %v1922_v15 = vmul.f32 0.0078125, %v1878_v9  ;;  %v1916_v2 = vadd.f32 %v1915_v25, %v1914_v7  ;;  %v1941_v47 = vunpack.c.0.s8 %v1940_v16  ;;  %v1617_v7 = vld [vmem:[#allocation8] ss:$8 sm:$0xf] }
 0x258   : > { %v1917_v31 = vrot.slane %v1916_v2, 2  ;;  %v1926_v50 = vadd.f32 1e-05, %v1922_v15  ;;  %v6676_v19 = vsub.s32 %v1941_v47, %v7733_v42  ;;  %v6682_v15 = vsub.s32 0, %v7733_v42 }
 0x25a   : > { %v1918_v58 = vadd.f32 %v1917_v31, %v1916_v2  ;;  %5263 = vrsqrt.f32 %v1926_v50  ;;  %v6685_v2 = vsub.s32 1, %v7733_v42  ;;  %v6691_v22 = vrot.slane %v7734_v30, %v6682_v15 }
 0x25b   : > { %5265 = vrsqrt.f32 %v1927_v5  ;;  %v7735_v5 = vsub.s32 2, %v7733_v42 }
 0x25c   : > { %v1919_v26 = vrot.slane %v1918_v58, 1  ;;  %v5262_v0 = vpop.eup %5261 }
 0x25e   : > { %v1920_v23 = vadd.f32 %v1919_v26, %v1918_v58 }
 0x260   : > { %v1924_v63 = vmul.f32 0.0078125, %v1920_v23 }
 0x262   : > { %v1928_v29 = vadd.f32 1e-05, %v1924_v63 }
 0x264   : > { %5267 = vrsqrt.f32 %v1928_v29  ;;  %v5264_v32 = vpop.eup %5263  ;;  %v6708_v29 = vrot.slane %v7734_v30, %v6685_v2 }
 0x265   : > { %v1937_v38 = vcombine.low %v5262_v0, %v5264_v32  ;;  %v5266_v8 = vpop.eup %5265 }
 0x267   : > { %v1945_v45 = vrot.slane %v1937_v38, %v6676_v19 }
 0x26e   : > { %v5268_v49 = vpop.eup %5267 }
 0x26f   : > { %v1938_v9 = vcombine.low %v5266_v8, %v5268_v49 }
 0x271   : > { %v1952_v58 = vrot.slane %v1938_v9, %v6676_v19 }
 0x273   : > { %v1953_v23 = vcombine.low %v1945_v45, %v1952_v58 }
 0x275   : > { %v1960_v25 = vrot.slane %v1953_v23, %v6676_v19 }
 0x277   : > { %v6687_v31 = vmul.f32 %v1960_v25, %v1617_v7 }
 0x279   : > { %v6695_v50 = vrot.slane %v6687_v31, %v6682_v15  ;;  %v6699_v26 = vrot.slane %v6687_v31, %v6685_v2  ;;  %v6704_v63 = vrot.slane %v6687_v31, %v7735_v5 }
 0x27b   : > { %v1985_v3 = vmul.f32 %v6699_v26, %v6480_v52  ;;  %v1989_v16 = vmul.f32 %v6699_v26, %v6483_v62  ;;  %v1984_v0 = vmul.f32 %v6695_v50, %v6357_v37  ;;  %v1988_v47 = vmul.f32 %v6695_v50, %v6360_v48 }
 0x27c   : > { %v1993_v32 = vmul.f32 %v6699_v26, %v6486_v17  ;;  %v1997_v38 = vmul.f32 %v6699_v26, %v6489_v34  ;;  %v1992_v62 = vmul.f32 %v6695_v50, %v6363_v57  ;;  %v1996_v17 = vmul.f32 %v6695_v50, %v6366_v61  ;;  %v5173_v57 = vld [vmem:[%s7584_s2 + $0x100] ss:$8 sps:$4 sm:$0xff]   ;;  %v5178_v61 = vld [vmem:[%s7584_s2 + $0x114] ss:$8 sps:$4 sm:$0xff]  }
 0x27d   : > { %v2070_v8 = vadd.f32 %v6708_v29, %v1985_v3  ;;  %v2074_v49 = vadd.f32 %v6708_v29, %v1989_v16  ;;  %v2069_v52 = vadd.f32 %v6691_v22, %v1984_v0  ;;  %v2073_v37 = vadd.f32 %v6691_v22, %v1988_v47 }
 0x27e   : > { %v2078_v45 = vadd.f32 %v6708_v29, %v1993_v32  ;;  %v2082_v48 = vadd.f32 %v6708_v29, %v1997_v38  ;;  %v2001_v3 = vmul.f32 %v6699_v26, %v6492_v46  ;;  %v2005_v16 = vmul.f32 %v6699_v26, %v6495_v59  ;;  %v5176_v46 = vld [vmem:[%s7584_s2 + $0x110] ss:$8 sps:$4 sm:$0xff]  }
 0x27f   : > { %v2134_v9 = vmax.f32 %v2070_v8, 0.0  ;;  %v2138_v34 = vmax.f32 %v2074_v49, 0.0  ;;  %v2133_v58 = vmax.f32 %v2069_v52, 0.0  ;;  %v2137_v23 = vmax.f32 %v2073_v37, 0.0 }
 0x280   : > { %v2142_v7 = vmax.f32 %v2078_v45, 0.0  ;;  %v2146_v25 = vmax.f32 %v2082_v48, 0.0  ;;  %v2077_v47 = vadd.f32 %v6691_v22, %v1992_v62  ;;  %v2081_v32 = vadd.f32 %v6691_v22, %v1996_v17  ;;  %v5181_v62 = vld [vmem:[%s7584_s2 + $0x124] ss:$8 sps:$4 sm:$0xff]  }
 0x281   : > { %v2198_v5 = vpack.c.bf16 %v2138_v34, %v2134_v9  ;;  %v2197_v0 = vpack.c.bf16 %v2137_v23, %v2133_v58  ;;  %v2086_v8 = vadd.f32 %v6708_v29, %v2001_v3  ;;  %v2090_v49 = vadd.f32 %v6708_v29, %v2005_v16  ;;  %v5179_v58 = vld [vmem:[%s7584_s2 + $0x120] ss:$8 sps:$4 sm:$0xff]   ;;  %v5187_v16 = vld [vmem:[%s7584_s2 + $0x144] ss:$8 sps:$4 sm:$0xff]  }
 0x282   : > { %v2202_v38 = vpack.c.bf16 %v2146_v25, %v2142_v7  ;;  %v2141_v59 = vmax.f32 %v2077_v47, 0.0  ;;  %v2145_v52 = vmax.f32 %v2081_v32, 0.0  ;;  %v2000_v37 = vmul.f32 %v6695_v50, %v6369_v35  ;;  %v5184_v35 = vld [vmem:[%s7584_s2 + $0x134] ss:$8 sps:$4 sm:$0xff]  }
 0x283   : > { %2645 = vmatprep.mubr.bf16.mxu0 %v2198_v5  ;;  %v2004_v45 = vmul.f32 %v6695_v50, %v6372_v56  ;;  %v2150_v48 = vmax.f32 %v2086_v8, 0.0  ;;  %v2154_v17 = vmax.f32 %v2090_v49, 0.0  ;;  %v2009_v9 = vmul.f32 %v6699_v26, %v6498_v60  ;;  %v5182_v5 = vld [vmem:[%s7584_s2 + $0x130] ss:$8 sps:$4 sm:$0xff]  }
 0x284   : > { %2646 = vmatmul.mubr.bf16.vlgmr.msra.gmra.mrb[32].mxu0 %v2197_v0  ;;  %v2013_v34 = vmul.f32 %v6699_v26, %v6501_v6  ;;  %v2201_v23 = vpack.c.bf16 %v2145_v52, %v2141_v59  ;;  %v2085_v56 = vadd.f32 %v6691_v22, %v2000_v37  ;;  %v2008_v0 = vmul.f32 %v6695_v50, %v6375_v18  ;;  %v5190_v18 = vld [vmem:[%s7584_s2 + $0x154] ss:$8 sps:$4 sm:$0xff]  }
 0x285   : > { %2655 = vmatprep.mubr.bf16.mxu0 %v2202_v38  ;;  %2727 = vmatpush1.bf16.msra.mxu0 %v5173_v57  ;;  %v2089_v7 = vadd.f32 %v6691_v22, %v2004_v45  ;;  %v2206_v25 = vpack.c.bf16 %v2154_v17, %v2150_v48  ;;  %v2094_v60 = vadd.f32 %v6708_v29, %v2009_v9  ;;  %v7737_v45 = vld [vmem:[#allocation41_spill] sm:$0xff]  ;;  %v5188_v17 = vld [vmem:[%s7584_s2 + $0x150] ss:$8 sps:$4 sm:$0xff]   ;;  %v7738_v9 = vld [vmem:[#allocation42_spill] sm:$0xff] }
 0x286   : > { %2728 = vmatprep.subr.bf16.mxu0 %v5178_v61  ;;  %v2098_v6 = vadd.f32 %v6708_v29, %v2013_v34  ;;  %v2149_v57 = vmax.f32 %v2085_v56, 0.0  ;;  %v7736_v61 = vld [vmem:[#allocation40_spill] sm:$0xff]  ;;  %v2017_v8 = vmul.f32 %v6699_v26, %v6504_v10  ;;  %v2021_v49 = vmul.f32 %v6699_v26, %v6507_v12 }
 0x287   : > { %v2153_v3 = vmax.f32 %v2089_v7, 0.0  ;;  %v2012_v47 = vmul.f32 %v6695_v50, %v7736_v61  ;;  %v2158_v32 = vmax.f32 %v2094_v60, 0.0  ;;  %v2093_v52 = vadd.f32 %v6691_v22, %v2008_v0  ;;  %v5191_v0 = vld [vmem:[%s7584_s2 + $0x160] ss:$8 sps:$4 sm:$0xff]  }
 0x288   : > { %v2162_v38 = vmax.f32 %v2098_v6, 0.0  ;;  %v2102_v10 = vadd.f32 %v6708_v29, %v2017_v8  ;;  %v2106_v12 = vadd.f32 %v6708_v29, %v2021_v49  ;;  %v2016_v48 = vmul.f32 %v6695_v50, %v7737_v45  ;;  %v7739_v6 = vld [vmem:[#allocation47_spill] sm:$0xff]  ;;  %v7741_v61 = vld [vmem:[#allocation37_spill] sm:$0xff] }
 0x289   : > { %2729 = vmatpush1.bf16.msra.mxu0 %v5176_v46  ;;  %v5185_v46 = vld [vmem:[%s7584_s2 + $0x140] ss:$8 sps:$4 sm:$0xff]   ;;  %v2205_v59 = vpack.c.bf16 %v2153_v3, %v2149_v57  ;;  %v2020_v34 = vmul.f32 %v6695_v50, %v7738_v9  ;;  %v2025_v56 = vmul.f32 %v6699_v26, %v6510_v28  ;;  %v2029_v7 = vmul.f32 %v6699_v26, %v6513_v44  ;;  %v7740_v57 = vld [vmem:[#allocation48_spill] sm:$0xff]  ;;  %v7744_v45 = vld [vmem:[#allocation43_spill] sm:$0xff] }
 0x28a   : > { %2730 = vmatprep.subr.bf16.mxu0 %v5181_v62  ;;  %v2097_v62 = vadd.f32 %v6691_v22, %v2012_v47  ;;  %v2210_v37 = vpack.c.bf16 %v2162_v38, %v2158_v32  ;;  %v2170_v60 = vmax.f32 %v2106_v12, 0.0  ;;  %v1990_v3 = vmul.f32 %v6704_v63, %v7740_v57  ;;  %v5196_v38 = vld [vmem:[%s7584_s2 + $0x174] ss:$8 sps:$4 sm:$0xff]   ;;  %v5194_v9 = vld [vmem:[%s7584_s2 + $0x170] ss:$8 sps:$4 sm:$0xff]  }
 0x28b   : > { %v2105_v28 = vadd.f32 %v6691_v22, %v2020_v34  ;;  %v2110_v8 = vadd.f32 %v6708_v29, %v2025_v56  ;;  %v2114_v49 = vadd.f32 %v6708_v29, %v2029_v7  ;;  %v5199_v7 = vld [vmem:[%s7584_s2 + $0x184] ss:$8 sps:$4 sm:$0xff]   ;;  %v7747_v57 = vld [vmem:[#allocation52_spill] sm:$0xff] }
 0x28c   : > { %2656 = vmatmul.mubr.bf16.gmra.mrb[36].mxu0 %v2201_v23  ;;  %v2161_v23 = vmax.f32 %v2097_v62, 0.0  ;;  %v2075_v44 = vadd.f32 %v7741_v61, %v1990_v3  ;;  %v2006_v3 = vmul.f32 %v6704_v63, %v7747_v57 }
 0x28d   : > { %2665 = vmatprep.mubr.bf16.mxu0 %v2206_v25  ;;  %2731 = vmatpush1.bf16.msra.mxu0 %v5179_v58  ;;  %v2157_v58 = vmax.f32 %v2093_v52, 0.0  ;;  %v2166_v25 = vmax.f32 %v2102_v10, 0.0  ;;  %v2169_v34 = vmax.f32 %v2105_v28, 0.0  ;;  %v2037_v28 = vmul.f32 %v6699_v26, %v6519_v14 }
 0x28e   : > { %2732 = vmatprep.subr.bf16.mxu0 %v5184_v35  ;;  %v5193_v35 = vld [vmem:[%s7584_s2 + $0x164] ss:$8 sps:$4 sm:$0xff]   ;;  %v2139_v62 = vmax.f32 %v2075_v44, 0.0 }
 0x28f   : > { %v2209_v32 = vpack.c.bf16 %v2161_v23, %v2157_v58  ;;  %v7745_v58 = vld [vmem:[#allocation44_spill] sm:$0xff] }
 0x290   : > { %v2028_v23 = vmul.f32 %v6695_v50, %v7745_v58  ;;  %v7750_v58 = vld [vmem:[#allocation45_spill] sm:$0xff] }
 0x291   : > { %2733 = vmatpush1.bf16.msra.mxu0 %v5182_v5  ;;  %v1986_v5 = vmul.f32 %v6704_v63, %v7739_v6  ;;  %v7746_v6 = vld [vmem:[#allocation51_spill] sm:$0xff] }
 0x292   : > { %2734 = vmatprep.subr.bf16.mxu0 %v5187_v16  ;;  %v2101_v16 = vadd.f32 %v6691_v22, %v2016_v48  ;;  %v2024_v48 = vmul.f32 %v6695_v50, %v7744_v45  ;;  %v1978_v45 = vsub.s32 3, %v7733_v42  ;;  %v5200_v42 = vld [vmem:[%s7584_s2 + $0x190] ss:$8 sps:$4 sm:$0xff]  }
 0x293   : > { %v2071_v47 = vadd.f32 %v7741_v61, %v1986_v5  ;;  %v2002_v5 = vmul.f32 %v6704_v63, %v7746_v6 }
 0x294   : > { %2666 = vmatmul.mubr.bf16.gmra.mrb[40].mxu0 %v2205_v59  ;;  %v2165_v12 = vmax.f32 %v2101_v16, 0.0  ;;  %v2174_v16 = vmax.f32 %v2110_v8, 0.0  ;;  %v2109_v44 = vadd.f32 %v6691_v22, %v2024_v48 }
 0x295   : > { %2675 = vmatprep.mubr.bf16.mxu0 %v2210_v37  ;;  %2735 = vmatpush1.bf16.msra.mxu0 %v5185_v46  ;;  %v7742_v46 = vld [vmem:[#allocation49_spill] sm:$0xff]  ;;  %v2135_v52 = vmax.f32 %v2071_v47, 0.0  ;;  %v7743_v37 = vld [vmem:[#allocation50_spill] sm:$0xff] }
 0x296   : > { %2736 = vmatprep.subr.bf16.mxu0 %v5190_v18  ;;  %v1994_v59 = vmul.f32 %v6704_v63, %v7742_v46  ;;  %v2214_v18 = vpack.c.bf16 %v2170_v60, %v2166_v25  ;;  %v1998_v10 = vmul.f32 %v6704_v63, %v7743_v37  ;;  %v2033_v25 = vmul.f32 %v6699_v26, %v6516_v54  ;;  %v5197_v46 = vld [vmem:[%s7584_s2 + $0x180] ss:$8 sps:$4 sm:$0xff]  }
 0x297   : > { %v2213_v54 = vpack.c.bf16 %v2169_v34, %v2165_v12  ;;  %v2173_v34 = vmax.f32 %v2109_v44, 0.0  ;;  %v2041_v44 = vmul.f32 %v6699_v26, %v6524_v33  ;;  %v5203_v33 = vld [vmem:[%s7584_s2 + $0x1a0] ss:$8 sps:$4 sm:$0xff]  }
 0x298   : > { %v2083_v56 = vadd.f32 %v7741_v61, %v1998_v10  ;;  %v7749_v10 = vld [vmem:[#allocation54_spill] sm:$0xff] }
 0x299   : > { %2737 = vmatpush1.bf16.msra.mxu0 %v5188_v17  ;;  %v2079_v17 = vadd.f32 %v7741_v61, %v1994_v59  ;;  %v2113_v59 = vadd.f32 %v6691_v22, %v2028_v23  ;;  %v2014_v12 = vmul.f32 %v6704_v63, %v7749_v10  ;;  %v2032_v23 = vmul.f32 %v6695_v50, %v7750_v58 }
 0x29a   : > { %2738 = vmatprep.subr.bf16.mxu0 %v5193_v35  ;;  %v6836_v35 = vpack.c.bf16 %v2139_v62, %v2135_v52  ;;  %v2147_v47 = vmax.f32 %v2083_v56, 0.0  ;;  %v2118_v52 = vadd.f32 %v6708_v29, %v2033_v25  ;;  %v7751_v25 = vld [vmem:[#allocation46_spill] sm:$0xff]  ;;  %v6908_v10 = vrot.slane %v6687_v31, %v1978_v45 }
 0x29b   : > { %v2143_v60 = vmax.f32 %v2079_v17, 0.0  ;;  %v2122_v17 = vadd.f32 %v6708_v29, %v2037_v28  ;;  %v5205_v28 = vld [vmem:[%s7584_s2 + $0x1a4] ss:$8 sps:$4 sm:$0xff]   ;;  %v2040_v31 = vmul.f32 %v6695_v50, %v6399_v1 }
 0x29c   : > { %2676 = vmatmul.mubr.bf16.gmra.mrb[44].mxu0 %v2209_v32  ;;  %v2087_v32 = vadd.f32 %v7741_v61, %v2002_v5  ;;  %v7752_v5 = vld [vmem:[#allocation55_spill] sm:$0xff]  ;;  %v5211_v1 = vld [vmem:[%s7584_s2 + $0x1c4] ss:$8 sps:$4 sm:$0xff]  }
 0x29d   : > { %2685 = vmatprep.mubr.bf16.mxu0 %v2214_v18  ;;  %2739 = vmatpush1.bf16.msra.mxu0 %v5191_v0  ;;  %v2178_v0 = vmax.f32 %v2114_v49, 0.0  ;;  %v6857_v8 = vpack.c.bf16 %v2147_v47, %v2143_v60  ;;  %v7748_v49 = vld [vmem:[#allocation53_spill] sm:$0xff]  ;;  %v5202_v18 = vld [vmem:[%s7584_s2 + $0x194] ss:$8 sps:$4 sm:$0xff]   ;;  %v2036_v60 = vmul.f32 %v6695_v50, %v7751_v25  ;;  %v2018_v57 = vmul.f32 %v6704_v63, %v7752_v5 }
 0x29e   : > { %2740 = vmatprep.subr.bf16.mxu0 %v5196_v38  ;;  %v2091_v38 = vadd.f32 %v7741_v61, %v2006_v3  ;;  %v2010_v14 = vmul.f32 %v6704_v63, %v7748_v49  ;;  %v2151_v62 = vmax.f32 %v2087_v32, 0.0  ;;  %v7753_v3 = vld [vmem:[#allocation56_spill] sm:$0xff]  ;;  %v2182_v47 = vmax.f32 %v2118_v52, 0.0  ;;  %v7754_v52 = vld [vmem:[#allocation57_spill] sm:$0xff] }
 0x29f   : > { %v2218_v48 = vpack.c.bf16 %v2178_v0, %v2174_v16  ;;  %v2022_v16 = vmul.f32 %v6704_v63, %v7753_v3  ;;  %v2177_v0 = vmax.f32 %v2113_v59, 0.0  ;;  %v2117_v59 = vadd.f32 %v6691_v22, %v2032_v23 }
 0x2a0   : > { %v2155_v37 = vmax.f32 %v2091_v38, 0.0  ;;  %v2186_v38 = vmax.f32 %v2122_v17, 0.0  ;;  %v2126_v17 = vadd.f32 %v6708_v29, %v2041_v44 }
 0x2a1   : > { %2741 = vmatpush1.bf16.msra.mxu0 %v5194_v9  ;;  %v2095_v9 = vadd.f32 %v7741_v61, %v2010_v14  ;;  %v2107_v49 = vadd.f32 %v7741_v61, %v2022_v16  ;;  %v6894_v14 = vrot.slane %v7734_v30, %v1978_v45  ;;  %v2030_v30 = vmul.f32 %v6704_v63, %v6445_v21 }
 0x2a2   : > { %2742 = vmatprep.subr.bf16.mxu0 %v5199_v7  ;;  %v6872_v56 = vpack.c.bf16 %v2155_v37, %v2151_v62  ;;  %v2099_v7 = vadd.f32 %v7741_v61, %v2014_v12  ;;  %v2026_v62 = vmul.f32 %v6704_v63, %v7754_v52  ;;  %v2217_v12 = vpack.c.bf16 %v2177_v0, %v2173_v34  ;;  %v7755_v0 = vld [vmem:[#allocation21_spill] sm:$0xff] }
 0x2a3   : > { %v2159_v6 = vmax.f32 %v2095_v9, 0.0  ;;  %v2171_v37 = vmax.f32 %v2107_v49, 0.0  ;;  %v2222_v58 = vpack.c.bf16 %v2186_v38, %v2182_v47  ;;  %v2115_v21 = vadd.f32 %v7741_v61, %v2030_v30 }
 0x2a4   : > { %2686 = vmatmul.mubr.bf16.gmra.mrb[48].mxu0 %v2213_v54  ;;  %v2163_v32 = vmax.f32 %v2099_v7, 0.0  ;;  %v2045_v54 = vmul.f32 %v6699_v26, %v6527_v53  ;;  %v2121_v53 = vadd.f32 %v6691_v22, %v2036_v60  ;;  %v2111_v9 = vadd.f32 %v7741_v61, %v2026_v62 }
 0x2a5   : > { %2695 = vmatprep.mubr.bf16.mxu0 %v2218_v48  ;;  %2743 = vmatpush1.bf16.msra.mxu0 %v5197_v46  ;;  %v2103_v46 = vadd.f32 %v7741_v61, %v2018_v57  ;;  %v5208_v48 = vld [vmem:[%s7584_s2 + $0x1b4] ss:$8 sps:$4 sm:$0xff]   ;;  %v2034_v34 = vmul.f32 %v6704_v63, %v6448_v40  ;;  %v2181_v25 = vmax.f32 %v2117_v59, 0.0  ;;  %v2179_v5 = vmax.f32 %v2115_v21, 0.0 }
 0x2a6   : > { %2744 = vmatprep.subr.bf16.mxu0 %v5202_v18  ;;  %v6897_v18 = vpack.c.bf16 %v2163_v32, %v2159_v6  ;;  %v2130_v23 = vadd.f32 %v6708_v29, %v2045_v54  ;;  %v2175_v45 = vmax.f32 %v2111_v9, 0.0  ;;  %v5206_v29 = vld [vmem:[%s7584_s2 + $0x1b0] ss:$8 sps:$4 sm:$0xff]   ;;  %v2185_v60 = vmax.f32 %v2121_v53, 0.0  ;;  %v5220_v21 = vld [vmem:[%s7584_s2 + $0x1f4] ss:$8 sps:$4 sm:$0xff]  }
 0x2a7   : > { %v2167_v26 = vmax.f32 %v2103_v46, 0.0  ;;  %v2044_v6 = vmul.f32 %v6695_v50, %v6401_v24  ;;  %v2190_v40 = vmax.f32 %v2126_v17, 0.0  ;;  %v2119_v57 = vadd.f32 %v7741_v61, %v2034_v34 }
 0x2a8   : > { %v2194_v16 = vmax.f32 %v2130_v23, 0.0  ;;  %v6939_v47 = vpack.c.bf16 %v2179_v5, %v2175_v45  ;;  %v2042_v24 = vmul.f32 %v6704_v63, %v6456_v43  ;;  %v2046_v32 = vmul.f32 %v6704_v63, %v6459_v36  ;;  %v5214_v43 = vld [vmem:[%s7584_s2 + $0x1d4] ss:$8 sps:$4 sm:$0xff]  }
 0x2a9   : > { %2745 = vmatpush1.bf16.msra.mxu0 %v5200_v42  ;;  %v6916_v7 = vpack.c.bf16 %v2171_v37, %v2167_v26  ;;  %v2038_v42 = vmul.f32 %v6704_v63, %v6451_v51  ;;  %v1987_v51 = vmul.f32 %v6908_v10, %v6556_v55  ;;  %v2183_v50 = vmax.f32 %v2119_v57, 0.0  ;;  %v5209_v55 = vld [vmem:[%s7584_s2 + $0x1c0] ss:$8 sps:$4 sm:$0xff]   ;;  %v5212_v26 = vld [vmem:[%s7584_s2 + $0x1d0] ss:$8 sps:$4 sm:$0xff]  }
 0x2aa   : > { %2746 = vmatprep.subr.bf16.mxu0 %v5205_v28  ;;  %v1991_v28 = vmul.f32 %v6908_v10, %v7755_v0  ;;  %v2125_v38 = vadd.f32 %v6691_v22, %v2040_v31  ;;  %v2127_v54 = vadd.f32 %v7741_v61, %v2042_v24  ;;  %v2221_v46 = vpack.c.bf16 %v2185_v60, %v2181_v25  ;;  %v7757_v60 = vld [vmem:[#allocation25_spill] sm:$0xff] }
 0x2ab   : > { %v2123_v3 = vadd.f32 %v7741_v61, %v2038_v42  ;;  %v2129_v49 = vadd.f32 %v6691_v22, %v2044_v6  ;;  %v2131_v36 = vadd.f32 %v7741_v61, %v2046_v32  ;;  %v2226_v63 = vpack.c.bf16 %v2194_v16, %v2190_v40  ;;  %v5217_v61 = vld [vmem:[%s7584_s2 + $0x1e4] ss:$8 sps:$4 sm:$0xff]  }
 0x2ac   : > { %2696 = vmatmul.mubr.bf16.gmra.mrb[52].mxu0 %v2217_v12  ;;  %v2072_v52 = vadd.f32 %v6894_v14, %v1987_v51  ;;  %v2076_v62 = vadd.f32 %v6894_v14, %v1991_v28  ;;  %v2189_v22 = vmax.f32 %v2125_v38, 0.0  ;;  %v1995_v17 = vmul.f32 %v6908_v10, %v6562_v20  ;;  %v5218_v20 = vld [vmem:[%s7584_s2 + $0x1f0] ss:$8 sps:$4 sm:$0xff]  }
 0x2ad   : > { %2705 = vmatprep.mubr.bf16.mxu0 %v2222_v58  ;;  %2747 = vmatpush1.bf16.msra.mxu0 %v5203_v33  ;;  %v2187_v44 = vmax.f32 %v2123_v3, 0.0  ;;  %v2191_v33 = vmax.f32 %v2127_v54, 0.0  ;;  %v2195_v53 = vmax.f32 %v2131_v36, 0.0  ;;  %v2193_v37 = vmax.f32 %v2129_v49, 0.0  ;;  %v5215_v58 = vld [vmem:[%s7584_s2 + $0x1e0] ss:$8 sps:$4 sm:$0xff]  }
 0x2ae   : > { %2748 = vmatprep.subr.bf16.mxu0 %v5208_v48  ;;  %v2136_v12 = vmax.f32 %v2072_v52, 0.0  ;;  %v2140_v48 = vmax.f32 %v2076_v62, 0.0  ;;  %v1999_v9 = vmul.f32 %v6908_v10, %v6565_v27  ;;  %v2080_v45 = vadd.f32 %v6894_v14, %v1995_v17 }
 0x2af   : > { %v6954_v59 = vpack.c.bf16 %v2187_v44, %v2183_v50  ;;  %v6965_v30 = vpack.c.bf16 %v2195_v53, %v2191_v33  ;;  %v2225_v23 = vpack.c.bf16 %v2193_v37, %v2189_v22  ;;  %v2007_v6 = vmul.f32 %v6908_v10, %v7757_v60  ;;  %v7760_v33 = vld [vmem:[#allocation31_spill] sm:$0xff]  ;;  %v7761_v22 = vld [vmem:[#allocation38_spill] sm:$0xff] }
 0x2b0   : > { %v2200_v31 = vpack.c.bf16 %v2140_v48, %v2136_v12  ;;  %v2084_v34 = vadd.f32 %v6894_v14, %v1999_v9  ;;  %v2144_v27 = vmax.f32 %v2080_v45, 0.0  ;;  %v2011_v3 = vmul.f32 %v6908_v10, %v6576_v41  ;;  %v7762_v12 = vld [vmem:[#allocation35_spill] sm:$0xff] }
 0x2b1   : > { %2749 = vmatpush1.bf16.msra.mxu0 %v5206_v29  ;;  %v7756_v29 = vld [vmem:[#allocation23_spill] sm:$0xff]  ;;  %v2092_v40 = vadd.f32 %v6894_v14, %v2007_v6  ;;  %v2015_v16 = vmul.f32 %v6908_v10, %v6579_v4  ;;  %v2039_v53 = vmul.f32 %v6908_v10, %v7760_v33  ;;  %v2043_v48 = vmul.f32 %v6908_v10, %v7762_v12  ;;  %v5228_v12 = vld [vmem:[#allocation3 + $0x18] sm:$0xff]  }
 0x2b2   : > { %2750 = vmatprep.subr.bf16.mxu0 %v5211_v1  ;;  %v2148_v42 = vmax.f32 %v2084_v34, 0.0  ;;  %v2003_v25 = vmul.f32 %v6908_v10, %v7756_v29  ;;  %v2096_v28 = vadd.f32 %v6894_v14, %v2011_v3  ;;  %v5226_v33 = vld [vmem:[#allocation3 + $0x10] sm:$0xff]  }
 0x2b3   : > { %v2156_v57 = vmax.f32 %v2092_v40, 0.0  ;;  %v2100_v24 = vadd.f32 %v6894_v14, %v2015_v16 }
 0x2b4   : > { %2706 = vmatmul.mubr.bf16.gmra.mrb[56].mxu0 %v2221_v46  ;;  %v2204_v5 = vpack.c.bf16 %v2148_v42, %v2144_v27  ;;  %v2088_v1 = vadd.f32 %v6894_v14, %v2003_v25  ;;  %v2160_v50 = vmax.f32 %v2096_v28, 0.0 }
 0x2b5   : > { %2715 = vmatprep.mubr.bf16.mxu0 %v2226_v63  ;;  %2751 = vmatpush1.bf16.msra.mxu0 %v5209_v55  ;;  %v2164_v44 = vmax.f32 %v2100_v24, 0.0  ;;  %v2023_v55 = vmul.f32 %v6908_v10, %v6585_v11 }
 0x2b6   : > { %2752 = vmatprep.subr.bf16.mxu0 %v5214_v43  ;;  %v2152_v51 = vmax.f32 %v2088_v1, 0.0  ;;  %v2031_v43 = vmul.f32 %v6908_v10, %v6591_v13  ;;  %v2124_v13 = vadd.f32 %v6894_v14, %v2039_v53 }
 0x2b7   : > { %v2212_v41 = vpack.c.bf16 %v2164_v44, %v2160_v50  ;;  %v2108_v4 = vadd.f32 %v6894_v14, %v2023_v55 }
 0x2b8   : > { %v2208_v0 = vpack.c.bf16 %v2156_v57, %v2152_v51  ;;  %v2116_v11 = vadd.f32 %v6894_v14, %v2031_v43 }
 0x2b9   : > { %2753 = vmatpush1.bf16.msra.mxu0 %v5212_v26  ;;  %v2172_v46 = vmax.f32 %v2108_v4, 0.0 }
 0x2ba   : > { %2754 = vmatprep.subr.bf16.mxu0 %v5217_v61  ;;  %v2180_v52 = vmax.f32 %v2116_v11, 0.0  ;;  %v2188_v61 = vmax.f32 %v2124_v13, 0.0 }
 0x2bc   : > { %2716 = vmatmul.mubr.bf16.gmra.mrb[60].mxu0 %v2225_v23 }
 0x2bd   : > { %2755 = vmatpush1.bf16.msra.mxu0 %v5215_v58  ;;  %2758 = vmatprep.mubr.bf16.mxu0 %v2200_v31  ;;  %v2128_v58 = vadd.f32 %v6894_v14, %v2043_v48  ;;  %v5229_v48 = vld [vmem:[#allocation3 + $0x60] sm:$0xff]  }
 0x2be   : > { %2756 = vmatprep.subr.bf16.mxu0 %v5220_v21 }
 0x2bf   : > { %v2192_v23 = vmax.f32 %v2128_v58, 0.0 }
 0x2c1   : > { %2757 = vmatpush1.bf16.msra.mxu0 %v5218_v20 }
 0x2c4   : > { %2759 = vmatmul.mubr.bf16.vlgmr.msra.gmra.mrb[32].mxu0 %v6836_v35  ;;  %v7758_v35 = vld [vmem:[#allocation27_spill] sm:$0xff] }
 0x2c5   : > { %2768 = vmatprep.mubr.bf16.mxu0 %v2204_v5  ;;  %v2019_v32 = vmul.f32 %v6908_v10, %v7758_v35 }
 0x2c7   : > { %v2104_v38 = vadd.f32 %v6894_v14, %v2019_v32 }
 0x2c9   : > { %v2168_v54 = vmax.f32 %v2104_v38, 0.0 }
 0x2cb   : > { %v2216_v49 = vpack.c.bf16 %v2172_v46, %v2168_v54  ;;  %v5221_v54 = vld [vmem:[#allocation3 + $0x40] sm:$0xff]  }
 0x2cc   : > { %2769 = vmatmul.mubr.bf16.gmra.mrb[36].mxu0 %v6857_v8  ;;  %v2027_v8 = vmul.f32 %v6908_v10, %v6588_v39  ;;  %v5222_v46 = vld [vmem:[#allocation3] sm:$0xff]   ;;  %4604 = vmatprep.subr.bf16.mxu1 %v5221_v54 }
 0x2cd   : > { %2778 = vmatprep.mubr.bf16.mxu0 %v2208_v0  ;;  %4605 = vmatpush3.bf16.msra.mxu1 %v5222_v46  ;;  %v5236_v46 = vld [vmem:[#allocation3 + $0x38] sm:$0xff]  }
 0x2ce   : > { %v2112_v36 = vadd.f32 %v6894_v14, %v2027_v8  ;;  %v5223_v8 = vld [vmem:[#allocation3 + $0x48] sm:$0xff]  }
 0x2cf   : > { %4606 = vmatprep.subr.bf16.mxu1 %v5223_v8 }
 0x2d0   : > { %v2176_v63 = vmax.f32 %v2112_v36, 0.0 }
 0x2d2   : > { %v2220_v39 = vpack.c.bf16 %v2180_v52, %v2176_v63  ;;  %v5224_v52 = vld [vmem:[#allocation3 + $0x8] sm:$0xff]  }
 0x2d3   : > { %4607 = vmatpush3.bf16.msra.mxu1 %v5224_v52 }
 0x2d4   : > { %2779 = vmatmul.mubr.bf16.gmra.mrb[40].mxu0 %v6872_v56  ;;  %v7759_v56 = vld [vmem:[#allocation29_spill] sm:$0xff] }
 0x2d5   : > { %2788 = vmatprep.mubr.bf16.mxu0 %v2212_v41  ;;  %v2035_v62 = vmul.f32 %v6908_v10, %v7759_v56  ;;  %v5225_v56 = vld [vmem:[#allocation3 + $0x50] sm:$0xff]  }
 0x2d6   : > { %4608 = vmatprep.subr.bf16.mxu1 %v5225_v56 }
 0x2d7   : > { %v2120_v26 = vadd.f32 %v6894_v14, %v2035_v62  ;;  %4609 = vmatpush3.bf16.msra.mxu1 %v5226_v33 }
 0x2d9   : > { %v2184_v37 = vmax.f32 %v2120_v26, 0.0  ;;  %v5227_v26 = vld [vmem:[#allocation3 + $0x58] sm:$0xff]  }
 0x2da   : > { %4610 = vmatprep.subr.bf16.mxu1 %v5227_v26 }
 0x2db   : > { %v2224_v9 = vpack.c.bf16 %v2188_v61, %v2184_v37  ;;  %4611 = vmatpush3.bf16.msra.mxu1 %v5228_v12 }
 0x2dc   : > { %2789 = vmatmul.mubr.bf16.gmra.mrb[44].mxu0 %v6897_v18  ;;  %v2047_v18 = vmul.f32 %v6908_v10, %v7761_v22  ;;  %4612 = vmatprep.subr.bf16.mxu1 %v5229_v48 }
 0x2dd   : > { %2798 = vmatprep.mubr.bf16.mxu0 %v2216_v49 }
 0x2de   : > { %v2132_v17 = vadd.f32 %v6894_v14, %v2047_v18 }
 0x2e0   : > { %v2196_v21 = vmax.f32 %v2132_v17, 0.0 }
 0x2e4   : > { %2799 = vmatmul.mubr.bf16.gmra.mrb[48].mxu0 %v6916_v7  ;;  %v2228_v7 = vpack.c.bf16 %v2196_v21, %v2192_v23  ;;  %v5231_v21 = vld [vmem:[#allocation3 + $0x68] sm:$0xff]  }
 0x2e5   : > { %2808 = vmatprep.mubr.bf16.mxu0 %v2220_v39 }
 0x2ec   : > { %2809 = vmatmul.mubr.bf16.gmra.mrb[52].mxu0 %v6939_v47 }
 0x2ed   : > { %2818 = vmatprep.mubr.bf16.mxu0 %v2224_v9  ;;  %v5230_v9 = vld [vmem:[#allocation3 + $0x20] sm:$0xff]  }
 0x2ee   : > { %4613 = vmatpush3.bf16.msra.mxu1 %v5230_v9 }
 0x2ef   : > { %4614 = vmatprep.subr.bf16.mxu1 %v5231_v21 }
 0x2f4   : > { %2819 = vmatmul.mubr.bf16.gmra.mrb[56].mxu0 %v6954_v59 }
 0x2f5   : > { %2828 = vmatprep.mubr.bf16.mxu0 %v2228_v7 }
 0x2fc   : > { %2829 = vmatmul.mubr.bf16.gmra.mrb[60].mxu0 %v6965_v30 }
 0x397   : > { %v7026_v31 = vpop.f32.mrb[32].mxu0 }
 0x398   : > { %v7028_v45 = vpop.f32.mrb[33].mxu0 }
 0x399   : > { %v7030_v10 = vpop.f32.mrb[34].mxu0 }
 0x39a   : > { %v2843_v14 = vadd.f32 %v7030_v10, %v7026_v31  ;;  %v7034_v34 = vpop.f32.mrb[35].mxu0 }
 0x39b   : > { %v2864_v47 = vadd.f32 %v7034_v34, %v7028_v45 }
 0x39f   : > { %v7038_v20 = vpop.f32.mrb[36].mxu0 }
 0x3a0   : > { %v2844_v59 = vadd.f32 %v2843_v14, %v7038_v20  ;;  %v7041_v27 = vpop.f32.mrb[37].mxu0 }
 0x3a1   : > { %v2865_v30 = vadd.f32 %v2864_v47, %v7041_v27  ;;  %v7044_v42 = vpop.f32.mrb[38].mxu0 }
 0x3a2   : > { %v2845_v29 = vadd.f32 %v2844_v59, %v7044_v42  ;;  %v7047_v25 = vpop.f32.mrb[39].mxu0 }
 0x3a3   : > { %v2866_v60 = vadd.f32 %v2865_v30, %v7047_v25 }
 0x3a7   : > { %v7050_v6 = vpop.f32.mrb[40].mxu0 }
 0x3a8   : > { %v2846_v5 = vadd.f32 %v2845_v29, %v7050_v6  ;;  %v7053_v1 = vpop.f32.mrb[41].mxu0  ;;  %v5232_v29 = vld [vmem:[#allocation3 + $0x28] sm:$0xff]  }
 0x3a9   : > { %v2867_v40 = vadd.f32 %v2866_v60, %v7053_v1  ;;  %v7056_v51 = vpop.f32.mrb[42].mxu0  ;;  %v5233_v60 = vld [vmem:[#allocation3 + $0x70] sm:$0xff]   ;;  %4615 = vmatpush3.bf16.msra.mxu1 %v5232_v29 }
 0x3aa   : > { %v2847_v57 = vadd.f32 %v2846_v5, %v7056_v51  ;;  %v7059_v3 = vpop.f32.mrb[43].mxu0  ;;  %4616 = vmatprep.subr.bf16.mxu1 %v5233_v60 }
 0x3ab   : > { %v2868_v16 = vadd.f32 %v2867_v40, %v7059_v3  ;;  %v5234_v40 = vld [vmem:[#allocation3 + $0x30] sm:$0xff]  }
 0x3ad   : > { %4617 = vmatpush3.bf16.msra.mxu1 %v5234_v40 }
 0x3af   : > { %v7062_v0 = vpop.f32.mrb[44].mxu0 }
 0x3b0   : > { %v2848_v28 = vadd.f32 %v2847_v57, %v7062_v0  ;;  %v7065_v24 = vpop.f32.mrb[45].mxu0 }
 0x3b1   : > { %v2869_v50 = vadd.f32 %v2868_v16, %v7065_v24  ;;  %v7068_v44 = vpop.f32.mrb[46].mxu0 }
 0x3b2   : > { %v2849_v35 = vadd.f32 %v2848_v28, %v7068_v44  ;;  %v7071_v32 = vpop.f32.mrb[47].mxu0  ;;  %v5235_v28 = vld [vmem:[#allocation3 + $0x78] sm:$0xff]  }
 0x3b3   : > { %v2870_v55 = vadd.f32 %v2869_v50, %v7071_v32  ;;  %4618 = vmatprep.subr.bf16.mxu1 %v5235_v28 }
 0x3b4   : > { %4619 = vmatpush3.bf16.msra.mxu1 %v5236_v46 }
 0x3b7   : > { %v7074_v41 = vpop.f32.mrb[48].mxu0 }
 0x3b8   : > { %v2850_v38 = vadd.f32 %v2849_v35, %v7074_v41  ;;  %v7077_v4 = vpop.f32.mrb[49].mxu0 }
 0x3b9   : > { %v2871_v43 = vadd.f32 %v2870_v55, %v7077_v4  ;;  %v7080_v49 = vpop.f32.mrb[50].mxu0 }
 0x3ba   : > { %v2851_v36 = vadd.f32 %v2850_v38, %v7080_v49  ;;  %v7083_v11 = vpop.f32.mrb[51].mxu0 }
 0x3bb   : > { %v2872_v63 = vadd.f32 %v2871_v43, %v7083_v11 }
 0x3bf   : > { %v7086_v62 = vpop.f32.mrb[52].mxu0 }
 0x3c0   : > { %v2852_v53 = vadd.f32 %v2851_v36, %v7086_v62  ;;  %v7089_v39 = vpop.f32.mrb[53].mxu0 }
 0x3c1   : > { %v2873_v13 = vadd.f32 %v2872_v63, %v7089_v39  ;;  %v7092_v22 = vpop.f32.mrb[54].mxu0 }
 0x3c2   : > { %v2853_v18 = vadd.f32 %v2852_v53, %v7092_v22  ;;  %v7095_v37 = vpop.f32.mrb[55].mxu0 }
 0x3c3   : > { %v2874_v61 = vadd.f32 %v2873_v13, %v7095_v37 }
 0x3c7   : > { %v2820_v17 = vpop.f32.mrb[56].mxu0 }
 0x3c8   : > { %v2854_v58 = vadd.f32 %v2853_v18, %v2820_v17  ;;  %v7098_v23 = vpop.f32.mrb[57].mxu0 }
 0x3c9   : > { %v2875_v7 = vadd.f32 %v2874_v61, %v7098_v23  ;;  %v2824_v14 = vpop.f32.mrb[58].mxu0 }
 0x3ca   : > { %v2855_v47 = vadd.f32 %v2854_v58, %v2824_v14  ;;  %v7101_v59 = vpop.f32.mrb[59].mxu0 }
 0x3cb   : > { %v2876_v30 = vadd.f32 %v2875_v7, %v7101_v59 }
 0x3cf   : > { %v2830_v5 = vpop.f32.mrb[60].mxu0 }
 0x3d0   : > { %v2856_v57 = vadd.f32 %v2855_v47, %v2830_v5  ;;  %v7104_v16 = vpop.f32.mrb[61].mxu0 }
 0x3d1   : > { %v2877_v50 = vadd.f32 %v2876_v30, %v7104_v16  ;;  %v2834_v35 = vpop.f32.mrb[62].mxu0 }
 0x3d2   : > { %v2857_v55 = vadd.f32 %v2856_v57, %v2834_v35  ;;  %v2836_v38 = vpop.f32.mrb[63].mxu0 }
 0x3d3   : > { %v2878_v54 = vadd.f32 %v2877_v50, %v2836_v38 }
 0x3d4   : > { %v2858_v8 = vrot.slane %v2857_v55, 4 }
 0x3d5   : > { %v2879_v43 = vrot.slane %v2878_v54, 4 }
 0x3d6   : > { %v2859_v36 = vadd.f32 %v2858_v8, %v2857_v55 }
 0x3d7   : > { %v2880_v63 = vadd.f32 %v2879_v43, %v2878_v54 }
 0x3d8   : > { %v2860_v52 = vrot.slane %v2859_v36, 2 }
 0x3d9   : > { %v2881_v56 = vrot.slane %v2880_v63, 2 }
 0x3da   : > { %v2861_v33 = vadd.f32 %v2860_v52, %v2859_v36 }
 0x3db   : > { %v2882_v53 = vadd.f32 %v2881_v56, %v2880_v63 }
 0x3dc   : > { %v2862_v26 = vrot.slane %v2861_v33, 1 }
 0x3dd   : > { %v2883_v13 = vrot.slane %v2882_v53, 1 }
 0x3de   : > { %v2863_v18 = vadd.f32 %v2862_v26, %v2861_v33 }
 0x3df   : > { %v2884_v12 = vadd.f32 %v2883_v13, %v2882_v53 }
 0x3e0   : > { %v2885_v61 = vmul.f32 0.0078125, %v2863_v18 }
 0x3e1   : > { %v2886_v60 = vmul.f32 0.0078125, %v2884_v12 }
 0x3e2   : > { %v7108_v48 = vsub.f32 %v7026_v31, %v2885_v61  ;;  %v7111_v9 = vsub.f32 %v7030_v10, %v2885_v61  ;;  %v7114_v58 = vsub.f32 %v7038_v20, %v2885_v61  ;;  %v7117_v21 = vsub.f32 %v7044_v42, %v2885_v61 }
 0x3e3   : > { %v7120_v7 = vsub.f32 %v7050_v6, %v2885_v61  ;;  %v7123_v47 = vsub.f32 %v7056_v51, %v2885_v61  ;;  %v7126_v30 = vsub.f32 %v7062_v0, %v2885_v61  ;;  %v7129_v31 = vsub.f32 %v7068_v44, %v2885_v61 }
 0x3e4   : > { %v7132_v10 = vsub.f32 %v7074_v41, %v2885_v61  ;;  %v7135_v20 = vsub.f32 %v7080_v49, %v2885_v61  ;;  %v7138_v42 = vsub.f32 %v7086_v62, %v2885_v61  ;;  %v7141_v6 = vsub.f32 %v7092_v22, %v2885_v61 }
 0x3e5   : > { %v7143_v51 = vsub.f32 %v2820_v17, %v2885_v61  ;;  %v7145_v29 = vsub.f32 %v2824_v14, %v2885_v61  ;;  %v7147_v0 = vsub.f32 %v2830_v5, %v2885_v61  ;;  %v7149_v44 = vsub.f32 %v2834_v35, %v2885_v61 }
 0x3e6   : > { %v2919_v41 = vmul.f32 %v7108_v48, %v7108_v48  ;;  %v2921_v49 = vmul.f32 %v7111_v9, %v7111_v9  ;;  %v2923_v62 = vmul.f32 %v7114_v58, %v7114_v58  ;;  %v2925_v22 = vmul.f32 %v7117_v21, %v7117_v21 }
 0x3e7   : > { %v7160_v14 = vsub.f32 %v7028_v45, %v2886_v60  ;;  %v7163_v5 = vsub.f32 %v7034_v34, %v2886_v60  ;;  %v7166_v40 = vsub.f32 %v7041_v27, %v2886_v60  ;;  %v7169_v57 = vsub.f32 %v7047_v25, %v2886_v60 }
 0x3e8   : > { %v2951_v17 = vadd.f32 %v2921_v49, %v2919_v41  ;;  %v7172_v28 = vsub.f32 %v7053_v1, %v2886_v60  ;;  %v7175_v50 = vsub.f32 %v7059_v3, %v2886_v60  ;;  %v7178_v35 = vsub.f32 %v7065_v24, %v2886_v60 }
 0x3e9   : > { %v7181_v55 = vsub.f32 %v7071_v32, %v2886_v60  ;;  %v7184_v34 = vsub.f32 %v7077_v4, %v2886_v60  ;;  %v7187_v27 = vsub.f32 %v7083_v11, %v2886_v60  ;;  %v7190_v25 = vsub.f32 %v7089_v39, %v2886_v60 }
 0x3ea   : > { %v2952_v45 = vadd.f32 %v2951_v17, %v2923_v62  ;;  %v7193_v1 = vsub.f32 %v7095_v37, %v2886_v60  ;;  %v7196_v3 = vsub.f32 %v7098_v23, %v2886_v60  ;;  %v7199_v24 = vsub.f32 %v7101_v59, %v2886_v60 }
 0x3eb   : > { %v2927_v32 = vmul.f32 %v7120_v7, %v7120_v7  ;;  %v7204_v54 = vsub.f32 %v7104_v16, %v2886_v60  ;;  %v7206_v11 = vsub.f32 %v2836_v38, %v2886_v60  ;;  %v2920_v39 = vmul.f32 %v7160_v14, %v7160_v14 }
 0x3ec   : > { %v2953_v4 = vadd.f32 %v2952_v45, %v2925_v22  ;;  %v2922_v37 = vmul.f32 %v7163_v5, %v7163_v5  ;;  %v2929_v23 = vmul.f32 %v7123_v47, %v7123_v47  ;;  %v2931_v46 = vmul.f32 %v7126_v30, %v7126_v30 }
 0x3ed   : > { %v2924_v16 = vmul.f32 %v7166_v40, %v7166_v40  ;;  %v2933_v38 = vmul.f32 %v7129_v31, %v7129_v31  ;;  %v2926_v63 = vmul.f32 %v7169_v57, %v7169_v57  ;;  %v2935_v56 = vmul.f32 %v7132_v10, %v7132_v10 }
 0x3ee   : > { %v2954_v59 = vadd.f32 %v2953_v4, %v2927_v32  ;;  %v2972_v43 = vadd.f32 %v2922_v37, %v2920_v39  ;;  %v2928_v53 = vmul.f32 %v7172_v28, %v7172_v28  ;;  %v2937_v13 = vmul.f32 %v7135_v20, %v7135_v20 }
 0x3ef   : > { %v2930_v61 = vmul.f32 %v7175_v50, %v7175_v50  ;;  %v2939_v41 = vmul.f32 %v7138_v42, %v7138_v42  ;;  %v2932_v60 = vmul.f32 %v7178_v35, %v7178_v35  ;;  %v2941_v22 = vmul.f32 %v7141_v6, %v7141_v6 }
 0x3f0   : > { %v2955_v8 = vadd.f32 %v2954_v59, %v2929_v23  ;;  %v2973_v52 = vadd.f32 %v2972_v43, %v2924_v16  ;;  %v2934_v45 = vmul.f32 %v7181_v55, %v7181_v55  ;;  %v2943_v4 = vmul.f32 %v7143_v51, %v7143_v51 }
 0x3f1   : > { %v2936_v37 = vmul.f32 %v7184_v34, %v7184_v34  ;;  %v2945_v59 = vmul.f32 %v7145_v29, %v7145_v29  ;;  %v2947_v43 = vmul.f32 %v7147_v0, %v7147_v0 }
 0x3f2   : > { %v2956_v36 = vadd.f32 %v2955_v8, %v2931_v46  ;;  %v2974_v26 = vadd.f32 %v2973_v52, %v2926_v63  ;;  %v2938_v8 = vmul.f32 %v7187_v27, %v7187_v27  ;;  %v2949_v52 = vmul.f32 %v7149_v44, %v7149_v44 }
 0x3f4   : > { %v2957_v33 = vadd.f32 %v2956_v36, %v2933_v38  ;;  %v2975_v12 = vadd.f32 %v2974_v26, %v2928_v53  ;;  %v2940_v36 = vmul.f32 %v7190_v25, %v7190_v25 }
 0x3f6   : > { %v2958_v18 = vadd.f32 %v2957_v33, %v2935_v56  ;;  %v2976_v62 = vadd.f32 %v2975_v12, %v2930_v61  ;;  %v2942_v33 = vmul.f32 %v7193_v1, %v7193_v1  ;;  %v2946_v12 = vmul.f32 %v7199_v24, %v7199_v24 }
 0x3f8   : > { %v2959_v49 = vadd.f32 %v2958_v18, %v2937_v13  ;;  %v2977_v32 = vadd.f32 %v2976_v62, %v2932_v60  ;;  %v2944_v13 = vmul.f32 %v7196_v3, %v7196_v3  ;;  %v2948_v60 = vmul.f32 %v7204_v54, %v7204_v54 }
 0x3fa   : > { %v2960_v17 = vadd.f32 %v2959_v49, %v2939_v41  ;;  %v2978_v23 = vadd.f32 %v2977_v32, %v2934_v45 }
 0x3fc   : > { %v2961_v39 = vadd.f32 %v2960_v17, %v2941_v22  ;;  %v2979_v16 = vadd.f32 %v2978_v23, %v2936_v37  ;;  %v2950_v17 = vmul.f32 %v7206_v11, %v7206_v11 }
 0x3fe   : > { %v2962_v46 = vadd.f32 %v2961_v39, %v2943_v4  ;;  %v2980_v63 = vadd.f32 %v2979_v16, %v2938_v8 }
 0x400   : > { %v2963_v38 = vadd.f32 %v2962_v46, %v2945_v59  ;;  %v2981_v53 = vadd.f32 %v2980_v63, %v2940_v36 }
 0x402   : > { %v2964_v56 = vadd.f32 %v2963_v38, %v2947_v43  ;;  %v2982_v18 = vadd.f32 %v2981_v53, %v2942_v33 }
 0x404   : > { %v2965_v26 = vadd.f32 %v2964_v56, %v2949_v52  ;;  %v2983_v41 = vadd.f32 %v2982_v18, %v2944_v13  ;;  %v2840_v13 = vld [vmem:[#allocation8 + $0x2] ss:$8 sm:$0x3] }
 0x406   : > { %v2966_v61 = vrot.slane %v2965_v26, 4  ;;  %v2984_v62 = vadd.f32 %v2983_v41, %v2946_v12 }
 0x408   : > { %v2967_v49 = vadd.f32 %v2966_v61, %v2965_v26  ;;  %v2985_v45 = vadd.f32 %v2984_v62, %v2948_v60  ;;  %v2842_v61 = vld [vmem:[#allocation8 + $0x3] ss:$8 sm:$0x3] }
 0x409   : > { %v7265_v41 = vrot.slane %v2842_v61, %v6682_v15 }
 0x40a   : > { %v2968_v22 = vrot.slane %v2967_v49, 2  ;;  %v2986_v4 = vadd.f32 %v2985_v45, %v2950_v17 }
 0x40c   : > { %v2969_v32 = vadd.f32 %v2968_v22, %v2967_v49  ;;  %v2987_v37 = vrot.slane %v2986_v4, 4  ;;  %v7268_v49 = vrot.slane %v2842_v61, %v6685_v2 }
 0x40e   : > { %v2970_v39 = vrot.slane %v2969_v32, 1  ;;  %v2988_v59 = vadd.f32 %v2987_v37, %v2986_v4 }
 0x410   : > { %v2971_v23 = vadd.f32 %v2970_v39, %v2969_v32  ;;  %v2989_v46 = vrot.slane %v2988_v59, 2 }
 0x412   : > { %v2993_v8 = vmul.f32 0.0078125, %v2971_v23  ;;  %v2990_v16 = vadd.f32 %v2989_v46, %v2988_v59 }
 0x414   : > { %v2991_v43 = vrot.slane %v2990_v16, 1  ;;  %v2995_v38 = vadd.f32 1e-05, %v2993_v8 }
 0x416   : > { %v2992_v36 = vadd.f32 %v2991_v43, %v2990_v16  ;;  %5269 = vrsqrt.f32 %v2995_v38 }
 0x418   : > { %v2994_v63 = vmul.f32 0.0078125, %v2992_v36 }
 0x41a   : > { %v2996_v52 = vadd.f32 1e-05, %v2994_v63 }
 0x41c   : > { %5271 = vrsqrt.f32 %v2996_v52 }
 0x420   : > { %v5270_v56 = vpop.eup %5269 }
 0x426   : > { %v5272_v33 = vpop.eup %5271 }
 0x427   : > { %v3001_v53 = vcombine.low %v5270_v56, %v5272_v33 }
 0x429   : > { %v3008_v26 = vrot.slane %v3001_v53, %v6676_v19 }
 0x42b   : > { %v3015_v18 = vrot.slane %v3008_v26, %v6676_v19 }
 0x42d   : > { %v3017_v12 = vmul.f32 %v3015_v18, %v2840_v13 }
 0x42f   : > { %v7271_v60 = vrot.slane %v3017_v12, %v6682_v15  ;;  %v7274_v62 = vrot.slane %v3017_v12, %v6685_v2 }
 0x431   : > { %v3030_v22 = vmul.f32 %v7274_v62, %v7160_v14  ;;  %v3032_v19 = vmul.f32 %v7274_v62, %v7163_v5  ;;  %v3029_v17 = vmul.f32 %v7271_v60, %v7108_v48  ;;  %v3031_v45 = vmul.f32 %v7271_v60, %v7111_v9 }
 0x432   : > { %v3034_v32 = vmul.f32 %v7274_v62, %v7166_v40  ;;  %v3036_v15 = vmul.f32 %v7274_v62, %v7169_v57  ;;  %v3033_v5 = vmul.f32 %v7271_v60, %v7114_v58  ;;  %v3035_v40 = vmul.f32 %v7271_v60, %v7117_v21 }
 0x433   : > { %v3073_v2 = vadd.f32 %v7268_v49, %v3030_v22  ;;  %v3075_v4 = vadd.f32 %v7268_v49, %v3032_v19  ;;  %v3072_v14 = vadd.f32 %v7265_v41, %v3029_v17  ;;  %v3074_v48 = vadd.f32 %v7265_v41, %v3031_v45 }
 0x434   : > { %v3077_v39 = vadd.f32 %v7268_v49, %v3034_v32  ;;  %v3079_v9 = vadd.f32 %v7268_v49, %v3036_v15  ;;  %v3038_v43 = vmul.f32 %v7274_v62, %v7172_v28  ;;  %v3040_v58 = vmul.f32 %v7274_v62, %v7175_v50 }
 0x435   : > { %v3105_v37 = vmax.f32 %v3073_v2, 0.0  ;;  %v3107_v57 = vmax.f32 %v3075_v4, 0.0  ;;  %v3104_v23 = vmax.f32 %v3072_v14, 0.0  ;;  %v3106_v59 = vmax.f32 %v3074_v48, 0.0 }
 0x436   : > { %v3109_v46 = vmax.f32 %v3077_v39, 0.0  ;;  %v3111_v8 = vmax.f32 %v3079_v9, 0.0  ;;  %v3076_v36 = vadd.f32 %v7265_v41, %v3033_v5  ;;  %v3078_v63 = vadd.f32 %v7265_v41, %v3035_v40 }
 0x437   : > { %v3137_v16 = vpack.c.bf16 %v3107_v57, %v3105_v37  ;;  %v3136_v38 = vpack.c.bf16 %v3106_v59, %v3104_v23  ;;  %v3081_v52 = vadd.f32 %v7268_v49, %v3038_v43  ;;  %v3083_v56 = vadd.f32 %v7268_v49, %v3040_v58 }
 0x438   : > { %v3139_v21 = vpack.c.bf16 %v3111_v8, %v3109_v46  ;;  %v3108_v33 = vmax.f32 %v3076_v36, 0.0  ;;  %v3110_v53 = vmax.f32 %v3078_v63, 0.0  ;;  %v3037_v28 = vmul.f32 %v7271_v60, %v7120_v7 }
 0x439   : > { %3312 = vmatprep.mubr.bf16.mxu1 %v3137_v16  ;;  %v3039_v50 = vmul.f32 %v7271_v60, %v7123_v47  ;;  %v3113_v26 = vmax.f32 %v3081_v52, 0.0  ;;  %v3115_v13 = vmax.f32 %v3083_v56, 0.0  ;;  %v3042_v18 = vmul.f32 %v7274_v62, %v7178_v35 }
 0x43a   : > { %3313 = vmatmul.mubr.bf16.vlgmr.msra.gmra.mrb[32].mxu1 %v3136_v38  ;;  %v3044_v61 = vmul.f32 %v7274_v62, %v7181_v55  ;;  %v3138_v12 = vpack.c.bf16 %v3110_v53, %v3108_v33  ;;  %v3080_v22 = vadd.f32 %v7265_v41, %v3037_v28  ;;  %v3041_v35 = vmul.f32 %v7271_v60, %v7126_v30 }
 0x43b   : > { %3320 = vmatprep.mubr.bf16.mxu1 %v3139_v21  ;;  %v3082_v19 = vadd.f32 %v7265_v41, %v3039_v50  ;;  %v3141_v17 = vpack.c.bf16 %v3115_v13, %v3113_v26  ;;  %v3085_v45 = vadd.f32 %v7268_v49, %v3042_v18  ;;  %v3043_v55 = vmul.f32 %v7271_v60, %v7129_v31 }
 0x43c   : > { %v3087_v7 = vadd.f32 %v7268_v49, %v3044_v61  ;;  %v3112_v47 = vmax.f32 %v3080_v22, 0.0  ;;  %v3046_v4 = vmul.f32 %v7274_v62, %v7184_v34  ;;  %v3048_v14 = vmul.f32 %v7274_v62, %v7187_v27 }
 0x43d   : > { %v3114_v32 = vmax.f32 %v3082_v19, 0.0  ;;  %v3117_v15 = vmax.f32 %v3085_v45, 0.0  ;;  %v3084_v48 = vadd.f32 %v7265_v41, %v3041_v35  ;;  %v3086_v39 = vadd.f32 %v7265_v41, %v3043_v55 }
 0x43e   : > { %v3119_v2 = vmax.f32 %v3087_v7, 0.0  ;;  %v3089_v40 = vadd.f32 %v7268_v49, %v3046_v4  ;;  %v3091_v30 = vadd.f32 %v7268_v49, %v3048_v14  ;;  %v3045_v34 = vmul.f32 %v7271_v60, %v7132_v10 }
 0x43f   : > { %v3140_v5 = vpack.c.bf16 %v3114_v32, %v3112_v47  ;;  %v3116_v31 = vmax.f32 %v3084_v48, 0.0  ;;  %v3118_v37 = vmax.f32 %v3086_v39, 0.0  ;;  %v3047_v27 = vmul.f32 %v7271_v60, %v7135_v20 }
 0x440   : > { %v3143_v9 = vpack.c.bf16 %v3119_v2, %v3117_v15  ;;  %v3121_v57 = vmax.f32 %v3089_v40, 0.0  ;;  %v3123_v23 = vmax.f32 %v3091_v30, 0.0  ;;  %v3050_v59 = vmul.f32 %v7274_v62, %v7190_v25 }
 0x441   : > { %v3052_v46 = vmul.f32 %v7274_v62, %v7193_v1  ;;  %v3142_v8 = vpack.c.bf16 %v3118_v37, %v3116_v31  ;;  %v3088_v16 = vadd.f32 %v7265_v41, %v3045_v34  ;;  %v3090_v43 = vadd.f32 %v7265_v41, %v3047_v27 }
 0x442   : > { %3321 = vmatmul.mubr.bf16.gmra.mrb[36].mxu1 %v3138_v12  ;;  %v3145_v58 = vpack.c.bf16 %v3123_v23, %v3121_v57  ;;  %v3093_v38 = vadd.f32 %v7268_v49, %v3050_v59  ;;  %v3049_v25 = vmul.f32 %v7271_v60, %v7138_v42  ;;  %v3051_v1 = vmul.f32 %v7271_v60, %v7141_v6 }
 0x443   : > { %3328 = vmatprep.mubr.bf16.mxu1 %v3141_v17  ;;  %v3095_v10 = vadd.f32 %v7268_v49, %v3052_v46  ;;  %v3120_v20 = vmax.f32 %v3088_v16, 0.0  ;;  %v3122_v36 = vmax.f32 %v3090_v43, 0.0  ;;  %v3054_v52 = vmul.f32 %v7274_v62, %v7196_v3  ;;  %v5238_v16 = vld [vmem:[%s7586_s4 + $0x8] sm:$0xff]  }
 0x444   : > { %v3125_v63 = vmax.f32 %v3093_v38, 0.0  ;;  %v3056_v56 = vmul.f32 %v7274_v62, %v7199_v24  ;;  %v3092_v53 = vadd.f32 %v7265_v41, %v3049_v25  ;;  %v3094_v28 = vadd.f32 %v7265_v41, %v3051_v1 }
 0x445   : > { %v3127_v21 = vmax.f32 %v3095_v10, 0.0  ;;  %v3144_v33 = vpack.c.bf16 %v3122_v36, %v3120_v20  ;;  %v3097_v26 = vadd.f32 %v7268_v49, %v3054_v52  ;;  %v3053_v3 = vmul.f32 %v7271_v60, %v7143_v51  ;;  %v5239_v36 = vld [vmem:[%s7586_s4 + $0x10] sm:$0xff]  }
 0x446   : > { %v3099_v42 = vadd.f32 %v7268_v49, %v3056_v56  ;;  %v3124_v6 = vmax.f32 %v3092_v53, 0.0  ;;  %v3126_v13 = vmax.f32 %v3094_v28, 0.0  ;;  %v3055_v24 = vmul.f32 %v7271_v60, %v7145_v29 }
 0x447   : > { %v3147_v50 = vpack.c.bf16 %v3127_v21, %v3125_v63  ;;  %v3060_v18 = vmul.f32 %v7274_v62, %v7206_v11  ;;  %v3129_v61 = vmax.f32 %v3097_v26, 0.0  ;;  %v3058_v22 = vmul.f32 %v7274_v62, %v7204_v54  ;;  %v5240_v21 = vld [vmem:[%s7586_s4 + $0x18] sm:$0xff]  }
 0x448   : > { %v3131_v12 = vmax.f32 %v3099_v42, 0.0  ;;  %v3146_v19 = vpack.c.bf16 %v3126_v13, %v3124_v6  ;;  %v3096_v17 = vadd.f32 %v7265_v41, %v3053_v3  ;;  %v3098_v45 = vadd.f32 %v7265_v41, %v3055_v24  ;;  %v5242_v13 = vld [vmem:[%s7586_s4 + $0x28] sm:$0xff]  }
 0x449   : > { %v3103_v7 = vadd.f32 %v7268_v49, %v3060_v18  ;;  %v3101_v51 = vadd.f32 %v7268_v49, %v3058_v22  ;;  %v3057_v11 = vmul.f32 %v7271_v60, %v7147_v0  ;;  %v3059_v54 = vmul.f32 %v7271_v60, %v7149_v44  ;;  %v5243_v22 = vld [vmem:[%s7586_s4 + $0x30] sm:$0xff]  }
 0x44a   : > { %3329 = vmatmul.mubr.bf16.gmra.mrb[40].mxu1 %v3140_v5  ;;  %v3149_v47 = vpack.c.bf16 %v3131_v12, %v3129_v61  ;;  %v3128_v29 = vmax.f32 %v3096_v17, 0.0  ;;  %v3130_v32 = vmax.f32 %v3098_v45, 0.0 }
 0x44b   : > { %3336 = vmatprep.mubr.bf16.mxu1 %v3143_v9  ;;  %v3133_v62 = vmax.f32 %v3101_v51, 0.0  ;;  %v3135_v35 = vmax.f32 %v3103_v7, 0.0  ;;  %v3100_v15 = vadd.f32 %v7265_v41, %v3057_v11  ;;  %v3102_v2 = vadd.f32 %v7265_v41, %v3059_v54  ;;  %v5244_v7 = vld [vmem:[%s7586_s4 + $0x38] sm:$0xff]  }
 0x44c   : > { %v3148_v55 = vpack.c.bf16 %v3130_v32, %v3128_v29 }
 0x44d   : > { %v3151_v4 = vpack.c.bf16 %v3135_v35, %v3133_v62  ;;  %v3132_v49 = vmax.f32 %v3100_v15, 0.0  ;;  %v3134_v14 = vmax.f32 %v3102_v2, 0.0 }
 0x44f   : > { %v3150_v5 = vpack.c.bf16 %v3134_v14, %v3132_v49 }
 0x452   : > { %3337 = vmatmul.mubr.bf16.gmra.mrb[44].mxu1 %v3142_v8  ;;  %v5237_v8 = vld [vmem:[%s7586_s4] sm:$0xff]  }
 0x453   : > { %3344 = vmatprep.mubr.bf16.mxu1 %v3145_v58  ;;  %4716 = vmatprep.subr.bf16.mxu1 %v5237_v8 }
 0x454   : > { %4717 = vmatpush3.bf16.msra.mxu1 %v5237_v8 }
 0x455   : > { %4718 = vmatprep.subr.bf16.mxu1 %v5238_v16 }
 0x458   : > { %4719 = vmatpush3.bf16.msra.mxu1 %v5238_v16 }
 0x459   : > { %4720 = vmatprep.subr.bf16.mxu1 %v5239_v36 }
 0x45a   : > { %3345 = vmatmul.mubr.bf16.gmra.mrb[48].mxu1 %v3144_v33 }
 0x45b   : > { %3352 = vmatprep.mubr.bf16.mxu1 %v3147_v50  ;;  %v5241_v50 = vld [vmem:[%s7586_s4 + $0x20] sm:$0xff]  }
 0x45c   : > { %4721 = vmatpush3.bf16.msra.mxu1 %v5239_v36 }
 0x45d   : > { %4722 = vmatprep.subr.bf16.mxu1 %v5240_v21 }
 0x460   : > { %4723 = vmatpush3.bf16.msra.mxu1 %v5240_v21 }
 0x461   : > { %4724 = vmatprep.subr.bf16.mxu1 %v5241_v50 }
 0x462   : > { %3353 = vmatmul.mubr.bf16.gmra.mrb[52].mxu1 %v3146_v19 }
 0x463   : > { %3360 = vmatprep.mubr.bf16.mxu1 %v3149_v47 }
 0x464   : > { %4725 = vmatpush3.bf16.msra.mxu1 %v5241_v50 }
 0x465   : > { %4726 = vmatprep.subr.bf16.mxu1 %v5242_v13 }
 0x468   : > { %4727 = vmatpush3.bf16.msra.mxu1 %v5242_v13 }
 0x469   : > { %4728 = vmatprep.subr.bf16.mxu1 %v5243_v22 }
 0x46a   : > { %3361 = vmatmul.mubr.bf16.gmra.mrb[56].mxu1 %v3148_v55 }
 0x46b   : > { %3368 = vmatprep.mubr.bf16.mxu1 %v3151_v4 }
 0x46c   : > { %4729 = vmatpush3.bf16.msra.mxu1 %v5243_v22 }
 0x46d   : > { %4730 = vmatprep.subr.bf16.mxu1 %v5244_v7 }
 0x470   : > { %4731 = vmatpush3.bf16.msra.mxu1 %v5244_v7 }
 0x472   : > { %3369 = vmatmul.mubr.bf16.gmra.mrb[60].mxu1 %v3150_v5 }
 0x50d   : > { %v4620_v48 = vpop.f32.mrb[32].mxu1 }
 0x50e   : > { %v4621_v39 = vpop.f32.mrb[33].mxu1 }
 0x50f   : > { %v7372_v0 = vadd.f32 %v4621_v39, %v4620_v48  ;;  %v4623_v9 = vpop.f32.mrb[34].mxu1 }
 0x510   : > { %v4624_v44 = vpop.f32.mrb[35].mxu1 }
 0x511   : > { %v7374_v60 = vadd.f32 %v4624_v44, %v4623_v9 }
 0x513   : > { %v3379_v40 = vadd.f32 %v7374_v60, %v7372_v0 }
 0x515   : > { %v4626_v30 = vpop.f32.mrb[36].mxu1 }
 0x516   : > { %v4627_v41 = vpop.f32.mrb[37].mxu1 }
 0x517   : > { %v7378_v31 = vadd.f32 %v4627_v41, %v4626_v30  ;;  %v4629_v37 = vpop.f32.mrb[38].mxu1 }
 0x518   : > { %v4630_v34 = vpop.f32.mrb[39].mxu1 }
 0x519   : > { %v3380_v27 = vadd.f32 %v7378_v31, %v3379_v40  ;;  %v7381_v57 = vadd.f32 %v4630_v34, %v4629_v37 }
 0x51b   : > { %v3381_v23 = vadd.f32 %v7381_v57, %v3380_v27 }
 0x51d   : > { %v4632_v59 = vpop.f32.mrb[40].mxu1 }
 0x51e   : > { %v4633_v46 = vpop.f32.mrb[41].mxu1 }
 0x51f   : > { %v7390_v43 = vadd.f32 %v4633_v46, %v4632_v59  ;;  %v4635_v58 = vpop.f32.mrb[42].mxu1 }
 0x520   : > { %v4636_v38 = vpop.f32.mrb[43].mxu1 }
 0x521   : > { %v3382_v10 = vadd.f32 %v7390_v43, %v3381_v23  ;;  %v7393_v20 = vadd.f32 %v4636_v38, %v4635_v58 }
 0x523   : > { %v3383_v25 = vadd.f32 %v7393_v20, %v3382_v10 }
 0x525   : > { %v4638_v1 = vpop.f32.mrb[44].mxu1 }
 0x526   : > { %v4639_v63 = vpop.f32.mrb[45].mxu1 }
 0x527   : > { %v7402_v52 = vadd.f32 %v4639_v63, %v4638_v1  ;;  %v4641_v56 = vpop.f32.mrb[46].mxu1 }
 0x528   : > { %v4642_v33 = vpop.f32.mrb[47].mxu1 }
 0x529   : > { %v3384_v53 = vadd.f32 %v7402_v52, %v3383_v25  ;;  %v7405_v28 = vadd.f32 %v4642_v33, %v4641_v56 }
 0x52b   : > { %v3385_v26 = vadd.f32 %v7405_v28, %v3384_v53 }
 0x52d   : > { %v4644_v42 = vpop.f32.mrb[48].mxu1 }
 0x52e   : > { %v4645_v6 = vpop.f32.mrb[49].mxu1 }
 0x52f   : > { %v4646_v3 = vadd.f32 %v4645_v6, %v4644_v42  ;;  %v4647_v24 = vpop.f32.mrb[50].mxu1 }
 0x530   : > { %v4648_v18 = vpop.f32.mrb[51].mxu1 }
 0x531   : > { %v3386_v61 = vadd.f32 %v4646_v3, %v3385_v26  ;;  %v4649_v12 = vadd.f32 %v4648_v18, %v4647_v24 }
 0x533   : > { %v3387_v19 = vadd.f32 %v4649_v12, %v3386_v61 }
 0x535   : > { %v4650_v17 = vpop.f32.mrb[52].mxu1 }
 0x536   : > { %v4651_v45 = vpop.f32.mrb[53].mxu1 }
 0x537   : > { %v4652_v47 = vadd.f32 %v4651_v45, %v4650_v17  ;;  %v4653_v51 = vpop.f32.mrb[54].mxu1 }
 0x538   : > { %v4654_v29 = vpop.f32.mrb[55].mxu1 }
 0x539   : > { %v3388_v32 = vadd.f32 %v4652_v47, %v3387_v19  ;;  %v4655_v11 = vadd.f32 %v4654_v29, %v4653_v51 }
 0x53b   : > { %v3389_v54 = vadd.f32 %v4655_v11, %v3388_v32 }
 0x53d   : > { %v4656_v62 = vpop.f32.mrb[56].mxu1 }
 0x53e   : > { %v4657_v35 = vpop.f32.mrb[57].mxu1 }
 0x53f   : > { %v4658_v55 = vadd.f32 %v4657_v35, %v4656_v62  ;;  %v4659_v15 = vpop.f32.mrb[58].mxu1 }
 0x540   : > { %v4660_v2 = vpop.f32.mrb[59].mxu1 }
 0x541   : > { %v3390_v4 = vadd.f32 %v4658_v55, %v3389_v54  ;;  %v4661_v49 = vadd.f32 %v4660_v2, %v4659_v15 }
 0x543   : > { %v3391_v14 = vadd.f32 %v4661_v49, %v3390_v4 }
 0x545   : > { %v4662_v5 = vpop.f32.mrb[60].mxu1 }
 0x546   : > { %v4663_v48 = vpop.f32.mrb[61].mxu1 }
 0x547   : > { %v4664_v39 = vadd.f32 %v4663_v48, %v4662_v5  ;;  %v4665_v9 = vpop.f32.mrb[62].mxu1 }
 0x548   : > { %v4666_v44 = vpop.f32.mrb[63].mxu1 }
 0x549   : > { %v3392_v40 = vadd.f32 %v4664_v39, %v3391_v14  ;;  %v4667_v30 = vadd.f32 %v4666_v44, %v4665_v9 }
 0x54b   : > { %v3393_v41 = vadd.f32 %v4667_v30, %v3392_v40 }
 0x54d   : > { %v3394_v37 = vrot.slane %v3393_v41, 4 }
 0x54f   : > { %v3395_v34 = vadd.f32 %v3394_v37, %v3393_v41 }
 0x551   : > { %v3396_v27 = vrot.slane %v3395_v34, 2 }
 0x553   : > { %v3397_v23 = vadd.f32 %v3396_v27, %v3395_v34  ;;  %v3378_v34 = vld [vmem:[#allocation8 + $0x5] ss:$0 sm:$0xff] }
 0x555   : > { %v3398_v59 = vrot.slane %v3397_v23, 1 }
 0x557   : > { %v3399_v46 = vadd.f32 %v3398_v59, %v3397_v23 }
 0x559   : > { %v3400_v8 = vmul.f32 0.0078125, %v3399_v46 }
 0x55b   : > { %v3401_v16 = vsub.f32 %v7372_v0, %v3400_v8  ;;  %v3402_v58 = vsub.f32 %v7374_v60, %v3400_v8  ;;  %v3403_v38 = vsub.f32 %v7378_v31, %v3400_v8  ;;  %v3404_v10 = vsub.f32 %v7381_v57, %v3400_v8 }
 0x55c   : > { %v3405_v36 = vsub.f32 %v7390_v43, %v3400_v8  ;;  %v3406_v25 = vsub.f32 %v7393_v20, %v3400_v8  ;;  %v3407_v1 = vsub.f32 %v7402_v52, %v3400_v8  ;;  %v7428_v63 = vsub.f32 %v7405_v28, %v3400_v8 }
 0x55d   : > { %v7430_v21 = vsub.f32 %v4646_v3, %v3400_v8  ;;  %v7432_v56 = vsub.f32 %v4649_v12, %v3400_v8  ;;  %v7434_v0 = vsub.f32 %v4652_v47, %v3400_v8  ;;  %v7436_v60 = vsub.f32 %v4655_v11, %v3400_v8 }
 0x55e   : > { %v7438_v31 = vsub.f32 %v4658_v55, %v3400_v8  ;;  %v7440_v57 = vsub.f32 %v4661_v49, %v3400_v8  ;;  %v7442_v43 = vsub.f32 %v4664_v39, %v3400_v8  ;;  %v3416_v20 = vsub.f32 %v4667_v30, %v3400_v8  ;;  %v3377_v30 = vld [vmem:[#allocation8 + $0x4] ss:$0 sm:$0xff] }
 0x55f   : > { %v3417_v33 = vmul.f32 %v3401_v16, %v3401_v16  ;;  %v3418_v52 = vmul.f32 %v3402_v58, %v3402_v58  ;;  %v3419_v53 = vmul.f32 %v3403_v38, %v3403_v38  ;;  %v3420_v50 = vmul.f32 %v3404_v10, %v3404_v10 }
 0x560   : > { %v3421_v42 = vmul.f32 %v3405_v36, %v3405_v36  ;;  %v3422_v13 = vmul.f32 %v3406_v25, %v3406_v25  ;;  %v3423_v24 = vmul.f32 %v3407_v1, %v3407_v1  ;;  %v3424_v61 = vmul.f32 %v7428_v63, %v7428_v63 }
 0x561   : > { %v3433_v28 = vadd.f32 %v3418_v52, %v3417_v33  ;;  %v3425_v22 = vmul.f32 %v7430_v21, %v7430_v21  ;;  %v3426_v17 = vmul.f32 %v7432_v56, %v7432_v56  ;;  %v3427_v7 = vmul.f32 %v7434_v0, %v7434_v0 }
 0x562   : > { %v3428_v51 = vmul.f32 %v7436_v60, %v7436_v60  ;;  %v3429_v32 = vmul.f32 %v7438_v31, %v7438_v31  ;;  %v3430_v54 = vmul.f32 %v7440_v57, %v7440_v57  ;;  %v3431_v35 = vmul.f32 %v7442_v43, %v7442_v43 }
 0x563   : > { %v3434_v26 = vadd.f32 %v3433_v28, %v3419_v53  ;;  %v3432_v15 = vmul.f32 %v3416_v20, %v3416_v20 }
 0x565   : > { %v3435_v6 = vadd.f32 %v3434_v26, %v3420_v50 }
 0x567   : > { %v3436_v3 = vadd.f32 %v3435_v6, %v3421_v42 }
 0x569   : > { %v3437_v18 = vadd.f32 %v3436_v3, %v3422_v13 }
 0x56b   : > { %v3438_v12 = vadd.f32 %v3437_v18, %v3423_v24 }
 0x56d   : > { %v3439_v19 = vadd.f32 %v3438_v12, %v3424_v61 }
 0x56f   : > { %v3440_v45 = vadd.f32 %v3439_v19, %v3425_v22 }
 0x571   : > { %v3441_v47 = vadd.f32 %v3440_v45, %v3426_v17 }
 0x573   : > { %v3442_v29 = vadd.f32 %v3441_v47, %v3427_v7 }
 0x575   : > { %v3443_v11 = vadd.f32 %v3442_v29, %v3428_v51 }
 0x577   : > { %v3444_v62 = vadd.f32 %v3443_v11, %v3429_v32 }
 0x579   : > { %v3445_v55 = vadd.f32 %v3444_v62, %v3430_v54 }
 0x57b   : > { %v3446_v2 = vadd.f32 %v3445_v55, %v3431_v35 }
 0x57d   : > { %v3447_v4 = vadd.f32 %v3446_v2, %v3432_v15 }
 0x57f   : > { %v3448_v49 = vrot.slane %v3447_v4, 4 }
 0x581   : > { %v3449_v14 = vadd.f32 %v3448_v49, %v3447_v4 }
 0x583   : > { %v3450_v5 = vrot.slane %v3449_v14, 2 }
 0x585   : > { %v3451_v48 = vadd.f32 %v3450_v5, %v3449_v14 }
 0x587   : > { %v3452_v39 = vrot.slane %v3451_v48, 1 }
 0x589   : > { %v3453_v9 = vadd.f32 %v3452_v39, %v3451_v48 }
 0x58b   : > { %v3454_v44 = vmul.f32 0.0078125, %v3453_v9 }
 0x58d   : > { %v3455_v40 = vadd.f32 1e-05, %v3454_v44  ;;  %v5247_v44 = vld [vmem:[#allocation5 + $0x10] sm:$0xff]  }
 0x58f   : > { %5273 = vrsqrt.f32 %v3455_v40  ;;  %v5248_v40 = vld [vmem:[#allocation5 + $0x18] sm:$0xff]  }
 0x599   : > { %v5274_v41 = vpop.eup %5273 }
 0x59a   : > { %v3457_v37 = vmul.f32 %v5274_v41, %v3377_v30 }
 0x59c   : > { %v3473_v27 = vmul.f32 %v3457_v37, %v3416_v20  ;;  %v3458_v23 = vmul.f32 %v3457_v37, %v3401_v16  ;;  %v3459_v59 = vmul.f32 %v3457_v37, %v3402_v58  ;;  %v3460_v46 = vmul.f32 %v3457_v37, %v3403_v38 }
 0x59d   : > { %v3461_v8 = vmul.f32 %v3457_v37, %v3404_v10  ;;  %v3462_v33 = vmul.f32 %v3457_v37, %v3405_v36  ;;  %v3463_v52 = vmul.f32 %v3457_v37, %v3406_v25  ;;  %v3464_v53 = vmul.f32 %v3457_v37, %v3407_v1 }
 0x59e   : > { %v3474_v28 = vadd.f32 %v3458_v23, %v3378_v34  ;;  %v3475_v50 = vadd.f32 %v3459_v59, %v3378_v34  ;;  %v3476_v26 = vadd.f32 %v3460_v46, %v3378_v34  ;;  %v3465_v42 = vmul.f32 %v3457_v37, %v7428_v63  ;;  %v5250_v59 = vld [vmem:[#allocation5 + $0x28] sm:$0xff]  }
 0x59f   : > { %v3477_v6 = vadd.f32 %v3461_v8, %v3378_v34  ;;  %v3478_v13 = vadd.f32 %v3462_v33, %v3378_v34  ;;  %v3479_v3 = vadd.f32 %v3463_v52, %v3378_v34  ;;  %v3480_v24 = vadd.f32 %v3464_v53, %v3378_v34  ;;  %v5251_v53 = vld [vmem:[#allocation5 + $0x30] sm:$0xff]  }
 0x5a0   : > { %v3490_v18 = vmax.f32 %v3474_v28, 0.0  ;;  %v3491_v61 = vmax.f32 %v3475_v50, 0.0  ;;  %v3492_v12 = vmax.f32 %v3476_v26, 0.0  ;;  %v3481_v20 = vadd.f32 %v3465_v42, %v3378_v34 }
 0x5a1   : > { %v3493_v16 = vmax.f32 %v3477_v6, 0.0  ;;  %v3494_v58 = vmax.f32 %v3478_v13, 0.0  ;;  %v3495_v38 = vmax.f32 %v3479_v3, 0.0  ;;  %v3496_v10 = vmax.f32 %v3480_v24, 0.0  ;;  %v5252_v6 = vld [vmem:[#allocation5 + $0x38] sm:$0xff]  }
 0x5a2   : > { %v3506_v36 = vpack.c.bf16 %v3491_v61, %v3490_v18  ;;  %v3497_v25 = vmax.f32 %v3481_v20, 0.0  ;;  %v3466_v1 = vmul.f32 %v3457_v37, %v7430_v21  ;;  %v3467_v22 = vmul.f32 %v3457_v37, %v7432_v56 }
 0x5a3   : > { %v3507_v19 = vpack.c.bf16 %v3493_v16, %v3492_v12  ;;  %v3508_v63 = vpack.c.bf16 %v3495_v38, %v3494_v58  ;;  %v3468_v17 = vmul.f32 %v3457_v37, %v7434_v0  ;;  %v3469_v45 = vmul.f32 %v3457_v37, %v7436_v60 }
 0x5a4   : > { %4732 = vmatprep.mubr.bf16.mxu1 %v3506_v36  ;;  %v3509_v7 = vpack.c.bf16 %v3497_v25, %v3496_v10  ;;  %v3482_v47 = vadd.f32 %v3466_v1, %v3378_v34  ;;  %v3483_v51 = vadd.f32 %v3467_v22, %v3378_v34  ;;  %v3470_v29 = vmul.f32 %v3457_v37, %v7438_v31 }
 0x5a5   : > { %4733 = vmatmul.mubr.bf16.vlgmr.msra.gmra.mrb[64].mxu1 %v3507_v19  ;;  %v3484_v32 = vadd.f32 %v3468_v17, %v3378_v34  ;;  %v3485_v11 = vadd.f32 %v3469_v45, %v3378_v34  ;;  %v3471_v54 = vmul.f32 %v3457_v37, %v7440_v57  ;;  %v3472_v21 = vmul.f32 %v3457_v37, %v7442_v43  ;;  %v5245_v57 = vld [vmem:[#allocation5] sm:$0xff]   ;;  %v5246_v43 = vld [vmem:[#allocation5 + $0x8] sm:$0xff]  }
 0x5a6   : > { %4736 = vmatprep.mubr.bf16.mxu1 %v3508_v63  ;;  %v3498_v56 = vmax.f32 %v3482_v47, 0.0  ;;  %v3499_v62 = vmax.f32 %v3483_v51, 0.0  ;;  %v3486_v35 = vadd.f32 %v3470_v29, %v3378_v34  ;;  %v3489_v0 = vadd.f32 %v3473_v27, %v3378_v34  ;;  %4748 = vmatprep.subr.bf16.mxu1 %v5245_v57  ;;  %v5249_v37 = vld [vmem:[#allocation5 + $0x20] sm:$0xff]  }
 0x5a7   : > { %v3500_v55 = vmax.f32 %v3484_v32, 0.0  ;;  %v3501_v60 = vmax.f32 %v3485_v11, 0.0  ;;  %v3487_v15 = vadd.f32 %v3471_v54, %v3378_v34  ;;  %v3488_v2 = vadd.f32 %v3472_v21, %v3378_v34  ;;  %4749 = vmatpush3.bf16.msra.mxu1 %v5245_v57 }
 0x5a8   : > { %v3510_v4 = vpack.c.bf16 %v3499_v62, %v3498_v56  ;;  %v3502_v49 = vmax.f32 %v3486_v35, 0.0  ;;  %v3505_v14 = vmax.f32 %v3489_v0, 0.0  ;;  %4750 = vmatprep.subr.bf16.mxu1 %v5246_v43 }
 0x5a9   : > { %v3511_v31 = vpack.c.bf16 %v3501_v60, %v3500_v55  ;;  %v3503_v5 = vmax.f32 %v3487_v15, 0.0  ;;  %v3504_v48 = vmax.f32 %v3488_v2, 0.0 }
 0x5ab   : > { %v3512_v39 = vpack.c.bf16 %v3503_v5, %v3502_v49  ;;  %v3513_v9 = vpack.c.bf16 %v3505_v14, %v3504_v48  ;;  %4751 = vmatpush3.bf16.msra.mxu1 %v5246_v43 }
 0x5ac   : > { %4752 = vmatprep.subr.bf16.mxu1 %v5247_v44 }
 0x5ad   : > { %4737 = vmatmul.mubr.bf16.gmra.mrb[68].mxu1 %v3509_v7 }
 0x5ae   : > { %4740 = vmatprep.mubr.bf16.mxu1 %v3510_v4 }
 0x5af   : > { %4753 = vmatpush3.bf16.msra.mxu1 %v5247_v44 }
 0x5b0   : > { %4754 = vmatprep.subr.bf16.mxu1 %v5248_v40 }
 0x5b3   : > { %4755 = vmatpush3.bf16.msra.mxu1 %v5248_v40 }
 0x5b4   : > { %4756 = vmatprep.subr.bf16.mxu1 %v5249_v37 }
 0x5b5   : > { %4741 = vmatmul.mubr.bf16.gmra.mrb[72].mxu1 %v3511_v31 }
 0x5b6   : > { %4744 = vmatprep.mubr.bf16.mxu1 %v3512_v39 }
 0x5b7   : > { %4757 = vmatpush3.bf16.msra.mxu1 %v5249_v37 }
 0x5b8   : > { %4758 = vmatprep.subr.bf16.mxu1 %v5250_v59 }
 0x5bb   : > { %4759 = vmatpush3.bf16.msra.mxu1 %v5250_v59 }
 0x5bc   : > { %4760 = vmatprep.subr.bf16.mxu1 %v5251_v53 }
 0x5bd   : > { %4745 = vmatmul.mubr.bf16.gmra.mrb[76].mxu1 %v3513_v9 }
 0x5bf   : > { %4761 = vmatpush3.bf16.msra.mxu1 %v5251_v53 }
 0x5c0   : > { %4762 = vmatprep.subr.bf16.mxu1 %v5252_v6 }
 0x5c3   : > { %4763 = vmatpush3.bf16.msra.mxu1 %v5252_v6 }
 0x678   : > { %v4734_v30 = vpop.f32.mrb[64].mxu1 }
 0x679   : > { %v3612_v41 = vpop.f32.mrb[65].mxu1 }
 0x67a   : > { %v4735_v34 = vpop.f32.mrb[66].mxu1 }
 0x67b   : > { %v3615_v27 = vpop.f32.mrb[67].mxu1 }
 0x67c   : > { %v3677_v23 = vadd.f32 %v3615_v27, %v3612_v41 }
 0x67e   : > { %v3678_v46 = vadd.f32 %v4734_v30, %v3677_v23 }
 0x680   : > { %v4738_v8 = vpop.f32.mrb[68].mxu1  ;;  %v3679_v33 = vadd.f32 %v4735_v34, %v3678_v46 }
 0x681   : > { %v3628_v52 = vpop.f32.mrb[69].mxu1 }
 0x682   : > { %v3680_v28 = vadd.f32 %v3679_v33, %v3628_v52  ;;  %v4739_v50 = vpop.f32.mrb[70].mxu1 }
 0x683   : > { %v3631_v26 = vpop.f32.mrb[71].mxu1 }
 0x684   : > { %v3681_v42 = vadd.f32 %v3680_v28, %v3631_v26 }
 0x686   : > { %v3682_v13 = vadd.f32 %v4738_v8, %v3681_v42 }
 0x688   : > { %v4742_v3 = vpop.f32.mrb[72].mxu1  ;;  %v3683_v24 = vadd.f32 %v4739_v50, %v3682_v13 }
 0x689   : > { %v3644_v18 = vpop.f32.mrb[73].mxu1 }
 0x68a   : > { %v3684_v61 = vadd.f32 %v3683_v24, %v3644_v18  ;;  %v4743_v12 = vpop.f32.mrb[74].mxu1 }
 0x68b   : > { %v3647_v20 = vpop.f32.mrb[75].mxu1 }
 0x68c   : > { %v3685_v16 = vadd.f32 %v3684_v61, %v3647_v20 }
 0x68e   : > { %v3686_v58 = vadd.f32 %v4742_v3, %v3685_v16 }
 0x690   : > { %v4746_v38 = vpop.f32.mrb[76].mxu1  ;;  %v3687_v10 = vadd.f32 %v4743_v12, %v3686_v58 }
 0x691   : > { %v3660_v36 = vpop.f32.mrb[77].mxu1 }
 0x692   : > { %v3688_v25 = vadd.f32 %v3687_v10, %v3660_v36  ;;  %v4747_v1 = vpop.f32.mrb[78].mxu1 }
 0x693   : > { %v3663_v22 = vpop.f32.mrb[79].mxu1 }
 0x694   : > { %v3689_v19 = vadd.f32 %v3688_v25, %v3663_v22 }
 0x696   : > { %v3690_v63 = vadd.f32 %v4746_v38, %v3689_v19 }
 0x698   : > { %v3691_v17 = vadd.f32 %v4747_v1, %v3690_v63  ;;  %v3675_v63 = vld [vmem:[#allocation8 + $0x6] ss:$0 sm:$0xff] }
 0x69a   : > { %v3692_v45 = vrot.slane %v3691_v17, 4 }
 0x69c   : > { %v3693_v7 = vadd.f32 %v3692_v45, %v3691_v17 }
 0x69e   : > { %v3694_v47 = vrot.slane %v3693_v7, 2 }
 0x6a0   : > { %v3695_v51 = vadd.f32 %v3694_v47, %v3693_v7  ;;  %v3676_v7 = vld [vmem:[#allocation8 + $0x7] ss:$0 sm:$0xff] }
 0x6a2   : > { %v3696_v29 = vrot.slane %v3695_v51, 1 }
 0x6a4   : > { %v3697_v32 = vadd.f32 %v3696_v29, %v3695_v51 }
 0x6a6   : > { %v3698_v11 = vmul.f32 0.0078125, %v3697_v32 }
 0x6a8   : > { %v3699_v54 = vsub.f32 %v3612_v41, %v3698_v11  ;;  %v3700_v21 = vsub.f32 %v3615_v27, %v3698_v11  ;;  %v3701_v56 = vsub.f32 %v4734_v30, %v3698_v11  ;;  %v3702_v62 = vsub.f32 %v4735_v34, %v3698_v11 }
 0x6a9   : > { %v3703_v35 = vsub.f32 %v3628_v52, %v3698_v11  ;;  %v3704_v0 = vsub.f32 %v3631_v26, %v3698_v11  ;;  %v3705_v55 = vsub.f32 %v4738_v8, %v3698_v11  ;;  %v7468_v60 = vsub.f32 %v4739_v50, %v3698_v11 }
 0x6aa   : > { %v7470_v15 = vsub.f32 %v3644_v18, %v3698_v11  ;;  %v7472_v2 = vsub.f32 %v3647_v20, %v3698_v11  ;;  %v7474_v4 = vsub.f32 %v4742_v3, %v3698_v11  ;;  %v7476_v49 = vsub.f32 %v4743_v12, %v3698_v11 }
 0x6ab   : > { %v7478_v14 = vsub.f32 %v3660_v36, %v3698_v11  ;;  %v3712_v31 = vsub.f32 %v3663_v22, %v3698_v11  ;;  %v7480_v5 = vsub.f32 %v4746_v38, %v3698_v11  ;;  %v7482_v48 = vsub.f32 %v4747_v1, %v3698_v11 }
 0x6ac   : > { %v3715_v39 = vmul.f32 %v3699_v54, %v3699_v54  ;;  %v3716_v9 = vmul.f32 %v3700_v21, %v3700_v21  ;;  %v3717_v57 = vmul.f32 %v3701_v56, %v3701_v56  ;;  %v3718_v44 = vmul.f32 %v3702_v62, %v3702_v62 }
 0x6ad   : > { %v3719_v30 = vmul.f32 %v3703_v35, %v3703_v35  ;;  %v3720_v37 = vmul.f32 %v3704_v0, %v3704_v0  ;;  %v3721_v27 = vmul.f32 %v3705_v55, %v3705_v55  ;;  %v3722_v59 = vmul.f32 %v7468_v60, %v7468_v60 }
 0x6ae   : > { %v3731_v43 = vadd.f32 %v3716_v9, %v3715_v39  ;;  %v3723_v8 = vmul.f32 %v7470_v15, %v7470_v15  ;;  %v3724_v52 = vmul.f32 %v7472_v2, %v7472_v2  ;;  %v3725_v28 = vmul.f32 %v7474_v4, %v7474_v4 }
 0x6af   : > { %v3726_v26 = vmul.f32 %v7476_v49, %v7476_v49  ;;  %v3727_v6 = vmul.f32 %v7478_v14, %v7478_v14  ;;  %v3728_v3 = vmul.f32 %v3712_v31, %v3712_v31  ;;  %v3729_v18 = vmul.f32 %v7480_v5, %v7480_v5 }
 0x6b0   : > { %v3732_v40 = vadd.f32 %v3731_v43, %v3717_v57  ;;  %v3730_v12 = vmul.f32 %v7482_v48, %v7482_v48 }
 0x6b2   : > { %v3733_v41 = vadd.f32 %v3732_v40, %v3718_v44 }
 0x6b4   : > { %v3734_v34 = vadd.f32 %v3733_v41, %v3719_v30 }
 0x6b6   : > { %v3735_v23 = vadd.f32 %v3734_v34, %v3720_v37 }
 0x6b8   : > { %v3736_v46 = vadd.f32 %v3735_v23, %v3721_v27 }
 0x6ba   : > { %v3737_v33 = vadd.f32 %v3736_v46, %v3722_v59 }
 0x6bc   : > { %v3738_v53 = vadd.f32 %v3737_v33, %v3723_v8 }
 0x6be   : > { %v3739_v50 = vadd.f32 %v3738_v53, %v3724_v52 }
 0x6c0   : > { %v3740_v42 = vadd.f32 %v3739_v50, %v3725_v28 }
 0x6c2   : > { %v3741_v13 = vadd.f32 %v3740_v42, %v3726_v26 }
 0x6c4   : > { %v3742_v24 = vadd.f32 %v3741_v13, %v3727_v6 }
 0x6c6   : > { %v3743_v61 = vadd.f32 %v3742_v24, %v3728_v3 }
 0x6c8   : > { %v3744_v20 = vadd.f32 %v3743_v61, %v3729_v18 }
 0x6ca   : > { %v3745_v16 = vadd.f32 %v3744_v20, %v3730_v12 }
 0x6cc   : > { %v3746_v58 = vrot.slane %v3745_v16, 4 }
 0x6ce   : > { %v3747_v38 = vadd.f32 %v3746_v58, %v3745_v16 }
 0x6d0   : > { %v3748_v10 = vrot.slane %v3747_v38, 2 }
 0x6d2   : > { %v3749_v36 = vadd.f32 %v3748_v10, %v3747_v38 }
 0x6d4   : > { %v3750_v25 = vrot.slane %v3749_v36, 1 }
 0x6d6   : > { %v3751_v1 = vadd.f32 %v3750_v25, %v3749_v36 }
 0x6d8   : > { %v3752_v22 = vmul.f32 0.0078125, %v3751_v1 }
 0x6da   : > { %v3753_v19 = vadd.f32 1e-05, %v3752_v22  ;;  %v5254_v22 = vld [vmem:[#allocation7 + $0x8] sm:$0xff]  }
 0x6dc   : > { %5275 = vrsqrt.f32 %v3753_v19  ;;  %v5256_v19 = vld [vmem:[#allocation7 + $0x18] sm:$0xff]  }
 0x6e6   : > { %v5276_v17 = vpop.eup %5275 }
 0x6e7   : > { %v3755_v45 = vmul.f32 %v5276_v17, %v3675_v63 }
 0x6e9   : > { %v3769_v47 = vmul.f32 %v3755_v45, %v3712_v31  ;;  %v3756_v51 = vmul.f32 %v3755_v45, %v3699_v54  ;;  %v3757_v29 = vmul.f32 %v3755_v45, %v3700_v21  ;;  %v3758_v32 = vmul.f32 %v3755_v45, %v3701_v56 }
 0x6ea   : > { %v3759_v11 = vmul.f32 %v3755_v45, %v3702_v62  ;;  %v3760_v39 = vmul.f32 %v3755_v45, %v3703_v35  ;;  %v3761_v9 = vmul.f32 %v3755_v45, %v3704_v0  ;;  %v3762_v57 = vmul.f32 %v3755_v45, %v3705_v55 }
 0x6eb   : > { %v3785_v43 = vadd.f32 %v3769_v47, %v3676_v7  ;;  %v3772_v44 = vadd.f32 %v3756_v51, %v3676_v7  ;;  %v3773_v40 = vadd.f32 %v3757_v29, %v3676_v7  ;;  %v3774_v30 = vadd.f32 %v3758_v32, %v3676_v7  ;;  %v5258_v29 = vld [vmem:[#allocation7 + $0x28] sm:$0xff]  }
 0x6ec   : > { %v3775_v41 = vadd.f32 %v3759_v11, %v3676_v7  ;;  %v3776_v37 = vadd.f32 %v3760_v39, %v3676_v7  ;;  %v3777_v34 = vadd.f32 %v3761_v9, %v3676_v7  ;;  %v3763_v27 = vmul.f32 %v3755_v45, %v7468_v60 }
 0x6ed   : > { %v3788_v23 = vmax.f32 %v3772_v44, 0.0  ;;  %v3789_v59 = vmax.f32 %v3773_v40, 0.0  ;;  %v3790_v46 = vmax.f32 %v3774_v30, 0.0  ;;  %v3778_v31 = vadd.f32 %v3762_v57, %v3676_v7  ;;  %v5259_v57 = vld [vmem:[#allocation7 + $0x30] sm:$0xff]  }
 0x6ee   : > { %v3791_v54 = vmax.f32 %v3775_v41, 0.0  ;;  %v3792_v21 = vmax.f32 %v3776_v37, 0.0  ;;  %v3793_v56 = vmax.f32 %v3777_v34, 0.0  ;;  %v3779_v62 = vadd.f32 %v3763_v27, %v3676_v7  ;;  %v5260_v41 = vld [vmem:[#allocation7 + $0x38] sm:$0xff]  }
 0x6ef   : > { %v3804_v35 = vpack.c.bf16 %v3789_v59, %v3788_v23  ;;  %v3794_v0 = vmax.f32 %v3778_v31, 0.0  ;;  %v3764_v55 = vmul.f32 %v3755_v45, %v7470_v15  ;;  %v3765_v8 = vmul.f32 %v3755_v45, %v7472_v2 }
 0x6f0   : > { %v3805_v33 = vpack.c.bf16 %v3791_v54, %v3790_v46  ;;  %v3806_v52 = vpack.c.bf16 %v3793_v56, %v3792_v21  ;;  %v3795_v53 = vmax.f32 %v3779_v62, 0.0  ;;  %v3766_v28 = vmul.f32 %v3755_v45, %v7474_v4 }
 0x6f1   : > { %4764 = vmatprep.mubr.bf16.mxu1 %v3804_v35  ;;  %v3780_v60 = vadd.f32 %v3764_v55, %v3676_v7  ;;  %v3781_v50 = vadd.f32 %v3765_v8, %v3676_v7  ;;  %v3767_v26 = vmul.f32 %v3755_v45, %v7476_v49  ;;  %v3768_v42 = vmul.f32 %v3755_v45, %v7478_v14 }
 0x6f2   : > { %4765 = vmatmul.mubr.bf16.vlgmr.msra.gmra.mrb[80].mxu1 %v3805_v33  ;;  %v3807_v6 = vpack.c.bf16 %v3795_v53, %v3794_v0  ;;  %v3782_v13 = vadd.f32 %v3766_v28, %v3676_v7  ;;  %v3801_v3 = vmax.f32 %v3785_v43, 0.0  ;;  %v3770_v15 = vmul.f32 %v3755_v45, %v7480_v5  ;;  %v5253_v5 = vld [vmem:[#allocation7] sm:$0xff]  }
 0x6f3   : > { %4768 = vmatprep.mubr.bf16.mxu1 %v3806_v52  ;;  %v3796_v2 = vmax.f32 %v3780_v60, 0.0  ;;  %v3797_v24 = vmax.f32 %v3781_v50, 0.0  ;;  %v3783_v18 = vadd.f32 %v3767_v26, %v3676_v7  ;;  %v3784_v61 = vadd.f32 %v3768_v42, %v3676_v7  ;;  %4780 = vmatprep.subr.bf16.mxu0 %v5253_v5 }
 0x6f4   : > { %v3798_v12 = vmax.f32 %v3782_v13, 0.0  ;;  %v3771_v4 = vmul.f32 %v3755_v45, %v7482_v48  ;;  %v3786_v20 = vadd.f32 %v3770_v15, %v3676_v7  ;;  %4812 = vmatprep.subr.bf16.mxu1 %v5253_v5  ;;  %4781 = vmatpush3.bf16.msra.mxu0 %v5253_v5  ;;  %v5255_v48 = vld [vmem:[#allocation7 + $0x10] sm:$0xff]   ;;  %v5257_v45 = vld [vmem:[#allocation7 + $0x20] sm:$0xff]  }
 0x6f5   : > { %v3808_v16 = vpack.c.bf16 %v3797_v24, %v3796_v2  ;;  %v3799_v58 = vmax.f32 %v3783_v18, 0.0  ;;  %v3800_v49 = vmax.f32 %v3784_v61, 0.0  ;;  %4820 = vmatpush3.bf16.msra.mxu1 %v5253_v5  ;;  %4782 = vmatprep.subr.bf16.mxu0 %v5254_v22 }
 0x6f6   : > { %v3787_v38 = vadd.f32 %v3771_v4, %v3676_v7  ;;  %v3802_v14 = vmax.f32 %v3786_v20, 0.0  ;;  %4813 = vmatprep.subr.bf16.mxu1 %v5254_v22 }
 0x6f7   : > { %v3809_v10 = vpack.c.bf16 %v3799_v58, %v3798_v12  ;;  %v3810_v36 = vpack.c.bf16 %v3801_v3, %v3800_v49 }
 0x6f8   : > { %v3803_v25 = vmax.f32 %v3787_v38, 0.0  ;;  %4783 = vmatpush3.bf16.msra.mxu0 %v5254_v22 }
 0x6f9   : > { %4821 = vmatpush3.bf16.msra.mxu1 %v5254_v22  ;;  %4784 = vmatprep.subr.bf16.mxu0 %v5255_v48 }
 0x6fa   : > { %4769 = vmatmul.mubr.bf16.gmra.mrb[84].mxu1 %v3807_v6  ;;  %v3811_v1 = vpack.c.bf16 %v3803_v25, %v3802_v14  ;;  %4814 = vmatprep.subr.bf16.mxu1 %v5255_v48 }
 0x6fb   : > { %4772 = vmatprep.mubr.bf16.mxu1 %v3808_v16 }
 0x6fc   : > { %4785 = vmatpush3.bf16.msra.mxu0 %v5255_v48 }
 0x6fd   : > { %4822 = vmatpush3.bf16.msra.mxu1 %v5255_v48  ;;  %4786 = vmatprep.subr.bf16.mxu0 %v5256_v19 }
 0x6fe   : > { %4815 = vmatprep.subr.bf16.mxu1 %v5256_v19 }
 0x700   : > { %4787 = vmatpush3.bf16.msra.mxu0 %v5256_v19 }
 0x701   : > { %4823 = vmatpush3.bf16.msra.mxu1 %v5256_v19  ;;  %4788 = vmatprep.subr.bf16.mxu0 %v5257_v45 }
 0x702   : > { %4773 = vmatmul.mubr.bf16.gmra.mrb[88].mxu1 %v3809_v10  ;;  %4816 = vmatprep.subr.bf16.mxu1 %v5257_v45 }
 0x703   : > { %4776 = vmatprep.mubr.bf16.mxu1 %v3810_v36 }
 0x704   : > { %4789 = vmatpush3.bf16.msra.mxu0 %v5257_v45 }
 0x705   : > { %4824 = vmatpush3.bf16.msra.mxu1 %v5257_v45  ;;  %4790 = vmatprep.subr.bf16.mxu0 %v5258_v29 }
 0x706   : > { %4817 = vmatprep.subr.bf16.mxu1 %v5258_v29 }
 0x708   : > { %4791 = vmatpush3.bf16.msra.mxu0 %v5258_v29 }
 0x709   : > { %4825 = vmatpush3.bf16.msra.mxu1 %v5258_v29  ;;  %4792 = vmatprep.subr.bf16.mxu0 %v5259_v57 }
 0x70a   : > { %4777 = vmatmul.mubr.bf16.gmra.mrb[92].mxu1 %v3811_v1  ;;  %4818 = vmatprep.subr.bf16.mxu1 %v5259_v57 }
 0x70c   : > { %4793 = vmatpush3.bf16.msra.mxu0 %v5259_v57 }
 0x70d   : > { %4826 = vmatpush3.bf16.msra.mxu1 %v5259_v57  ;;  %4794 = vmatprep.subr.bf16.mxu0 %v5260_v41 }
 0x70e   : > { %4819 = vmatprep.subr.bf16.mxu1 %v5260_v41 }
 0x710   : > { %4795 = vmatpush3.bf16.msra.mxu0 %v5260_v41 }
 0x711   : > { %4827 = vmatpush3.bf16.msra.mxu1 %v5260_v41 }
 0x7c5   : > { %v7508_v63 = vpop.f32.mrb[80].mxu1 }
 0x7c6   : > { %v3910_v17 = vpop.f32.mrb[81].mxu1 }
 0x7c7   : > { %v4767_v7 = vpop.f32.mrb[82].mxu1 }
 0x7c8   : > { %v3913_v47 = vpop.f32.mrb[83].mxu1 }
 0x7c9   : > { %v3975_v51 = vadd.f32 %v3913_v47, %v3910_v17 }
 0x7cb   : > { %v3976_v32 = vadd.f32 %v7508_v63, %v3975_v51 }
 0x7cd   : > { %v4770_v11 = vpop.f32.mrb[84].mxu1  ;;  %v3977_v39 = vadd.f32 %v4767_v7, %v3976_v32 }
 0x7ce   : > { %v3926_v9 = vpop.f32.mrb[85].mxu1 }
 0x7cf   : > { %v3978_v43 = vadd.f32 %v3977_v39, %v3926_v9  ;;  %v4771_v44 = vpop.f32.mrb[86].mxu1 }
 0x7d0   : > { %v3929_v40 = vpop.f32.mrb[87].mxu1 }
 0x7d1   : > { %v3979_v30 = vadd.f32 %v3978_v43, %v3929_v40 }
 0x7d3   : > { %v3980_v37 = vadd.f32 %v4770_v11, %v3979_v30 }
 0x7d5   : > { %v4774_v34 = vpop.f32.mrb[88].mxu1  ;;  %v3981_v27 = vadd.f32 %v4771_v44, %v3980_v37 }
 0x7d6   : > { %v3942_v23 = vpop.f32.mrb[89].mxu1 }
 0x7d7   : > { %v3982_v59 = vadd.f32 %v3981_v27, %v3942_v23  ;;  %v4775_v46 = vpop.f32.mrb[90].mxu1 }
 0x7d8   : > { %v3945_v31 = vpop.f32.mrb[91].mxu1 }
 0x7d9   : > { %v3983_v54 = vadd.f32 %v3982_v59, %v3945_v31 }
 0x7db   : > { %v3984_v21 = vadd.f32 %v4774_v34, %v3983_v54 }
 0x7dd   : > { %v4778_v56 = vpop.f32.mrb[92].mxu1  ;;  %v3985_v62 = vadd.f32 %v4775_v46, %v3984_v21 }
 0x7de   : > { %v3958_v35 = vpop.f32.mrb[93].mxu1 }
 0x7df   : > { %v3986_v0 = vadd.f32 %v3985_v62, %v3958_v35  ;;  %v4779_v55 = vpop.f32.mrb[94].mxu1 }
 0x7e0   : > { %v3961_v8 = vpop.f32.mrb[95].mxu1 }
 0x7e1   : > { %v3987_v33 = vadd.f32 %v3986_v0, %v3961_v8 }
 0x7e3   : > { %v3988_v52 = vadd.f32 %v4778_v56, %v3987_v33 }
 0x7e5   : > { %v3989_v53 = vadd.f32 %v4779_v55, %v3988_v52  ;;  %v3973_v52 = vld [vmem:[#allocation8 + $0x20] ss:$0 sm:$0xff] }
 0x7e7   : > { %v3990_v28 = vrot.slane %v3989_v53, 4 }
 0x7e9   : > { %v3991_v60 = vadd.f32 %v3990_v28, %v3989_v53 }
 0x7eb   : > { %v3992_v50 = vrot.slane %v3991_v60, 2 }
 0x7ed   : > { %v3993_v26 = vadd.f32 %v3992_v50, %v3991_v60  ;;  %v3974_v60 = vld [vmem:[#allocation8 + $0x21] ss:$0 sm:$0xff] }
 0x7ef   : > { %v3994_v42 = vrot.slane %v3993_v26, 1 }
 0x7f1   : > { %v3995_v6 = vadd.f32 %v3994_v42, %v3993_v26 }
 0x7f3   : > { %v3996_v13 = vmul.f32 0.0078125, %v3995_v6 }
 0x7f5   : > { %v3997_v3 = vsub.f32 %v3910_v17, %v3996_v13  ;;  %v3998_v15 = vsub.f32 %v3913_v47, %v3996_v13  ;;  %v7512_v2 = vsub.f32 %v7508_v63, %v3996_v13  ;;  %v7514_v24 = vsub.f32 %v4767_v7, %v3996_v13 }
 0x7f6   : > { %v7516_v18 = vsub.f32 %v3926_v9, %v3996_v13  ;;  %v7518_v61 = vsub.f32 %v3929_v40, %v3996_v13  ;;  %v7520_v12 = vsub.f32 %v4770_v11, %v3996_v13  ;;  %v7522_v4 = vsub.f32 %v4771_v44, %v3996_v13 }
 0x7f7   : > { %v4005_v20 = vsub.f32 %v3942_v23, %v3996_v13  ;;  %v4006_v16 = vsub.f32 %v3945_v31, %v3996_v13  ;;  %v4007_v58 = vsub.f32 %v4774_v34, %v3996_v13  ;;  %v4008_v49 = vsub.f32 %v4775_v46, %v3996_v13 }
 0x7f8   : > { %v7524_v38 = vsub.f32 %v3958_v35, %v3996_v13  ;;  %v4010_v14 = vsub.f32 %v3961_v8, %v3996_v13  ;;  %v7526_v10 = vsub.f32 %v4778_v56, %v3996_v13  ;;  %v7528_v36 = vsub.f32 %v4779_v55, %v3996_v13 }
 0x7f9   : > { %v4013_v25 = vmul.f32 %v3997_v3, %v3997_v3  ;;  %v4014_v1 = vmul.f32 %v3998_v15, %v3998_v15  ;;  %v4015_v5 = vmul.f32 %v7512_v2, %v7512_v2  ;;  %v4016_v48 = vmul.f32 %v7514_v24, %v7514_v24 }
 0x7fa   : > { %v4017_v63 = vmul.f32 %v7516_v18, %v7516_v18  ;;  %v4018_v45 = vmul.f32 %v7518_v61, %v7518_v61  ;;  %v4019_v47 = vmul.f32 %v7520_v12, %v7520_v12  ;;  %v4020_v29 = vmul.f32 %v7522_v4, %v7522_v4 }
 0x7fb   : > { %v4029_v22 = vadd.f32 %v4014_v1, %v4013_v25  ;;  %v4021_v11 = vmul.f32 %v4005_v20, %v4005_v20  ;;  %v4022_v9 = vmul.f32 %v4006_v16, %v4006_v16  ;;  %v4023_v43 = vmul.f32 %v4007_v58, %v4007_v58 }
 0x7fc   : > { %v4024_v40 = vmul.f32 %v4008_v49, %v4008_v49  ;;  %v4025_v41 = vmul.f32 %v7524_v38, %v7524_v38  ;;  %v4026_v34 = vmul.f32 %v4010_v14, %v4010_v14  ;;  %v4027_v23 = vmul.f32 %v7526_v10, %v7526_v10 }
 0x7fd   : > { %v4030_v19 = vadd.f32 %v4029_v22, %v4015_v5  ;;  %v4028_v46 = vmul.f32 %v7528_v36, %v7528_v36 }
 0x7ff   : > { %v4031_v17 = vadd.f32 %v4030_v19, %v4016_v48 }
 0x801   : > { %v4032_v7 = vadd.f32 %v4031_v17, %v4017_v63 }
 0x803   : > { %v4033_v51 = vadd.f32 %v4032_v7, %v4018_v45 }
 0x805   : > { %v4034_v32 = vadd.f32 %v4033_v51, %v4019_v47 }
 0x807   : > { %v4035_v39 = vadd.f32 %v4034_v32, %v4020_v29 }
 0x809   : > { %v4036_v57 = vadd.f32 %v4035_v39, %v4021_v11 }
 0x80b   : > { %v4037_v44 = vadd.f32 %v4036_v57, %v4022_v9 }
 0x80d   : > { %v4038_v30 = vadd.f32 %v4037_v44, %v4023_v43 }
 0x80f   : > { %v4039_v37 = vadd.f32 %v4038_v30, %v4024_v40 }
 0x811   : > { %v4040_v27 = vadd.f32 %v4039_v37, %v4025_v41 }
 0x813   : > { %v4041_v59 = vadd.f32 %v4040_v27, %v4026_v34 }
 0x815   : > { %v4042_v31 = vadd.f32 %v4041_v59, %v4027_v23 }
 0x817   : > { %v4043_v54 = vadd.f32 %v4042_v31, %v4028_v46 }
 0x819   : > { %v4044_v21 = vrot.slane %v4043_v54, 4 }
 0x81b   : > { %v4045_v56 = vadd.f32 %v4044_v21, %v4043_v54 }
 0x81d   : > { %v4046_v62 = vrot.slane %v4045_v56, 2 }
 0x81f   : > { %v4047_v35 = vadd.f32 %v4046_v62, %v4045_v56 }
 0x821   : > { %v4048_v0 = vrot.slane %v4047_v35, 1 }
 0x823   : > { %v4049_v55 = vadd.f32 %v4048_v0, %v4047_v35 }
 0x825   : > { %v4050_v8 = vmul.f32 0.0078125, %v4049_v55 }
 0x827   : > { %v4051_v33 = vadd.f32 1e-05, %v4050_v8 }
 0x829   : > { %5277 = vrsqrt.f32 %v4051_v33 }
 0x833   : > { %v5278_v53 = vpop.eup %5277 }
 0x834   : > { %v4053_v28 = vmul.f32 %v5278_v53, %v3973_v52 }
 0x836   : > { %v4065_v50 = vmul.f32 %v4053_v28, %v4008_v49  ;;  %v4067_v26 = vmul.f32 %v4053_v28, %v4010_v14  ;;  %v4054_v42 = vmul.f32 %v4053_v28, %v3997_v3  ;;  %v4055_v6 = vmul.f32 %v4053_v28, %v3998_v15 }
 0x837   : > { %v4062_v13 = vmul.f32 %v4053_v28, %v4005_v20  ;;  %v4063_v25 = vmul.f32 %v4053_v28, %v4006_v16  ;;  %v4056_v1 = vmul.f32 %v4053_v28, %v7512_v2  ;;  %v4057_v5 = vmul.f32 %v4053_v28, %v7514_v24 }
 0x838   : > { %v4083_v22 = vadd.f32 %v4067_v26, %v3974_v60  ;;  %v4070_v48 = vadd.f32 %v4054_v42, %v3974_v60  ;;  %v4071_v19 = vadd.f32 %v4055_v6, %v3974_v60  ;;  %v4064_v63 = vmul.f32 %v4053_v28, %v4007_v58 }
 0x839   : > { %v4078_v17 = vadd.f32 %v4062_v13, %v3974_v60  ;;  %v4079_v45 = vadd.f32 %v4063_v25, %v3974_v60  ;;  %v4072_v7 = vadd.f32 %v4056_v1, %v3974_v60  ;;  %v4073_v47 = vadd.f32 %v4057_v5, %v3974_v60 }
 0x83a   : > { %v4086_v51 = vmax.f32 %v4070_v48, 0.0  ;;  %v4087_v29 = vmax.f32 %v4071_v19, 0.0  ;;  %v4080_v49 = vadd.f32 %v4064_v63, %v3974_v60  ;;  %v4081_v14 = vadd.f32 %v4065_v50, %v3974_v60 }
 0x83b   : > { %v4094_v3 = vmax.f32 %v4078_v17, 0.0  ;;  %v4095_v15 = vmax.f32 %v4079_v45, 0.0  ;;  %v4088_v20 = vmax.f32 %v4072_v7, 0.0  ;;  %v4089_v16 = vmax.f32 %v4073_v47, 0.0 }
 0x83c   : > { %v4102_v32 = vpack.c.bf16 %v4087_v29, %v4086_v51  ;;  %v4096_v2 = vmax.f32 %v4080_v49, 0.0  ;;  %v4097_v11 = vmax.f32 %v4081_v14, 0.0  ;;  %v4058_v24 = vmul.f32 %v4053_v28, %v7516_v18 }
 0x83d   : > { %v4106_v39 = vpack.c.bf16 %v4095_v15, %v4094_v3  ;;  %v4103_v9 = vpack.c.bf16 %v4089_v16, %v4088_v20  ;;  %v4059_v58 = vmul.f32 %v4053_v28, %v7518_v61  ;;  %v4066_v57 = vmul.f32 %v4053_v28, %v7524_v38 }
 0x83e   : > { %4796 = vmatprep.mubr.bf16.mxu0 %v4102_v32  ;;  %v4107_v43 = vpack.c.bf16 %v4097_v11, %v4096_v2  ;;  %v4074_v44 = vadd.f32 %v4058_v24, %v3974_v60  ;;  %v4060_v40 = vmul.f32 %v4053_v28, %v7520_v12  ;;  %v4099_v37 = vmax.f32 %v4083_v22, 0.0 }
 0x83f   : > { %4804 = vmatprep.mubr.bf16.mxu1 %v4106_v39  ;;  %4797 = vmatmul.mubr.bf16.vlgmr.msra.gmra.mrb[64].mxu0 %v4103_v9  ;;  %v4075_v30 = vadd.f32 %v4059_v58, %v3974_v60  ;;  %v4082_v41 = vadd.f32 %v4066_v57, %v3974_v60  ;;  %v4061_v34 = vmul.f32 %v4053_v28, %v7522_v4 }
 0x840   : > { %4805 = vmatmul.mubr.bf16.vlgmr.msra.gmra.mrb[96].mxu1 %v4107_v43  ;;  %v4090_v18 = vmax.f32 %v4074_v44, 0.0  ;;  %v4076_v27 = vadd.f32 %v4060_v40, %v3974_v60  ;;  %v4068_v23 = vmul.f32 %v4053_v28, %v7526_v10  ;;  %v4069_v61 = vmul.f32 %v4053_v28, %v7528_v36  ;;  %v4110_v10 = vld [vmem:[#allocation8 + $0x22] ss:$0 sm:$0xff] }
 0x841   : > { %v4091_v38 = vmax.f32 %v4075_v30, 0.0  ;;  %v4098_v59 = vmax.f32 %v4082_v41, 0.0  ;;  %v4077_v46 = vadd.f32 %v4061_v34, %v3974_v60 }
 0x842   : > { %v4092_v31 = vmax.f32 %v4076_v27, 0.0  ;;  %v4084_v12 = vadd.f32 %v4068_v23, %v3974_v60  ;;  %v4085_v54 = vadd.f32 %v4069_v61, %v3974_v60 }
 0x843   : > { %v4104_v21 = vpack.c.bf16 %v4091_v38, %v4090_v18  ;;  %v4108_v56 = vpack.c.bf16 %v4099_v37, %v4098_v59  ;;  %v4093_v62 = vmax.f32 %v4077_v46, 0.0 }
 0x844   : > { %v4100_v35 = vmax.f32 %v4084_v12, 0.0  ;;  %v4101_v0 = vmax.f32 %v4085_v54, 0.0 }
 0x845   : > { %4800 = vmatprep.mubr.bf16.mxu0 %v4104_v21  ;;  %4808 = vmatprep.mubr.bf16.mxu1 %v4108_v56  ;;  %v4105_v4 = vpack.c.bf16 %v4093_v62, %v4092_v31 }
 0x846   : > { %v4109_v55 = vpack.c.bf16 %v4101_v0, %v4100_v35 }
 0x847   : > { %4801 = vmatmul.mubr.bf16.gmra.mrb[68].mxu0 %v4105_v4 }
 0x848   : > { %4809 = vmatmul.mubr.bf16.gmra.mrb[100].mxu1 %v4109_v55 }
 0x912   : > { %v4798_v36 = vpop.f32.mrb[64].mxu0 }
 0x913   : > { %v4218_v8 = vadd.f32 %v4798_v36, %v4110_v10  ;;  %v4806_v33 = vpop.f32.mrb[96].mxu1  ;;  %v4209_v52 = vpop.f32.mrb[65].mxu0 }
 0x914   : > { %v4250_v53 = vadd.f32 %v4806_v33, %v4110_v10  ;;  %v4210_v28 = vadd.f32 %v4209_v52, %v4110_v10  ;;  %v4241_v60 = vpop.f32.mrb[97].mxu1  ;;  %v4799_v50 = vpop.f32.mrb[66].mxu0 }
 0x915   : > { %4274 = vst [vmem:[%s7561_s28 + $0x10] sm:$0xff] %v4218_v8  ;;  %v4242_v26 = vadd.f32 %v4241_v60, %v4110_v10  ;;  %v4221_v42 = vadd.f32 %v4799_v50, %v4110_v10  ;;  %v4807_v6 = vpop.f32.mrb[98].mxu1  ;;  %v4212_v13 = vpop.f32.mrb[67].mxu0 }
 0x916   : > { %4282 = vst [vmem:[%s7561_s28 + $0x50] sm:$0xff] %v4250_v53  ;;  %4272 = vst [vmem:[%s7561_s28] sm:$0xff] %v4210_v28  ;;  %v4253_v25 = vadd.f32 %v4807_v6, %v4110_v10  ;;  %v4213_v1 = vadd.f32 %v4212_v13, %v4110_v10  ;;  %v4244_v5 = vpop.f32.mrb[99].mxu1 }
 0x917   : > { %4280 = vst [vmem:[%s7561_s28 + $0x40] sm:$0xff] %v4242_v26  ;;  %4275 = vst [vmem:[%s7561_s28 + $0x18] sm:$0xff] %v4221_v42  ;;  %v4245_v22 = vadd.f32 %v4244_v5, %v4110_v10 }
 0x918   : > { %4283 = vst [vmem:[%s7561_s28 + $0x58] sm:$0xff] %v4253_v25  ;;  %4273 = vst [vmem:[%s7561_s28 + $0x8] sm:$0xff] %v4213_v1 }
 0x919   : > { %4281 = vst [vmem:[%s7561_s28 + $0x48] sm:$0xff] %v4245_v22 }
 0x91a   : > { %v4802_v48 = vpop.f32.mrb[68].mxu0 }
 0x91b   : > { %v4234_v19 = vadd.f32 %v4802_v48, %v4110_v10  ;;  %v4810_v63 = vpop.f32.mrb[100].mxu1  ;;  %v4225_v17 = vpop.f32.mrb[69].mxu0 }
 0x91c   : > { %v4266_v45 = vadd.f32 %v4810_v63, %v4110_v10  ;;  %v4226_v7 = vadd.f32 %v4225_v17, %v4110_v10  ;;  %v4257_v47 = vpop.f32.mrb[101].mxu1  ;;  %v4803_v51 = vpop.f32.mrb[70].mxu0 }
 0x91d   : > { %4278 = vst [vmem:[%s7561_s28 + $0x30] sm:$0xff] %v4234_v19  ;;  %v4258_v29 = vadd.f32 %v4257_v47, %v4110_v10  ;;  %v4237_v49 = vadd.f32 %v4803_v51, %v4110_v10  ;;  %v4811_v14 = vpop.f32.mrb[102].mxu1  ;;  %v4228_v3 = vpop.f32.mrb[71].mxu0 }
 0x91e   : > { %4286 = vst [vmem:[%s7561_s28 + $0x70] sm:$0xff] %v4266_v45  ;;  %4276 = vst [vmem:[%s7561_s28 + $0x20] sm:$0xff] %v4226_v7  ;;  %v4269_v15 = vadd.f32 %v4811_v14, %v4110_v10  ;;  %v4229_v20 = vadd.f32 %v4228_v3, %v4110_v10  ;;  %v4260_v16 = vpop.f32.mrb[103].mxu1 }
 0x91f   : > { %4284 = vst [vmem:[%s7561_s28 + $0x60] sm:$0xff] %v4258_v29  ;;  %4279 = vst [vmem:[%s7561_s28 + $0x38] sm:$0xff] %v4237_v49  ;;  %v4261_v32 = vadd.f32 %v4260_v16, %v4110_v10 }
 0x920   : > { %4287 = vst [vmem:[%s7561_s28 + $0x78] sm:$0xff] %v4269_v15  ;;  %4277 = vst [vmem:[%s7561_s28 + $0x28] sm:$0xff] %v4229_v20 }
 0x921   : > { %4285 = vst [vmem:[%s7561_s28 + $0x68] sm:$0xff] %v4261_v32 }
 0x922 PF: > { %s21_s27 = sadd.s32 1, %s5409_s27  }
 0x923   : > { %p18_p3 = scmp.ge.s32.totalorder %s21_s27, 4  }
 0x925   :  { %20 = sbr.rel (!%p18_p3) target bundleno = 3 (0x3), region = 102 }
 0x92c   :  { %4310 = vsyncpa [#allocation4], 1 }
 0x92d   :  { %4312 = vsyncpa [#allocation4 + $0x1], 1 }
 0x92e   :  { %4313 = vsyncpa [#allocation6], 1 }
 0x92f   :  { %4314 = vsyncpa [#allocation9], 1 }

</bundles_post_ra>
